<compile_context>
chip_gen: v6e
topology: v6e:2x2x1
jax: 0.10.0
libtpu: 0.0.40
codegen_flags: <defaults>
</compile_context>

<pallas_src>
import functools

import jax
import jax.numpy as jnp
import numpy as np
from jax import lax
from jax.experimental import pallas as pl
from jax.experimental.pallas import tpu as pltpu

_K = 5                                   # number of nearest neighbours (hardcoded in forward)
_PRED_LANE = 8                           # lane of the int slab holding the majority vote
_EPS = 1e-12                             # F.normalize eps
_INT32_MAX = int(np.iinfo(np.int32).max)


def _pn_fused_kernel(s_ref, q_ref, lab_ref, sc_ref, dist_ref, ip_ref):
    # s_ref   : [S, C, HWs]  support feature maps, native dtype (C on sublanes, HW on lanes)
    # q_ref   : [TQ, C, HWq] query feature-map tile, native dtype
    # lab_ref : [1, S] int32 support labels
    # sc_ref  : [TQ, WPAD] f32  cosine scores (lanes [0, way) valid, rest exactly 0)
    # dist_ref: [TQ, 128] f32   kNN distances (lanes [0, 5) valid)
    # ip_ref  : [TQ, 128] i32   lanes [0, 5) = neighbour indices, lane 8 = prediction
    s_img = s_ref[...].astype(jnp.float32)          # in-kernel cast (free VPU op)
    q_img = q_ref[...].astype(jnp.float32)
    lab = lab_ref[...]                               # [1, S] int32

    S = s_img.shape[0]
    TQ = q_img.shape[0]
    WPAD = sc_ref.shape[1]

    # ---- global average pool (adaptive_avg_pool2d(., 1)): mean over HW (lane axis).
    # The small [*, C] results are relaid out with C on lanes for the matmuls below.
    # TODO(synk): for very large HW (e.g. 196) this sublane/lane reduce could instead be a
    # dot against ones[HW] to run on the (idle) MXU; not worth it at HW <= ~25.
    s_pool = jnp.mean(s_img, axis=2)                 # [S, C]
    q_pool = jnp.mean(q_img, axis=2)                 # [TQ, C]

    # ---- F.normalize(p=2, dim=1, eps=1e-12)
    def l2norm(x):
        n = jnp.sqrt(jnp.sum(x * x, axis=1, keepdims=True))
        return x / jnp.maximum(n, _EPS)

    s_n = l2norm(s_pool)
    q_n = l2norm(q_pool)

    # ---- transposed one-hot labels, padded to WPAD classes (rows >= way are all-zero)
    iota_w = lax.broadcasted_iota(jnp.int32, (WPAD, S), 0)
    oh_t = (iota_w == lab).astype(jnp.float32)       # [WPAD, S]

    # ---- cosine distances (kept in f32 for kNN / tie-break parity)
    sim = lax.dot_general(q_n, s_n, (((1,), (1,)), ((), ())),
                          preferred_element_type=jnp.float32)      # [TQ, S]
    d = 1.0 - sim                                                  # exact f32 distances

    # ---- fused brute-force 5-NN: one combined-key int32 min per neighbour.
    # key = quantized_distance * SPAD + column_index  (monotone in d, ties -> lowest index).
    # Index recovered exactly from the low bits; exact f32 distance recovered off the serial
    # chain via a masked sum.  Distance quantization granularity ~2/(2^dist_bits) <= ~1.2e-7
    # (f32 rounding level) only affects near-tie ordering.
    spad = 1
    while spad < S:
        spad *= 2
    spad = max(spad, 2)
    dist_bits = min(31 - (spad.bit_length() - 1), 24)
    max_q = (1 << dist_bits) - 2
    scale = max_q / 2.0                               # d in [0, 2] -> [0, max_q], no overflow

    iota_s = lax.broadcasted_iota(jnp.int32, (TQ, S), 1)
    dq = (jnp.clip(d, 0.0, 2.0) * scale).astype(jnp.int32)
    dq = jnp.minimum(dq, max_q)                       # belt-and-suspenders vs f32 rounding
    key = dq * spad + iota_s                          # int32, < 2^31 - spad

    lane128 = lax.broadcasted_iota(jnp.int32, (TQ, 128), 1)
    dist_slab = jnp.zeros((TQ, 128), jnp.float32)
    ip_slab = jnp.zeros((TQ, 128), jnp.int32)
    sel_total = jnp.zeros((TQ, S), jnp.float32)
    for k in range(_K):
        kmin = jnp.min(key, axis=1, keepdims=True)                 # ONE reduce per neighbour
        idx = jnp.bitwise_and(kmin, spad - 1)                      # exact column index [TQ,1]
        sel = iota_s == idx                                        # one-hot of chosen column
        dk = jnp.sum(jnp.where(sel, d, 0.0), axis=1, keepdims=True)  # exact f32 dist (off chain)
        dist_slab = jnp.where(lane128 == k, dk, dist_slab)
        ip_slab = jnp.where(lane128 == k, idx, ip_slab)
        sel_total = sel_total + sel.astype(jnp.float32)
        key = jnp.where(sel, _INT32_MAX, key)                      # mask chosen element

    # ---- majority vote over the 5 neighbour labels (bincount().argmax(), lowest-id ties).
    # 0/1 x 0/1 matmul is exact in bf16 with f32 accumulation -> single MXU pass.
    counts = lax.dot_general(sel_total.astype(jnp.bfloat16), oh_t.astype(jnp.bfloat16),
                             (((1,), (1,)), ((), ())),
                             preferred_element_type=jnp.float32)   # [TQ, WPAD]
    maxc = jnp.max(counts, axis=1, keepdims=True)
    lane_w = lax.broadcasted_iota(jnp.int32, (TQ, WPAD), 1)
    pred = jnp.min(jnp.where(counts >= maxc, lane_w, WPAD), axis=1).astype(jnp.int32)
    ip_slab = jnp.where(lane128 == _PRED_LANE, pred[:, None], ip_slab)

    # ---- prototypes: per-class mean of normalized supports, then L2-normalize (f32, exact).
    proto = jnp.dot(oh_t, s_n, preferred_element_type=jnp.float32)  # [WPAD, C]
    cnt = jnp.sum(oh_t, axis=1, keepdims=True)                      # [WPAD, 1]
    proto = proto / jnp.maximum(cnt, 1.0)   # guard: padded/empty classes -> zero prototype
    pnorm = jnp.sqrt(jnp.sum(proto * proto, axis=1, keepdims=True))
    proto = proto / jnp.maximum(pnorm, _EPS)

    # ---- cosine scores (lane-dense store; lanes >= way are exactly 0)
    sc_ref[...] = lax.dot_general(q_n, proto, (((1,), (1,)), ((), ())),
                                  preferred_element_type=jnp.float32)
    dist_ref[...] = dist_slab
    ip_ref[...] = ip_slab


def _to_kernel_layout(x):
    """[N, C, H, W] -> [N, C, H*W] (free reshape, no transpose, no dtype change);
    2-D [N, C] -> [N, C, 1]."""
    if x.ndim == 4:
        n, c, h, w = x.shape
        return x.reshape(n, c, h * w)
    assert x.ndim == 2
    n, c = x.shape
    return x.reshape(n, c, 1)


def _padded_nbytes(shape, dtype):
    """Rough VMEM footprint of a block, accounting for (8, 128) tile padding."""
    s = list(shape)
    if len(s) >= 1:
        s[-1] = -(-s[-1] // 128) * 128
    if len(s) >= 2:
        s[-2] = -(-s[-2] // 8) * 8
    return int(np.prod(s)) * jnp.dtype(dtype).itemsize


@functools.partial(jax.jit, static_argnames=("way", "q_tile"))
def pn_head_forward(proto_support_images, proto_support_labels, query_images, *,
                    way, q_tile=None):
    """Mirrors PN_head.forward.

    Returns (classification_scores, indices, distances, test_predictions, scores).
    `way` must be a static Python int (number of classes in the episode).
    """
    s_img = _to_kernel_layout(proto_support_images)   # [S, C, HWs], native dtype
    q_img = _to_kernel_layout(query_images)           # [Q, C, HWq], native dtype
    S, C, HW_s = s_img.shape
    Q, _, HW_q = q_img.shape
    if S < _K:
        raise ValueError(f"need at least {_K} support examples, got {S}")
    labels = proto_support_labels.astype(jnp.int32).reshape(1, S)

    wpad = max(128, ((way + 127) // 128) * 128)        # lane-dense score slab width
    if q_tile is None:
        q_tile = Q if Q <= 128 else 128                # f32-sublane friendly query tile
    q_tile = min(q_tile, Q)
    num_q_tiles = pl.cdiv(Q, q_tile)

    # Right-sized scoped-VMEM budget: double-buffered blocks + slack for in-kernel temporaries.
    # TODO(synk): the support block stays fully resident; huge support sets would also need an
    # S-tiling / streaming pass to fit v7x's 64 MiB VMEM.
    block_bytes = (_padded_nbytes((S, C, HW_s), s_img.dtype)
                   + _padded_nbytes((q_tile, C, HW_q), q_img.dtype)
                   + _padded_nbytes((1, S), jnp.int32)
                   + _padded_nbytes((q_tile, wpad), jnp.float32)
                   + 2 * _padded_nbytes((q_tile, 128), jnp.float32))
    temp_bytes = 2 * (_padded_nbytes((S, C, HW_s), jnp.float32)
                      + _padded_nbytes((q_tile, C, HW_q), jnp.float32)
                      + 4 * _padded_nbytes((S, C), jnp.float32)
                      + 4 * _padded_nbytes((q_tile, C), jnp.float32)
                      + 2 * _padded_nbytes((wpad, S), jnp.float32)
                      + 8 * _padded_nbytes((q_tile, S), jnp.float32)
                      + 2 * _padded_nbytes((q_tile, wpad), jnp.float32)
                      + 2 * _padded_nbytes((wpad, C), jnp.float32))
    vmem_limit = int(max(8 << 20, min(64 << 20, 2 * block_bytes + temp_bytes + (2 << 20))))

    out_shapes = (
        jax.ShapeDtypeStruct((Q, wpad), jnp.float32),   # scores slab
        jax.ShapeDtypeStruct((Q, 128), jnp.float32),    # distances slab
        jax.ShapeDtypeStruct((Q, 128), jnp.int32),      # indices + prediction slab
    )
    # TODO(synk): pl.Buffered(1) on the resident support spec would halve its VMEM footprint;
    # left off pending pipeline_mode support confirmation on this JAX version.
    sc_slab, dist_slab, ip_slab = pl.pallas_call(
        _pn_fused_kernel,
        out_shape=out_shapes,
        grid=(num_q_tiles,),
        in_specs=[
            pl.BlockSpec((S, C, HW_s), lambda i: (0, 0, 0)),        # support: resident block
            pl.BlockSpec((q_tile, C, HW_q), lambda i: (i, 0, 0)),   # query tile
            pl.BlockSpec((1, S), lambda i: (0, 0)),                 # labels: resident
        ],
        out_specs=(
            pl.BlockSpec((q_tile, wpad), lambda i: (i, 0)),
            pl.BlockSpec((q_tile, 128), lambda i: (i, 0)),
            pl.BlockSpec((q_tile, 128), lambda i: (i, 0)),
        ),
        compiler_params=pltpu.CompilerParams(
            dimension_semantics=("parallel",),          # shards query tiles across TCs on v7x
            vmem_limit_bytes=vmem_limit),
    )(s_img, q_img, labels)

    scores = sc_slab[:, :way]
    classification_scores = 10.0 * scores               # forward hardcodes the factor 10
    distances = dist_slab[:, :_K]
    indices = ip_slab[:, :_K]
    test_predictions = ip_slab[:, _PRED_LANE]
    return classification_scores, indices, distances, test_predictions, scores


if __name__ == "__main__":
    key = jax.random.PRNGKey(0)
    k1, k2 = jax.random.split(key)

    way, shot = 5, 5
    num_support = way * shot            # 25
    num_query = 16                      # two query tiles of 8 -> exercises the grid
    C, H, W = 32, 4, 4

    support_images = jax.random.normal(k1, (num_support, C, H, W), dtype=jnp.float32)
    query_images = jax.random.normal(k2, (num_query, C, H, W), dtype=jnp.float32)
    support_labels = jnp.repeat(jnp.arange(way, dtype=jnp.int32), shot)   # [25]

    cls, idx, dist, pred, sc = pn_head_forward(
        support_images, support_labels, query_images, way=way, q_tile=8)
    jax.block_until_ready((cls, idx, dist, pred, sc))

    # ---- pure-numpy (float64) reference of the forward pass ----
    s64 = np.asarray(support_images, dtype=np.float64).reshape(num_support, C, H * W).mean(-1)
    q64 = np.asarray(query_images, dtype=np.float64).reshape(num_query, C, H * W).mean(-1)
    s64 /= np.maximum(np.linalg.norm(s64, axis=1, keepdims=True), 1e-12)
    q64 /= np.maximum(np.linalg.norm(q64, axis=1, keepdims=True), 1e-12)
    d64 = 1.0 - q64 @ s64.T
    order_ref = np.argsort(d64, axis=1, kind="stable")[:, :_K]
    dist_ref = np.take_along_axis(d64, order_ref, axis=1)
    lab_np = np.asarray(support_labels)
    onehot = np.eye(way)[lab_np]                                   # [S, way]
    proto_ref = (onehot.T @ s64) / onehot.sum(0)[:, None]
    proto_ref /= np.maximum(np.linalg.norm(proto_ref, axis=1, keepdims=True), 1e-12)
    sc_ref = q64 @ proto_ref.T

    cls_np, idx_np = np.asarray(cls), np.asarray(idx)
    dist_np, pred_np, sc_np = np.asarray(dist), np.asarray(pred), np.asarray(sc)

    assert cls_np.shape == (num_query, way) and sc_np.shape == (num_query, way)
    assert idx_np.shape == (num_query, _K) and dist_np.shape == (num_query, _K)
    assert pred_np.shape == (num_query,)
    assert np.allclose(sc_np, sc_ref, atol=1e-5)
    assert np.allclose(cls_np, 10.0 * sc_ref, atol=1e-4)
    assert np.allclose(cls_np, 10.0 * sc_np)
    assert np.all(np.diff(dist_np, axis=1) >= -1e-6)               # ascending distances
    assert np.all((idx_np >= 0) & (idx_np < num_support))          # valid neighbour indices
    assert np.allclose(dist_np, dist_ref, atol=1e-5)
    for qi in range(num_query):
        if not np.array_equal(idx_np[qi], order_ref[qi]):          # allow only near-tie swaps
            assert np.allclose(dist_ref[qi], dist_np[qi], atol=1e-6)
        votes = np.bincount(lab_np[idx_np[qi]], minlength=way)     # majority vote consistency
        assert int(pred_np[qi]) == int(votes.argmax())

    # ---- native-dtype path: bf16 backbone features DMA'd as-is, cast inside the kernel ----
    cls_b, idx_b, dist_b, pred_b, sc_b = pn_head_forward(
        support_images.astype(jnp.bfloat16), support_labels,
        query_images.astype(jnp.bfloat16), way=way, q_tile=8)
    jax.block_until_ready(sc_b)
    assert sc_b.shape == (num_query, way) and np.all(np.isfinite(np.asarray(sc_b)))
    assert np.all((np.asarray(pred_b) >= 0) & (np.asarray(pred_b) < way))

    # TODO(synk): sklearn NearestNeighbors is replaced by an exact in-kernel brute-force cosine
    # kNN (combined-key selection; tie granularity ~1e-7, indices int32 vs reference int64);
    # empty/padded classes yield zero prototypes (scores 0) instead of the reference NaN.
    print("KERNEL_OK")
</pallas_src>

<mosaic_0001>
module attributes {stable_mosaic.version = 11 : i64} {
  func.func @_pn_fused_kernel(%arg0: i32, %arg1: memref<25x32x16xf32, #tpu.memory_space<vmem>>, %arg2: memref<8x32x16xf32, #tpu.memory_space<vmem>>, %arg3: memref<1x25xi32, #tpu.memory_space<vmem>>, %arg4: memref<8x128xf32, #tpu.memory_space<vmem>>, %arg5: memref<8x128xf32, #tpu.memory_space<vmem>>, %arg6: memref<8x128xi32, #tpu.memory_space<vmem>>) attributes {dimension_semantics = [#tpu.dimension_semantics<parallel>], iteration_bounds = array<i64: 2>, scalar_prefetch = 0 : i64, scratch_operands = 0 : i64, tpu.core_type = #tpu.core_type<tc>, window_params = [{pipeline_mode = #tpu.pipeline_mode<synchronous>, transform_indices = @transform_0, window_bounds = array<i64: 25, 32, 16>}, {transform_indices = @transform_1, window_bounds = array<i64: 8, 32, 16>}, {pipeline_mode = #tpu.pipeline_mode<synchronous>, transform_indices = @transform_2, window_bounds = array<i64: 1, 25>}, {transform_indices = @transform_3, window_bounds = array<i64: 8, 128>}, {transform_indices = @transform_4, window_bounds = array<i64: 8, 128>}, {transform_indices = @transform_5, window_bounds = array<i64: 8, 128>}]} {
    %c0 = arith.constant 0 : index
    %c0_0 = arith.constant 0 : index
    %c0_1 = arith.constant 0 : index
    %0 = vector.load %arg1[%c0, %c0_0, %c0_1] : memref<25x32x16xf32, #tpu.memory_space<vmem>>, vector<25x32x16xf32>
    %c0_2 = arith.constant 0 : index
    %c0_3 = arith.constant 0 : index
    %c0_4 = arith.constant 0 : index
    %1 = vector.load %arg2[%c0_2, %c0_3, %c0_4] : memref<8x32x16xf32, #tpu.memory_space<vmem>>, vector<8x32x16xf32>
    %c0_5 = arith.constant 0 : index
    %c0_6 = arith.constant 0 : index
    %2 = vector.load %arg3[%c0_5, %c0_6] : memref<1x25xi32, #tpu.memory_space<vmem>>, vector<1x25xi32>
    %cst = arith.constant dense<0.000000e+00> : vector<25x32xf32>
    %3 = vector.multi_reduction <add>, %0, %cst [2] : vector<25x32x16xf32> to vector<25x32xf32>
    %cst_7 = arith.constant 1.600000e+01 : f32
    %4 = vector.broadcast %cst_7 : f32 to vector<25x32xf32>
    %5 = arith.divf %3, %4 : vector<25x32xf32>
    %cst_8 = arith.constant dense<0.000000e+00> : vector<8x32xf32>
    %6 = vector.multi_reduction <add>, %1, %cst_8 [2] : vector<8x32x16xf32> to vector<8x32xf32>
    %cst_9 = arith.constant 1.600000e+01 : f32
    %7 = vector.broadcast %cst_9 : f32 to vector<8x32xf32>
    %8 = arith.divf %6, %7 : vector<8x32xf32>
    %9 = arith.mulf %5, %5 : vector<25x32xf32>
    %cst_10 = arith.constant dense<0.000000e+00> : vector<25xf32>
    %10 = vector.multi_reduction <add>, %9, %cst_10 [1] : vector<25x32xf32> to vector<25xf32>
    %11 = vector.shape_cast %10 : vector<25xf32> to vector<25x1xf32>
    %12 = math.sqrt %11 : vector<25x1xf32>
    %cst_11 = arith.constant 9.99999996E-13 : f32
    %13 = vector.broadcast %cst_11 : f32 to vector<25x1xf32>
    %14 = arith.maximumf %12, %13 : vector<25x1xf32>
    %15 = vector.broadcast %14 : vector<25x1xf32> to vector<25x32xf32>
    %16 = arith.divf %5, %15 : vector<25x32xf32>
    %17 = arith.mulf %8, %8 : vector<8x32xf32>
    %cst_12 = arith.constant dense<0.000000e+00> : vector<8xf32>
    %18 = vector.multi_reduction <add>, %17, %cst_12 [1] : vector<8x32xf32> to vector<8xf32>
    %19 = vector.shape_cast %18 : vector<8xf32> to vector<8x1xf32>
    %20 = math.sqrt %19 : vector<8x1xf32>
    %cst_13 = arith.constant 9.99999996E-13 : f32
    %21 = vector.broadcast %cst_13 : f32 to vector<8x1xf32>
    %22 = arith.maximumf %20, %21 : vector<8x1xf32>
    %23 = vector.broadcast %22 : vector<8x1xf32> to vector<8x32xf32>
    %24 = arith.divf %8, %23 : vector<8x32xf32>
    %25 = tpu.iota {dimensions = array<i32: 0>} : vector<128x25xi32>
    %26 = vector.broadcast %2 : vector<1x25xi32> to vector<128x25xi32>
    %27 = arith.cmpi eq, %25, %26 : vector<128x25xi32>
    %28 = arith.extui %27 : vector<128x25xi1> to vector<128x25xi32>
    %29 = arith.sitofp %28 : vector<128x25xi32> to vector<128x25xf32>
    %cst_14 = arith.constant dense<0.000000e+00> : vector<8x25xf32>
    %30 = tpu.matmul %24, %16, %cst_14 {dimension_numbers = #tpu.dot_dimension_numbers<[1], [1], [0], [0], [0, 0, 1, 0], [], []>} : vector<8x32xf32>, vector<25x32xf32>, vector<8x25xf32> -> vector<8x25xf32>
    %cst_15 = arith.constant 1.000000e+00 : f32
    %31 = vector.broadcast %cst_15 : f32 to vector<8x25xf32>
    %32 = arith.subf %31, %30 : vector<8x25xf32>
    %33 = tpu.iota {dimensions = array<i32: 1>} : vector<8x25xi32>
    %cst_16 = arith.constant 0.000000e+00 : f32
    %cst_17 = arith.constant 2.000000e+00 : f32
    %34 = vector.broadcast %cst_16 : f32 to vector<8x25xf32>
    %35 = arith.maximumf %34, %32 : vector<8x25xf32>
    %36 = vector.broadcast %cst_17 : f32 to vector<8x25xf32>
    %37 = arith.minimumf %36, %35 : vector<8x25xf32>
    %cst_18 = arith.constant 0x4AFFFFFE : f32
    %38 = vector.broadcast %cst_18 : f32 to vector<8x25xf32>
    %39 = arith.mulf %37, %38 : vector<8x25xf32>
    %40 = arith.fptosi %39 : vector<8x25xf32> to vector<8x25xi32>
    %c16777214_i32 = arith.constant 16777214 : i32
    %41 = vector.broadcast %c16777214_i32 : i32 to vector<8x25xi32>
    %42 = arith.minsi %40, %41 : vector<8x25xi32>
    %c32_i32 = arith.constant 32 : i32
    %43 = vector.broadcast %c32_i32 : i32 to vector<8x25xi32>
    %44 = arith.muli %42, %43 : vector<8x25xi32>
    %45 = arith.addi %44, %33 : vector<8x25xi32>
    %46 = tpu.iota {dimensions = array<i32: 1>} : vector<8x128xi32>
    %cst_19 = arith.constant 0.000000e+00 : f32
    %47 = vector.broadcast %cst_19 : f32 to vector<8x128xf32>
    %c0_i32 = arith.constant 0 : i32
    %48 = vector.broadcast %c0_i32 : i32 to vector<8x128xi32>
    %cst_20 = arith.constant 0.000000e+00 : f32
    %49 = vector.broadcast %cst_20 : f32 to vector<8x25xf32>
    %cst_21 = arith.constant dense<2147483647> : vector<8xi32>
    %50 = vector.multi_reduction <minsi>, %45, %cst_21 [1] : vector<8x25xi32> to vector<8xi32>
    %51 = vector.shape_cast %50 : vector<8xi32> to vector<8x1xi32>
    %c31_i32 = arith.constant 31 : i32
    %52 = vector.broadcast %c31_i32 : i32 to vector<8x1xi32>
    %53 = arith.andi %51, %52 : vector<8x1xi32>
    %54 = vector.broadcast %53 : vector<8x1xi32> to vector<8x25xi32>
    %55 = arith.cmpi eq, %33, %54 : vector<8x25xi32>
    %cst_22 = arith.constant 0.000000e+00 : f32
    %56 = vector.broadcast %cst_22 : f32 to vector<8x25xf32>
    %57 = arith.select %55, %32, %56 : vector<8x25xi1>, vector<8x25xf32>
    %cst_23 = arith.constant dense<0.000000e+00> : vector<8xf32>
    %58 = vector.multi_reduction <add>, %57, %cst_23 [1] : vector<8x25xf32> to vector<8xf32>
    %59 = vector.shape_cast %58 : vector<8xf32> to vector<8x1xf32>
    %c0_i32_24 = arith.constant 0 : i32
    %60 = vector.broadcast %c0_i32_24 : i32 to vector<8x128xi32>
    %61 = arith.cmpi eq, %46, %60 : vector<8x128xi32>
    %62 = vector.shape_cast %59 : vector<8x1xf32> to vector<8x1xf32>
    %63 = vector.broadcast %62 : vector<8x1xf32> to vector<8x128xf32>
    %64 = arith.select %61, %63, %47 : vector<8x128xi1>, vector<8x128xf32>
    %c0_i32_25 = arith.constant 0 : i32
    %65 = vector.broadcast %c0_i32_25 : i32 to vector<8x128xi32>
    %66 = arith.cmpi eq, %46, %65 : vector<8x128xi32>
    %67 = vector.shape_cast %53 : vector<8x1xi32> to vector<8x1xi32>
    %68 = vector.broadcast %67 : vector<8x1xi32> to vector<8x128xi32>
    %69 = arith.select %66, %68, %48 : vector<8x128xi1>, vector<8x128xi32>
    %70 = arith.extui %55 : vector<8x25xi1> to vector<8x25xi32>
    %71 = arith.sitofp %70 : vector<8x25xi32> to vector<8x25xf32>
    %72 = arith.addf %49, %71 : vector<8x25xf32>
    %c2147483647_i32 = arith.constant 2147483647 : i32
    %73 = vector.broadcast %c2147483647_i32 : i32 to vector<8x25xi32>
    %74 = arith.select %55, %73, %45 : vector<8x25xi1>, vector<8x25xi32>
    %cst_26 = arith.constant dense<2147483647> : vector<8xi32>
    %75 = vector.multi_reduction <minsi>, %74, %cst_26 [1] : vector<8x25xi32> to vector<8xi32>
    %76 = vector.shape_cast %75 : vector<8xi32> to vector<8x1xi32>
    %c31_i32_27 = arith.constant 31 : i32
    %77 = vector.broadcast %c31_i32_27 : i32 to vector<8x1xi32>
    %78 = arith.andi %76, %77 : vector<8x1xi32>
    %79 = vector.broadcast %78 : vector<8x1xi32> to vector<8x25xi32>
    %80 = arith.cmpi eq, %33, %79 : vector<8x25xi32>
    %cst_28 = arith.constant 0.000000e+00 : f32
    %81 = vector.broadcast %cst_28 : f32 to vector<8x25xf32>
    %82 = arith.select %80, %32, %81 : vector<8x25xi1>, vector<8x25xf32>
    %cst_29 = arith.constant dense<0.000000e+00> : vector<8xf32>
    %83 = vector.multi_reduction <add>, %82, %cst_29 [1] : vector<8x25xf32> to vector<8xf32>
    %84 = vector.shape_cast %83 : vector<8xf32> to vector<8x1xf32>
    %c1_i32 = arith.constant 1 : i32
    %85 = vector.broadcast %c1_i32 : i32 to vector<8x128xi32>
    %86 = arith.cmpi eq, %46, %85 : vector<8x128xi32>
    %87 = vector.shape_cast %84 : vector<8x1xf32> to vector<8x1xf32>
    %88 = vector.broadcast %87 : vector<8x1xf32> to vector<8x128xf32>
    %89 = arith.select %86, %88, %64 : vector<8x128xi1>, vector<8x128xf32>
    %c1_i32_30 = arith.constant 1 : i32
    %90 = vector.broadcast %c1_i32_30 : i32 to vector<8x128xi32>
    %91 = arith.cmpi eq, %46, %90 : vector<8x128xi32>
    %92 = vector.shape_cast %78 : vector<8x1xi32> to vector<8x1xi32>
    %93 = vector.broadcast %92 : vector<8x1xi32> to vector<8x128xi32>
    %94 = arith.select %91, %93, %69 : vector<8x128xi1>, vector<8x128xi32>
    %95 = arith.extui %80 : vector<8x25xi1> to vector<8x25xi32>
    %96 = arith.sitofp %95 : vector<8x25xi32> to vector<8x25xf32>
    %97 = arith.addf %72, %96 : vector<8x25xf32>
    %c2147483647_i32_31 = arith.constant 2147483647 : i32
    %98 = vector.broadcast %c2147483647_i32_31 : i32 to vector<8x25xi32>
    %99 = arith.select %80, %98, %74 : vector<8x25xi1>, vector<8x25xi32>
    %cst_32 = arith.constant dense<2147483647> : vector<8xi32>
    %100 = vector.multi_reduction <minsi>, %99, %cst_32 [1] : vector<8x25xi32> to vector<8xi32>
    %101 = vector.shape_cast %100 : vector<8xi32> to vector<8x1xi32>
    %c31_i32_33 = arith.constant 31 : i32
    %102 = vector.broadcast %c31_i32_33 : i32 to vector<8x1xi32>
    %103 = arith.andi %101, %102 : vector<8x1xi32>
    %104 = vector.broadcast %103 : vector<8x1xi32> to vector<8x25xi32>
    %105 = arith.cmpi eq, %33, %104 : vector<8x25xi32>
    %cst_34 = arith.constant 0.000000e+00 : f32
    %106 = vector.broadcast %cst_34 : f32 to vector<8x25xf32>
    %107 = arith.select %105, %32, %106 : vector<8x25xi1>, vector<8x25xf32>
    %cst_35 = arith.constant dense<0.000000e+00> : vector<8xf32>
    %108 = vector.multi_reduction <add>, %107, %cst_35 [1] : vector<8x25xf32> to vector<8xf32>
    %109 = vector.shape_cast %108 : vector<8xf32> to vector<8x1xf32>
    %c2_i32 = arith.constant 2 : i32
    %110 = vector.broadcast %c2_i32 : i32 to vector<8x128xi32>
    %111 = arith.cmpi eq, %46, %110 : vector<8x128xi32>
    %112 = vector.shape_cast %109 : vector<8x1xf32> to vector<8x1xf32>
    %113 = vector.broadcast %112 : vector<8x1xf32> to vector<8x128xf32>
    %114 = arith.select %111, %113, %89 : vector<8x128xi1>, vector<8x128xf32>
    %c2_i32_36 = arith.constant 2 : i32
    %115 = vector.broadcast %c2_i32_36 : i32 to vector<8x128xi32>
    %116 = arith.cmpi eq, %46, %115 : vector<8x128xi32>
    %117 = vector.shape_cast %103 : vector<8x1xi32> to vector<8x1xi32>
    %118 = vector.broadcast %117 : vector<8x1xi32> to vector<8x128xi32>
    %119 = arith.select %116, %118, %94 : vector<8x128xi1>, vector<8x128xi32>
    %120 = arith.extui %105 : vector<8x25xi1> to vector<8x25xi32>
    %121 = arith.sitofp %120 : vector<8x25xi32> to vector<8x25xf32>
    %122 = arith.addf %97, %121 : vector<8x25xf32>
    %c2147483647_i32_37 = arith.constant 2147483647 : i32
    %123 = vector.broadcast %c2147483647_i32_37 : i32 to vector<8x25xi32>
    %124 = arith.select %105, %123, %99 : vector<8x25xi1>, vector<8x25xi32>
    %cst_38 = arith.constant dense<2147483647> : vector<8xi32>
    %125 = vector.multi_reduction <minsi>, %124, %cst_38 [1] : vector<8x25xi32> to vector<8xi32>
    %126 = vector.shape_cast %125 : vector<8xi32> to vector<8x1xi32>
    %c31_i32_39 = arith.constant 31 : i32
    %127 = vector.broadcast %c31_i32_39 : i32 to vector<8x1xi32>
    %128 = arith.andi %126, %127 : vector<8x1xi32>
    %129 = vector.broadcast %128 : vector<8x1xi32> to vector<8x25xi32>
    %130 = arith.cmpi eq, %33, %129 : vector<8x25xi32>
    %cst_40 = arith.constant 0.000000e+00 : f32
    %131 = vector.broadcast %cst_40 : f32 to vector<8x25xf32>
    %132 = arith.select %130, %32, %131 : vector<8x25xi1>, vector<8x25xf32>
    %cst_41 = arith.constant dense<0.000000e+00> : vector<8xf32>
    %133 = vector.multi_reduction <add>, %132, %cst_41 [1] : vector<8x25xf32> to vector<8xf32>
    %134 = vector.shape_cast %133 : vector<8xf32> to vector<8x1xf32>
    %c3_i32 = arith.constant 3 : i32
    %135 = vector.broadcast %c3_i32 : i32 to vector<8x128xi32>
    %136 = arith.cmpi eq, %46, %135 : vector<8x128xi32>
    %137 = vector.shape_cast %134 : vector<8x1xf32> to vector<8x1xf32>
    %138 = vector.broadcast %137 : vector<8x1xf32> to vector<8x128xf32>
    %139 = arith.select %136, %138, %114 : vector<8x128xi1>, vector<8x128xf32>
    %c3_i32_42 = arith.constant 3 : i32
    %140 = vector.broadcast %c3_i32_42 : i32 to vector<8x128xi32>
    %141 = arith.cmpi eq, %46, %140 : vector<8x128xi32>
    %142 = vector.shape_cast %128 : vector<8x1xi32> to vector<8x1xi32>
    %143 = vector.broadcast %142 : vector<8x1xi32> to vector<8x128xi32>
    %144 = arith.select %141, %143, %119 : vector<8x128xi1>, vector<8x128xi32>
    %145 = arith.extui %130 : vector<8x25xi1> to vector<8x25xi32>
    %146 = arith.sitofp %145 : vector<8x25xi32> to vector<8x25xf32>
    %147 = arith.addf %122, %146 : vector<8x25xf32>
    %c2147483647_i32_43 = arith.constant 2147483647 : i32
    %148 = vector.broadcast %c2147483647_i32_43 : i32 to vector<8x25xi32>
    %149 = arith.select %130, %148, %124 : vector<8x25xi1>, vector<8x25xi32>
    %cst_44 = arith.constant dense<2147483647> : vector<8xi32>
    %150 = vector.multi_reduction <minsi>, %149, %cst_44 [1] : vector<8x25xi32> to vector<8xi32>
    %151 = vector.shape_cast %150 : vector<8xi32> to vector<8x1xi32>
    %c31_i32_45 = arith.constant 31 : i32
    %152 = vector.broadcast %c31_i32_45 : i32 to vector<8x1xi32>
    %153 = arith.andi %151, %152 : vector<8x1xi32>
    %154 = vector.broadcast %153 : vector<8x1xi32> to vector<8x25xi32>
    %155 = arith.cmpi eq, %33, %154 : vector<8x25xi32>
    %cst_46 = arith.constant 0.000000e+00 : f32
    %156 = vector.broadcast %cst_46 : f32 to vector<8x25xf32>
    %157 = arith.select %155, %32, %156 : vector<8x25xi1>, vector<8x25xf32>
    %cst_47 = arith.constant dense<0.000000e+00> : vector<8xf32>
    %158 = vector.multi_reduction <add>, %157, %cst_47 [1] : vector<8x25xf32> to vector<8xf32>
    %159 = vector.shape_cast %158 : vector<8xf32> to vector<8x1xf32>
    %c4_i32 = arith.constant 4 : i32
    %160 = vector.broadcast %c4_i32 : i32 to vector<8x128xi32>
    %161 = arith.cmpi eq, %46, %160 : vector<8x128xi32>
    %162 = vector.shape_cast %159 : vector<8x1xf32> to vector<8x1xf32>
    %163 = vector.broadcast %162 : vector<8x1xf32> to vector<8x128xf32>
    %164 = arith.select %161, %163, %139 : vector<8x128xi1>, vector<8x128xf32>
    %c4_i32_48 = arith.constant 4 : i32
    %165 = vector.broadcast %c4_i32_48 : i32 to vector<8x128xi32>
    %166 = arith.cmpi eq, %46, %165 : vector<8x128xi32>
    %167 = vector.shape_cast %153 : vector<8x1xi32> to vector<8x1xi32>
    %168 = vector.broadcast %167 : vector<8x1xi32> to vector<8x128xi32>
    %169 = arith.select %166, %168, %144 : vector<8x128xi1>, vector<8x128xi32>
    %170 = arith.extui %155 : vector<8x25xi1> to vector<8x25xi32>
    %171 = arith.sitofp %170 : vector<8x25xi32> to vector<8x25xf32>
    %172 = arith.addf %147, %171 : vector<8x25xf32>
    %173 = arith.truncf %172 : vector<8x25xf32> to vector<8x25xbf16>
    %174 = arith.truncf %29 : vector<128x25xf32> to vector<128x25xbf16>
    %cst_49 = arith.constant dense<0.000000e+00> : vector<8x128xf32>
    %175 = tpu.matmul %173, %174, %cst_49 {dimension_numbers = #tpu.dot_dimension_numbers<[1], [1], [0], [0], [0, 0, 1, 0], [], []>} : vector<8x25xbf16>, vector<128x25xbf16>, vector<8x128xf32> -> vector<8x128xf32>
    %cst_50 = arith.constant dense<0xFF800000> : vector<8xf32>
    %176 = vector.multi_reduction <maximumf>, %175, %cst_50 [1] : vector<8x128xf32> to vector<8xf32>
    %177 = vector.shape_cast %176 : vector<8xf32> to vector<8x1xf32>
    %178 = tpu.iota {dimensions = array<i32: 1>} : vector<8x128xi32>
    %179 = vector.broadcast %177 : vector<8x1xf32> to vector<8x128xf32>
    %180 = arith.cmpf oge, %175, %179 : vector<8x128xf32>
    %c128_i32 = arith.constant 128 : i32
    %181 = vector.broadcast %c128_i32 : i32 to vector<8x128xi32>
    %182 = arith.select %180, %178, %181 : vector<8x128xi1>, vector<8x128xi32>
    %cst_51 = arith.constant dense<2147483647> : vector<8xi32>
    %183 = vector.multi_reduction <minsi>, %182, %cst_51 [1] : vector<8x128xi32> to vector<8xi32>
    %c8_i32 = arith.constant 8 : i32
    %184 = vector.broadcast %c8_i32 : i32 to vector<8x128xi32>
    %185 = arith.cmpi eq, %46, %184 : vector<8x128xi32>
    %186 = vector.shape_cast %183 : vector<8xi32> to vector<8x1xi32>
    %187 = vector.shape_cast %186 : vector<8x1xi32> to vector<8x1xi32>
    %188 = vector.broadcast %187 : vector<8x1xi32> to vector<8x128xi32>
    %189 = arith.select %185, %188, %169 : vector<8x128xi1>, vector<8x128xi32>
    %cst_52 = arith.constant dense<0.000000e+00> : vector<128x32xf32>
    %190 = tpu.matmul %29, %16, %cst_52 {dimension_numbers = #tpu.dot_dimension_numbers<[1], [0], [0], [1], [0, 0, 1, 1], [], []>} : vector<128x25xf32>, vector<25x32xf32>, vector<128x32xf32> -> vector<128x32xf32>
    %cst_53 = arith.constant dense<0.000000e+00> : vector<128xf32>
    %191 = vector.multi_reduction <add>, %29, %cst_53 [1] : vector<128x25xf32> to vector<128xf32>
    %192 = vector.shape_cast %191 : vector<128xf32> to vector<128x1xf32>
    %cst_54 = arith.constant 1.000000e+00 : f32
    %193 = vector.broadcast %cst_54 : f32 to vector<128x1xf32>
    %194 = arith.maximumf %192, %193 : vector<128x1xf32>
    %195 = vector.broadcast %194 : vector<128x1xf32> to vector<128x32xf32>
    %196 = arith.divf %190, %195 : vector<128x32xf32>
    %197 = arith.mulf %196, %196 : vector<128x32xf32>
    %cst_55 = arith.constant dense<0.000000e+00> : vector<128xf32>
    %198 = vector.multi_reduction <add>, %197, %cst_55 [1] : vector<128x32xf32> to vector<128xf32>
    %199 = vector.shape_cast %198 : vector<128xf32> to vector<128x1xf32>
    %200 = math.sqrt %199 : vector<128x1xf32>
    %cst_56 = arith.constant 9.99999996E-13 : f32
    %201 = vector.broadcast %cst_56 : f32 to vector<128x1xf32>
    %202 = arith.maximumf %200, %201 : vector<128x1xf32>
    %203 = vector.broadcast %202 : vector<128x1xf32> to vector<128x32xf32>
    %204 = arith.divf %196, %203 : vector<128x32xf32>
    %cst_57 = arith.constant dense<0.000000e+00> : vector<8x128xf32>
    %205 = tpu.matmul %24, %204, %cst_57 {dimension_numbers = #tpu.dot_dimension_numbers<[1], [1], [0], [0], [0, 0, 1, 0], [], []>} : vector<8x32xf32>, vector<128x32xf32>, vector<8x128xf32> -> vector<8x128xf32>
    %c0_58 = arith.constant 0 : index
    %c0_59 = arith.constant 0 : index
    %206 = vector.load %arg4[%c0_58, %c0_59] : memref<8x128xf32, #tpu.memory_space<vmem>>, vector<8x128xf32>
    tpu.vector_store %arg4[%c0_58, %c0_59], %205 {strides = array<i32>} : memref<8x128xf32, #tpu.memory_space<vmem>>, vector<8x128xf32>,
    %c0_60 = arith.constant 0 : index
    %c0_61 = arith.constant 0 : index
    %207 = vector.load %arg5[%c0_60, %c0_61] : memref<8x128xf32, #tpu.memory_space<vmem>>, vector<8x128xf32>
    tpu.vector_store %arg5[%c0_60, %c0_61], %164 {strides = array<i32>} : memref<8x128xf32, #tpu.memory_space<vmem>>, vector<8x128xf32>,
    %c0_62 = arith.constant 0 : index
    %c0_63 = arith.constant 0 : index
    %208 = vector.load %arg6[%c0_62, %c0_63] : memref<8x128xi32, #tpu.memory_space<vmem>>, vector<8x128xi32>
    tpu.vector_store %arg6[%c0_62, %c0_63], %189 {strides = array<i32>} : memref<8x128xi32, #tpu.memory_space<vmem>>, vector<8x128xi32>,
    return
  }
  func.func @transform_0(%arg0: i32) -> (i32, i32, i32) {
    %c0_i32 = arith.constant 0 : i32
    %c0_i32_0 = arith.constant 0 : i32
    %c0_i32_1 = arith.constant 0 : i32
    %c0_i32_2 = arith.constant 0 : i32
    return %c0_i32, %c0_i32_0, %c0_i32_1 : i32, i32, i32
  }
  func.func @transform_1(%arg0: i32) -> (i32, i32, i32) {
    %c0_i32 = arith.constant 0 : i32
    %c0_i32_0 = arith.constant 0 : i32
    %c0_i32_1 = arith.constant 0 : i32
    return %arg0, %c0_i32, %c0_i32_0 : i32, i32, i32
  }
  func.func @transform_2(%arg0: i32) -> (i32, i32) {
    %c0_i32 = arith.constant 0 : i32
    %c0_i32_0 = arith.constant 0 : i32
    %c0_i32_1 = arith.constant 0 : i32
    return %c0_i32, %c0_i32_0 : i32, i32
  }
  func.func @transform_3(%arg0: i32) -> (i32, i32) {
    %c0_i32 = arith.constant 0 : i32
    %c0_i32_0 = arith.constant 0 : i32
    return %arg0, %c0_i32 : i32, i32
  }
  func.func @transform_4(%arg0: i32) -> (i32, i32) {
    %c0_i32 = arith.constant 0 : i32
    %c0_i32_0 = arith.constant 0 : i32
    return %arg0, %c0_i32 : i32, i32
  }
  func.func @transform_5(%arg0: i32) -> (i32, i32) {
    %c0_i32 = arith.constant 0 : i32
    %c0_i32_0 = arith.constant 0 : i32
    return %arg0, %c0_i32 : i32, i32
  }
}

</mosaic_0001>

<bundles_post_ra>
// kernel: pn_head_forward.1
= control target key start
LH: loop header
LB: loop body
LE: loop exit
PB: predicated region body
PF: predicated region fallthrough
CT: control target
= control target key end

     0   :  { %s5029_s18 = smov 0   ;;  %s8266_s0 = inlined_call_operand.vmem [shape: f32[25,32,16], index: 0, kind: input, shape index: {}]   ;;  %s8267_s1 = inlined_call_operand.vmem [shape: f32[16,32,16], index: 1, kind: input, shape index: {}]   ;;  %s8268_s2 = inlined_call_operand.vmem [shape: s32[1,25], index: 2, kind: input, shape index: {}]   ;;  %s8269_s3 = inlined_call_operand.vmem [shape: f32[16,128], index: 3, kind: output, shape index: {0}]   ;;  %s8270_s4 = inlined_call_operand.vmem [shape: f32[16,128], index: 4, kind: output, shape index: {1}]   ;;  %s8271_s5 = inlined_call_operand.vmem [shape: s32[16,128], index: 5, kind: output, shape index: {2}]  }
   0x1 LB: > { %s5035_s19 = sadd.s32 4294967295, %s4994_s18   ;;  %p4580_p0 = scmp.ge.s32.totalorder %s4994_s18, 1  ;;  %s4994_s18 = sphi %s5029_s18, %s16_s18  }
   0x2   : > { %p194_p1 = scmp.lt.s32.totalorder %s4994_s18, 3 }
   0x4   : > { %p195_p2 = pnand %p4580_p0, %p194_p1 }
   0x6   : > { %198 = sbr.rel (%p195_p2) target bundleno = 3215 (0xc8f), region = 32 }
   0xb   : > { %v318_v0 = vld [vmem:[%s8266_s0 + $0x220] sm:$0xff]  ;;  %vm383_vm0 = vcmask 130048   ;;  %v319_v2 = vld [vmem:[%s8266_s0 + $0x228] sm:$0xff]  ;;  %v320_v8 = vld [vmem:[%s8266_s0 + $0x230] sm:$0xff]  ;;  %s4581_s30 = sshll.u32 %s5035_s19, 3  ;;  %vm1124_vm1 = vcmask 130112  }
   0xc   : > { %v314_v1 = vld [vmem:[%s8266_s0 + $0x200] sm:$0xff]  ;;  %v588_v3 = vsel %vm383_vm0, %v318_v0, 0.0  ;;  %v315_v5 = vld [vmem:[%s8266_s0 + $0x208] sm:$0xff]  ;;  %v591_v6 = vsel %vm383_vm0, %v319_v2, 0.0  ;;  %v316_v9 = vld [vmem:[%s8266_s0 + $0x210] sm:$0xff]  ;;  %v594_v10 = vsel %vm383_vm0, %v320_v8, 0.0 }
   0xd   : > { %v576_v4 = vsel %vm383_vm0, %v314_v1, 0.0  ;;  %589 = vadd.xlane.f32.xlu1 %v588_v3  ;;  %v579_v7 = vsel %vm383_vm0, %v315_v5, 0.0  ;;  %v582_v11 = vsel %vm383_vm0, %v316_v9, 0.0  ;;  %v323_v12 = vld [vmem:[%s8266_s0 + $0x248] sm:$0xff]  ;;  %v322_v13 = vld [vmem:[%s8266_s0 + $0x240] sm:$0xff]  ;;  %v321_v16 = vld [vmem:[%s8266_s0 + $0x238] sm:$0xff] }
   0xe   : > { %577 = vadd.xlane.f32.xlu0 %v576_v4  ;;  %v603_v14 = vsel %vm383_vm0, %v323_v12, 0.0  ;;  %v600_v15 = vsel %vm383_vm0, %v322_v13, 0.0  ;;  %v317_v17 = vld [vmem:[%s8266_s0 + $0x218] sm:$0xff]  ;;  %v597_v18 = vsel %vm383_vm0, %v321_v16, 0.0  ;;  %v326_v20 = vld [vmem:[%s8266_s0 + $0x260] sm:$0xff]  ;;  %v324_v21 = vld [vmem:[%s8266_s0 + $0x250] sm:$0xff] }
   0xf   : > { %v585_v19 = vsel %vm383_vm0, %v317_v17, 0.0  ;;  %v612_v22 = vsel %vm383_vm0, %v326_v20, 0.0  ;;  %v606_v23 = vsel %vm383_vm0, %v324_v21, 0.0  ;;  %v325_v24 = vld [vmem:[%s8266_s0 + $0x258] sm:$0xff]  ;;  %v327_v25 = vld [vmem:[%s8266_s0 + $0x268] sm:$0xff]  ;;  %v330_v28 = vld [vmem:[%s8266_s0 + $0x280] sm:$0xff] }
  0x10   : > { %v609_v26 = vsel %vm383_vm0, %v325_v24, 0.0  ;;  %v615_v27 = vsel %vm383_vm0, %v327_v25, 0.0  ;;  %v328_v29 = vld [vmem:[%s8266_s0 + $0x270] sm:$0xff]  ;;  %v624_v30 = vsel %vm383_vm0, %v330_v28, 0.0  ;;  %v331_v32 = vld [vmem:[%s8266_s0 + $0x288] sm:$0xff]  ;;  %v282_v33 = vld [vmem:[%s8266_s0 + $0x100] sm:$0xff] }
  0x11   : > { %592 = vadd.xlane.f32.xlu1 %v591_v6  ;;  %v618_v31 = vsel %vm383_vm0, %v328_v29, 0.0  ;;  %v627_v34 = vsel %vm383_vm0, %v331_v32, 0.0  ;;  %v480_v35 = vsel %vm383_vm0, %v282_v33, 0.0  ;;  %v283_v36 = vld [vmem:[%s8266_s0 + $0x108] sm:$0xff]  ;;  %v286_v37 = vld [vmem:[%s8266_s0 + $0x120] sm:$0xff]  ;;  %v329_v41 = vld [vmem:[%s8266_s0 + $0x278] sm:$0xff] }
  0x12   : > { %580 = vadd.xlane.f32.xlu0 %v579_v7  ;;  %v483_v38 = vsel %vm383_vm0, %v283_v36, 0.0  ;;  %v492_v39 = vsel %vm383_vm0, %v286_v37, 0.0  ;;  %v287_v40 = vld [vmem:[%s8266_s0 + $0x128] sm:$0xff]  ;;  %v621_v43 = vsel %vm383_vm0, %v329_v41, 0.0  ;;  %v332_v44 = vld [vmem:[%s8266_s0 + $0x290] sm:$0xff]  ;;  %v334_v45 = vld [vmem:[%s8266_s0 + $0x2a0] sm:$0xff] }
  0x13   : > { %v495_v42 = vsel %vm383_vm0, %v287_v40, 0.0  ;;  %v630_v46 = vsel %vm383_vm0, %v332_v44, 0.0  ;;  %v636_v47 = vsel %vm383_vm0, %v334_v45, 0.0  ;;  %v335_v48 = vld [vmem:[%s8266_s0 + $0x2a8] sm:$0xff]  ;;  %v284_v49 = vld [vmem:[%s8266_s0 + $0x110] sm:$0xff]  ;;  %v290_v53 = vld [vmem:[%s8266_s0 + $0x140] sm:$0xff] }
  0x14   : > { %v639_v50 = vsel %vm383_vm0, %v335_v48, 0.0  ;;  %v486_v51 = vsel %vm383_vm0, %v284_v49, 0.0  ;;  %v288_v52 = vld [vmem:[%s8266_s0 + $0x130] sm:$0xff]  ;;  %v504_v55 = vsel %vm383_vm0, %v290_v53, 0.0  ;;  %v291_v56 = vld [vmem:[%s8266_s0 + $0x148] sm:$0xff]  ;;  %v333_v57 = vld [vmem:[%s8266_s0 + $0x298] sm:$0xff] }
  0x15   : > { %595 = vadd.xlane.f32.xlu1 %v594_v10  ;;  %v498_v54 = vsel %vm383_vm0, %v288_v52, 0.0  ;;  %v507_v58 = vsel %vm383_vm0, %v291_v56, 0.0  ;;  %v633_v59 = vsel %vm383_vm0, %v333_v57, 0.0  ;;  %v336_v60 = vld [vmem:[%s8266_s0 + $0x2b0] sm:$0xff]  ;;  %v338_v61 = vld [vmem:[%s8266_s0 + $0x2c0] sm:$0xff]  ;;  %v339_v0 = vld [vmem:[%s8266_s0 + $0x2c8] sm:$0xff] }
  0x16   : > { %583 = vadd.xlane.f32.xlu0 %v582_v11  ;;  %v642_v62 = vsel %vm383_vm0, %v336_v60, 0.0  ;;  %v648_v63 = vsel %vm383_vm0, %v338_v61, 0.0  ;;  %v285_v1 = vld [vmem:[%s8266_s0 + $0x118] sm:$0xff]  ;;  %v651_v2 = vsel %vm383_vm0, %v339_v0, 0.0  ;;  %v292_v5 = vld [vmem:[%s8266_s0 + $0x150] sm:$0xff]  ;;  %v294_v8 = vld [vmem:[%s8266_s0 + $0x160] sm:$0xff] }
  0x17   : > { %v489_v3 = vsel %vm383_vm0, %v285_v1, 0.0  ;;  %v289_v4 = vld [vmem:[%s8266_s0 + $0x138] sm:$0xff]  ;;  %v510_v7 = vsel %vm383_vm0, %v292_v5, 0.0  ;;  %v295_v9 = vld [vmem:[%s8266_s0 + $0x168] sm:$0xff]  ;;  %v516_v10 = vsel %vm383_vm0, %v294_v8, 0.0  ;;  %v340_v13 = vld [vmem:[%s8266_s0 + $0x2d0] sm:$0xff] }
  0x18   : > { %v501_v6 = vsel %vm383_vm0, %v289_v4, 0.0  ;;  %v519_v11 = vsel %vm383_vm0, %v295_v9, 0.0  ;;  %v337_v12 = vld [vmem:[%s8266_s0 + $0x2b8] sm:$0xff]  ;;  %v342_v16 = vld [vmem:[%s8266_s0 + $0x2e0] sm:$0xff]  ;;  %v343_v17 = vld [vmem:[%s8266_s0 + $0x2e8] sm:$0xff]  ;;  %p231_p3 = scmp.lt.s32.totalorder %s4581_s30, 15 }
  0x19   : > { %604 = vadd.xlane.f32.xlu1 %v603_v14  ;;  %v645_v14 = vsel %vm383_vm0, %v337_v12, 0.0  ;;  %v293_v20 = vld [vmem:[%s8266_s0 + $0x158] sm:$0xff]  ;;  %v296_v21 = vld [vmem:[%s8266_s0 + $0x170] sm:$0xff]  ;;  %v298_v24 = vld [vmem:[%s8266_s0 + $0x180] sm:$0xff]  ;;  %vm1131_vm2 = vcmask 195712   ;;  %vm1138_vm3 = vcmask 261312  }
  0x1a   : > { %601 = vadd.xlane.f32.xlu0 %v600_v15  ;;  %v654_v15 = vsel %vm383_vm0, %v340_v13, 0.0  ;;  %v299_v25 = vld [vmem:[%s8266_s0 + $0x188] sm:$0xff]  ;;  %v341_v28 = vld [vmem:[%s8266_s0 + $0x2d8] sm:$0xff]  ;;  %v344_v29 = vld [vmem:[%s8266_s0 + $0x2f0] sm:$0xff]  ;;  %s8649_s30 = smov (!%p231_p3, %s4581_s30), 15  ;;  %vm1596_vm4 = vcmask 1041409  }
  0x1b   : > { %v251_v32 = vld [vmem:[%s8266_s0 + $0x8] sm:$0xff]  ;;  %v250_v33 = vld [vmem:[%s8266_s0] sm:$0xff]  ;;  %v300_v40 = vld [vmem:[%s8266_s0 + $0x190] sm:$0xff]  ;;  %s4651_s20 = sshll.u32 %s8649_s30, 5  ;;  %vm1598_vm5 = vcmask 1042434   ;;  %vm1600_vm6 = vcmask 1043459  }
  0x1c   : > { %v255_v36 = vld [vmem:[%s8266_s0 + $0x28] sm:$0xff]  ;;  %v254_v37 = vld [vmem:[%s8266_s0 + $0x20] sm:$0xff]  ;;  %v297_v41 = vld [vmem:[%s8266_s0 + $0x178] sm:$0xff]  ;;  %s5389_s27 = scalar_lea.vmem %s8267_s1, %s4651_s20  ;;  %vm1602_vm7 = vcmask 1044484   ;;  %vm1604_vm8 = vcmask 1045509   ;;  %vm1606_vm9 = vcmask 1046534  }
  0x1d   : > { %598 = vadd.xlane.f32.xlu1 %v597_v18  ;;  %v660_v18 = vsel %vm383_vm0, %v342_v16, 0.0  ;;  %v303_v44 = vld [vmem:[%s8266_s0 + $0x1a8] sm:$0xff]  ;;  %v302_v45 = vld [vmem:[%s8266_s0 + $0x1a0] sm:$0xff]  ;;  %v252_v48 = vld [vmem:[%s8266_s0 + $0x10] sm:$0xff]  ;;  %vm1608_vm10 = vcmask 1047559   ;;  %vm1628_vm11 = vcmask 261120  }
  0x1e   : > { %586 = vadd.xlane.f32.xlu0 %v585_v19  ;;  %v663_v19 = vsel %vm383_vm0, %v343_v17, 0.0  ;;  %v345_v49 = vld [vmem:[%s8266_s0 + $0x2f8] sm:$0xff]  ;;  %v258_v52 = vld [vmem:[%s8266_s0 + $0x40] sm:$0xff]  ;;  %v256_v53 = vld [vmem:[%s8266_s0 + $0x30] sm:$0xff]  ;;  %vm1638_vm12 = vcmask 253952   ;;  %p237_p4 = scmp.lt.s32.totalorder %s5035_s19, 1 }
  0x1f   : > { %v301_v56 = vld [vmem:[%s8266_s0 + $0x198] sm:$0xff]  ;;  %v259_v57 = vld [vmem:[%s8266_s0 + $0x48] sm:$0xff]  ;;  %v306_v60 = vld [vmem:[%s8266_s0 + $0x1c0] sm:$0xff] }
  0x20   : > { %v304_v61 = vld [vmem:[%s8266_s0 + $0x1b0] sm:$0xff]  ;;  %v253_v0 = vld [vmem:[%s8266_s0 + $0x18] sm:$0xff]  ;;  %v307_v1 = vld [vmem:[%s8266_s0 + $0x1c8] sm:$0xff]  ;;  %s8651_s19 = smov (!%p237_p4, %s5035_s19), 1 }
  0x21   : > { %613 = vadd.xlane.f32.xlu1 %v612_v22  ;;  %v513_v22 = vsel %vm383_vm0, %v293_v20, 0.0  ;;  %v260_v4 = vld [vmem:[%s8266_s0 + $0x50] sm:$0xff]  ;;  %v257_v5 = vld [vmem:[%s8266_s0 + $0x38] sm:$0xff]  ;;  %v263_v8 = vld [vmem:[%s8266_s0 + $0x68] sm:$0xff]  ;;  %s8233_s20 = sshll.u32 %s8651_s19, 3 }
  0x22   : > { %607 = vadd.xlane.f32.xlu0 %v606_v23  ;;  %v522_v23 = vsel %vm383_vm0, %v296_v21, 0.0  ;;  %v262_v9 = vld [vmem:[%s8266_s0 + $0x60] sm:$0xff]  ;;  %v308_v12 = vld [vmem:[%s8266_s0 + $0x1d0] sm:$0xff]  ;;  %v305_v13 = vld [vmem:[%s8266_s0 + $0x1b8] sm:$0xff]  ;;  %s240_s23 = scalar_lea.vmem %s8269_s3, %s8233_s20  ;;  %s248_s25 = scalar_lea.vmem %s8271_s5, %s8233_s20 }
  0x23   : > { %v558_v16 = vsel %vm383_vm0, %v308_v12, 0.0  ;;  %v549_v17 = vsel %vm383_vm0, %v305_v13, 0.0  ;;  %s244_s29 = scalar_lea.vmem %s8270_s4, %s8233_s20 }
  0x25   : > { %610 = vadd.xlane.f32.xlu1 %v609_v26  ;;  %v528_v26 = vsel %vm383_vm0, %v298_v24, 0.0  ;;  %v347_v24 = vld [vmem:[%s8266_s0 + $0x308] sm:$0xff] }
  0x26   : > { %616 = vadd.xlane.f32.xlu0 %v615_v27  ;;  %v531_v27 = vsel %vm383_vm0, %v299_v25, 0.0  ;;  %v346_v25 = vld [vmem:[%s8266_s0 + $0x300] sm:$0xff] }
  0x29   : > { %625 = vadd.xlane.f32.xlu1 %v624_v30  ;;  %v657_v30 = vsel %vm383_vm0, %v341_v28, 0.0  ;;  %v675_v28 = vsel %vm383_vm0, %v347_v24, 0.0  ;;  %v358_v24 = vld [vmem:[%s5389_s27 + $0x40] sm:$0xff] }
  0x2a   : > { %619 = vadd.xlane.f32.xlu0 %v618_v31  ;;  %v666_v31 = vsel %vm383_vm0, %v344_v29, 0.0  ;;  %v672_v29 = vsel %vm383_vm0, %v346_v25, 0.0  ;;  %v356_v25 = vld [vmem:[%s5389_s27 + $0x30] sm:$0xff] }
  0x2d   : > { %481 = vadd.xlane.f32.xlu1 %v480_v35  ;;  %v384_v35 = vsel %vm383_vm0, %v250_v33, 0.0 }
  0x2e   : > { %628 = vadd.xlane.f32.xlu0 %v627_v34  ;;  %v387_v34 = vsel %vm383_vm0, %v251_v32, 0.0 }
  0x31   : > { %493 = vadd.xlane.f32.xlu1 %v492_v39  ;;  %v396_v39 = vsel %vm383_vm0, %v254_v37, 0.0  ;;  %v266_v37 = vld [vmem:[%s8266_s0 + $0x80] sm:$0xff] }
  0x32   : > { %484 = vadd.xlane.f32.xlu0 %v483_v38  ;;  %v399_v38 = vsel %vm383_vm0, %v255_v36, 0.0  ;;  %v267_v36 = vld [vmem:[%s8266_s0 + $0x88] sm:$0xff] }
  0x35   : > { %622 = vadd.xlane.f32.xlu1 %v621_v43  ;;  %v525_v43 = vsel %vm383_vm0, %v297_v41, 0.0  ;;  %v432_v41 = vsel %vm383_vm0, %v266_v37, 0.0 }
  0x36   : > { %496 = vadd.xlane.f32.xlu0 %v495_v42  ;;  %v534_v42 = vsel %vm383_vm0, %v300_v40, 0.0  ;;  %v435_v40 = vsel %vm383_vm0, %v267_v36, 0.0 }
  0x39   : > { %637 = vadd.xlane.f32.xlu1 %v636_v47  ;;  %v540_v47 = vsel %vm383_vm0, %v302_v45, 0.0 }
  0x3a   : > { %631 = vadd.xlane.f32.xlu0 %v630_v46  ;;  %v543_v46 = vsel %vm383_vm0, %v303_v44, 0.0 }
  0x3d   : > { %487 = vadd.xlane.f32.xlu1 %v486_v51  ;;  %v669_v51 = vsel %vm383_vm0, %v345_v49, 0.0  ;;  %v348_v49 = vld [vmem:[%s8266_s0 + $0x310] sm:$0xff] }
  0x3e   : > { %640 = vadd.xlane.f32.xlu0 %v639_v50  ;;  %v390_v50 = vsel %vm383_vm0, %v252_v48, 0.0  ;;  %v350_v48 = vld [vmem:[%s5389_s27] sm:$0xff] }
  0x41   : > { %505 = vadd.xlane.f32.xlu1 %v504_v55  ;;  %v402_v55 = vsel %vm383_vm0, %v256_v53, 0.0  ;;  %v678_v53 = vsel %vm383_vm0, %v348_v49, 0.0 }
  0x42   : > { %499 = vadd.xlane.f32.xlu0 %v498_v54  ;;  %v408_v54 = vsel %vm383_vm0, %v258_v52, 0.0  ;;  %v785_v52 = vsel %vm383_vm0, %v350_v48, 0.0 }
  0x45   : > { %634 = vadd.xlane.f32.xlu1 %v633_v59  ;;  %v411_v59 = vsel %vm383_vm0, %v259_v57, 0.0 }
  0x46   : > { %508 = vadd.xlane.f32.xlu0 %v507_v58  ;;  %v537_v58 = vsel %vm383_vm0, %v301_v56, 0.0 }
  0x49   : > { %649 = vadd.xlane.f32.xlu1 %v648_v63  ;;  %v546_v63 = vsel %vm383_vm0, %v304_v61, 0.0  ;;  %v355_v61 = vld [vmem:[%s5389_s27 + $0x28] sm:$0xff] }
  0x4a   : > { %643 = vadd.xlane.f32.xlu0 %v642_v62  ;;  %v552_v62 = vsel %vm383_vm0, %v306_v60, 0.0  ;;  %v265_v60 = vld [vmem:[%s8266_s0 + $0x78] sm:$0xff] }
  0x4d   : > { %490 = vadd.xlane.f32.xlu1 %v489_v3  ;;  %v555_v3 = vsel %vm383_vm0, %v307_v1, 0.0  ;;  %v800_v1 = vsel %vm383_vm0, %v355_v61, 0.0  ;;  %v357_v61 = vld [vmem:[%s5389_s27 + $0x38] sm:$0xff] }
  0x4e   : > { %652 = vadd.xlane.f32.xlu0 %v651_v2  ;;  %v393_v2 = vsel %vm383_vm0, %v253_v0, 0.0  ;;  %v429_v0 = vsel %vm383_vm0, %v265_v60, 0.0  ;;  %v360_v60 = vld [vmem:[%s5389_s27 + $0x50] sm:$0xff] }
  0x51   : > { %511 = vadd.xlane.f32.xlu1 %v510_v7  ;;  %v405_v7 = vsel %vm383_vm0, %v257_v5, 0.0 }
  0x52   : > { %502 = vadd.xlane.f32.xlu0 %v501_v6  ;;  %v414_v6 = vsel %vm383_vm0, %v260_v4, 0.0 }
  0x55   : > { %520 = vadd.xlane.f32.xlu1 %v519_v11  ;;  %v420_v11 = vsel %vm383_vm0, %v262_v9, 0.0  ;;  %v271_v9 = vld [vmem:[%s8266_s0 + $0xa8] sm:$0xff] }
  0x56   : > { %517 = vadd.xlane.f32.xlu0 %v516_v10  ;;  %v423_v10 = vsel %vm383_vm0, %v263_v8, 0.0  ;;  %v313_v8 = vld [vmem:[%s8266_s0 + $0x1f8] sm:$0xff]  ;;  %v447_v13 = vsel %vm383_vm0, %v271_v9, 0.0 }
  0x57   : > { %v573_v12 = vsel %vm383_vm0, %v313_v8, 0.0 }
  0x59   : > { %655 = vadd.xlane.f32.xlu1 %v654_v15 }
  0x5a   : > { %646 = vadd.xlane.f32.xlu0 %v645_v14 }
  0x5d   : > { %664 = vadd.xlane.f32.xlu1 %v663_v19  ;;  %v310_v19 = vld [vmem:[%s8266_s0 + $0x1e0] sm:$0xff] }
  0x5e   : > { %661 = vadd.xlane.f32.xlu0 %v660_v18  ;;  %v311_v18 = vld [vmem:[%s8266_s0 + $0x1e8] sm:$0xff] }
  0x61   : > { %523 = vadd.xlane.f32.xlu1 %v522_v23  ;;  %v564_v23 = vsel %vm383_vm0, %v310_v19, 0.0 }
  0x62   : > { %514 = vadd.xlane.f32.xlu0 %v513_v22  ;;  %v567_v22 = vsel %vm383_vm0, %v311_v18, 0.0 }
  0x65   : > { %532 = vadd.xlane.f32.xlu1 %v531_v27 }
  0x66   : > { %529 = vadd.xlane.f32.xlu0 %v528_v26 }
  0x69   : > { %667 = vadd.xlane.f32.xlu1 %v666_v31  ;;  %v261_v31 = vld [vmem:[%s8266_s0 + $0x58] sm:$0xff] }
  0x6a   : > { %658 = vadd.xlane.f32.xlu0 %v657_v30  ;;  %v264_v30 = vld [vmem:[%s8266_s0 + $0x70] sm:$0xff] }
  0x6d   : > { %388 = vadd.xlane.f32.xlu1 %v387_v34  ;;  %v426_v34 = vsel %vm383_vm0, %v264_v30, 0.0  ;;  %v809_v30 = vsel %vm383_vm0, %v358_v24, 0.0 }
  0x6e   : > { %385 = vadd.xlane.f32.xlu0 %v384_v35  ;;  %v417_v35 = vsel %vm383_vm0, %v261_v31, 0.0  ;;  %v803_v31 = vsel %vm383_vm0, %v356_v25, 0.0 }
  0x71   : > { %400 = vadd.xlane.f32.xlu1 %v399_v38 }
  0x72   : > { %397 = vadd.xlane.f32.xlu0 %v396_v39 }
  0x75   : > { %535 = vadd.xlane.f32.xlu1 %v534_v42  ;;  %v312_v42 = vld [vmem:[%s8266_s0 + $0x1f0] sm:$0xff] }
  0x76   : > { %526 = vadd.xlane.f32.xlu0 %v525_v43  ;;  %v309_v43 = vld [vmem:[%s8266_s0 + $0x1d8] sm:$0xff] }
  0x79   : > { %544 = vadd.xlane.f32.xlu1 %v543_v46  ;;  %v570_v46 = vsel %vm383_vm0, %v312_v42, 0.0  ;;  %v274_v42 = vld [vmem:[%s8266_s0 + $0xc0] sm:$0xff] }
  0x7a   : > { %541 = vadd.xlane.f32.xlu0 %v540_v47  ;;  %v561_v47 = vsel %vm383_vm0, %v309_v43, 0.0  ;;  %v272_v43 = vld [vmem:[%s8266_s0 + $0xb0] sm:$0xff]  ;;  %v456_v48 = vsel %vm383_vm0, %v274_v42, 0.0 }
  0x7b   : > { %v450_v49 = vsel %vm383_vm0, %v272_v43, 0.0  ;;  %v364_v43 = vld [vmem:[%s5389_s27 + $0x70] sm:$0xff] }
  0x7d   : > { %391 = vadd.xlane.f32.xlu1 %v390_v50 }
  0x7e   : > { %670 = vadd.xlane.f32.xlu0 %v669_v51 }
  0x81   : > { %409 = vadd.xlane.f32.xlu1 %v408_v54  ;;  %v354_v54 = vld [vmem:[%s5389_s27 + $0x20] sm:$0xff] }
  0x82   : > { %403 = vadd.xlane.f32.xlu0 %v402_v55  ;;  %v351_v55 = vld [vmem:[%s5389_s27 + $0x8] sm:$0xff] }
  0x85   : > { %538 = vadd.xlane.f32.xlu1 %v537_v58  ;;  %v797_v58 = vsel %vm383_vm0, %v354_v54, 0.0 }
  0x86   : > { %412 = vadd.xlane.f32.xlu0 %v411_v59  ;;  %v788_v59 = vsel %vm383_vm0, %v351_v55, 0.0 }
  0x89   : > { %553 = vadd.xlane.f32.xlu1 %v552_v62 }
  0x8a   : > { %547 = vadd.xlane.f32.xlu0 %v546_v63 }
  0x8d   : > { %394 = vadd.xlane.f32.xlu1 %v393_v2  ;;  %v270_v2 = vld [vmem:[%s8266_s0 + $0xa0] sm:$0xff] }
  0x8e   : > { %556 = vadd.xlane.f32.xlu0 %v555_v3  ;;  %v268_v3 = vld [vmem:[%s8266_s0 + $0x90] sm:$0xff] }
  0x91   : > { %415 = vadd.xlane.f32.xlu1 %v414_v6  ;;  %v444_v6 = vsel %vm383_vm0, %v270_v2, 0.0  ;;  %v815_v2 = vsel %vm383_vm0, %v360_v60, 0.0 }
  0x92   : > { %406 = vadd.xlane.f32.xlu0 %v405_v7  ;;  %v438_v7 = vsel %vm383_vm0, %v268_v3, 0.0  ;;  %v806_v3 = vsel %vm383_vm0, %v357_v61, 0.0  ;;  %v367_v61 = vld [vmem:[%s5389_s27 + $0x88] sm:$0xff] }
  0x95   : > { %424 = vadd.xlane.f32.xlu1 %v423_v10 }
  0x96   : > { %421 = vadd.xlane.f32.xlu0 %v420_v11  ;;  %v5325_v14 = vpop.xlane.xlu1 %589 }
  0x97   : > { %v5327_v15 = vpop.xlane.xlu0 %577 }
  0x99   : > { %559 = vadd.xlane.f32.xlu1 %v558_v16  ;;  %v352_v16 = vld [vmem:[%s5389_s27 + $0x10] sm:$0xff] }
  0x9a   : > { %550 = vadd.xlane.f32.xlu0 %v549_v17  ;;  %v5337_v20 = vpop.xlane.xlu1 %592  ;;  %v349_v17 = vld [vmem:[%s8266_s0 + $0x318] sm:$0xff] }
  0x9b   : > { %v5339_v21 = vpop.xlane.xlu0 %580 }
  0x9d   : > { %568 = vadd.xlane.f32.xlu1 %v567_v22  ;;  %v791_v22 = vsel %vm383_vm0, %v352_v16, 0.0  ;;  %v276_v16 = vld [vmem:[%s8266_s0 + $0xd0] sm:$0xff] }
  0x9e   : > { %565 = vadd.xlane.f32.xlu0 %v564_v23  ;;  %v5350_v26 = vpop.xlane.xlu1 %595  ;;  %v681_v23 = vsel %vm383_vm0, %v349_v17, 0.0  ;;  %v273_v17 = vld [vmem:[%s8266_s0 + $0xb8] sm:$0xff]  ;;  %v462_v24 = vsel %vm383_vm0, %v276_v16, 0.0 }
  0x9f   : > { %v5352_v27 = vpop.xlane.xlu0 %583  ;;  %v453_v25 = vsel %vm383_vm0, %v273_v17, 0.0 }
  0xa1   : > { %676 = vadd.xlane.f32.xlu1 %v675_v28 }
  0xa2   : > { %673 = vadd.xlane.f32.xlu0 %v672_v29  ;;  %v5362_v32 = vpop.xlane.xlu1 %604 }
  0xa3   : > { %v5364_v33 = vpop.xlane.xlu0 %601 }
  0xa5   : > { %427 = vadd.xlane.f32.xlu1 %v426_v34  ;;  %v269_v34 = vld [vmem:[%s8266_s0 + $0x98] sm:$0xff] }
  0xa6   : > { %418 = vadd.xlane.f32.xlu0 %v417_v35  ;;  %v5374_v38 = vpop.xlane.xlu1 %598  ;;  %v359_v35 = vld [vmem:[%s5389_s27 + $0x48] sm:$0xff] }
  0xa7   : > { %v5376_v39 = vpop.xlane.xlu0 %586 }
  0xa9   : > { %436 = vadd.xlane.f32.xlu1 %v435_v40  ;;  %v441_v40 = vsel %vm383_vm0, %v269_v34, 0.0  ;;  %v1113_v34 = vlaneseq }
  0xaa   : > { %433 = vadd.xlane.f32.xlu0 %v432_v41  ;;  %v5391_v44 = vpop.xlane.xlu1 %613  ;;  %v812_v41 = vsel %vm383_vm0, %v359_v35, 0.0 }
  0xab   : > { %v5393_v45 = vpop.xlane.xlu0 %607 }
  0xad   : > { %571 = vadd.xlane.f32.xlu1 %v570_v46 }
  0xae   : > { %562 = vadd.xlane.f32.xlu0 %v561_v47  ;;  %v5401_v50 = vpop.xlane.xlu1 %610 }
  0xaf   : > { %v5403_v51 = vpop.xlane.xlu0 %616 }
  0xb1   : > { %786 = vadd.xlane.f32.xlu1 %v785_v52  ;;  %v353_v52 = vld [vmem:[%s5389_s27 + $0x18] sm:$0xff] }
  0xb2   : > { %679 = vadd.xlane.f32.xlu0 %v678_v53  ;;  %v5409_v56 = vpop.xlane.xlu1 %625  ;;  %v275_v53 = vld [vmem:[%s8266_s0 + $0xc8] sm:$0xff] }
  0xb3   : > { %v5411_v57 = vpop.xlane.xlu0 %619 }
  0xb5   : > { %798 = vadd.xlane.f32.xlu1 %v797_v58  ;;  %v794_v58 = vsel %vm383_vm0, %v353_v52, 0.0 }
  0xb6   : > { %789 = vadd.xlane.f32.xlu0 %v788_v59  ;;  %v5421_v63 = vpop.xlane.xlu1 %481  ;;  %v459_v59 = vsel %vm383_vm0, %v275_v53, 0.0 }
  0xb7   : > { %v5419_v62 = vpop.xlane.xlu0 %628 }
  0xb9   : > { %430 = vadd.xlane.f32.xlu1 %v429_v0 }
  0xba   : > { %801 = vadd.xlane.f32.xlu0 %v800_v1  ;;  %v5433_v5 = vpop.xlane.xlu1 %493 }
  0xbb   : > { %v5431_v4 = vpop.xlane.xlu0 %484 }
  0xbd   : > { %445 = vadd.xlane.f32.xlu1 %v444_v6  ;;  %v363_v6 = vld [vmem:[%s5389_s27 + $0x68] sm:$0xff] }
  0xbe   : > { %439 = vadd.xlane.f32.xlu0 %v438_v7  ;;  %v5445_v11 = vpop.xlane.xlu1 %622  ;;  %v362_v7 = vld [vmem:[%s5389_s27 + $0x60] sm:$0xff] }
  0xbf   : > { %v5443_v10 = vpop.xlane.xlu0 %496 }
  0xc1   : > { %574 = vadd.xlane.f32.xlu1 %v573_v12  ;;  %v824_v12 = vsel %vm383_vm0, %v363_v6, 0.0 }
  0xc2   : > { %448 = vadd.xlane.f32.xlu0 %v447_v13  ;;  %v5455_v19 = vpop.xlane.xlu1 %637  ;;  %v821_v13 = vsel %vm383_vm0, %v362_v7, 0.0  ;;  %v366_v7 = vld [vmem:[%s5389_s27 + $0x80] sm:$0xff] }
  0xc3   : > { %v5453_v18 = vpop.xlane.xlu0 %631 }
  0xc5   : > { %792 = vadd.xlane.f32.xlu1 %v791_v22 }
  0xc6   : > { %682 = vadd.xlane.f32.xlu0 %v681_v23  ;;  %v5463_v29 = vpop.xlane.xlu1 %487 }
  0xc7   : > { %v5461_v28 = vpop.xlane.xlu0 %640 }
  0xc9   : > { %810 = vadd.xlane.f32.xlu1 %v809_v30  ;;  %v279_v30 = vld [vmem:[%s8266_s0 + $0xe8] sm:$0xff] }
  0xca   : > { %804 = vadd.xlane.f32.xlu0 %v803_v31  ;;  %v5473_v37 = vpop.xlane.xlu1 %505  ;;  %v278_v31 = vld [vmem:[%s8266_s0 + $0xe0] sm:$0xff] }
  0xcb   : > { %v5471_v36 = vpop.xlane.xlu0 %499  ;;  %v468_v42 = vsel %vm383_vm0, %v278_v31, 0.0  ;;  %v370_v31 = vld [vmem:[%s5389_s27 + $0xa0] sm:$0xff] }
  0xcd   : > { %442 = vadd.xlane.f32.xlu1 %v441_v40 }
  0xce   : > { %813 = vadd.xlane.f32.xlu0 %v812_v41  ;;  %v5485_v47 = vpop.xlane.xlu1 %634  ;;  %v471_v41 = vsel %vm383_vm0, %v279_v30, 0.0  ;;  %v368_v30 = vld [vmem:[%s5389_s27 + $0x90] sm:$0xff] }
  0xcf   : > { %v5483_v46 = vpop.xlane.xlu0 %508 }
  0xd1   : > { %457 = vadd.xlane.f32.xlu1 %v456_v48  ;;  %v361_v48 = vld [vmem:[%s5389_s27 + $0x58] sm:$0xff] }
  0xd2   : > { %451 = vadd.xlane.f32.xlu0 %v450_v49  ;;  %v5495_v55 = vpop.xlane.xlu1 %649  ;;  %v5541_v49 = vand.u32 127, %v1113_v34  ;;  %v818_v60 = vsel %vm383_vm0, %v361_v48, 0.0  ;;  %v371_v48 = vld [vmem:[%s5389_s27 + $0xa8] sm:$0xff] }
  0xd3   : > { %v5493_v54 = vpop.xlane.xlu0 %643 }
  0xd4   : > { %8386 = vst [vmem:[#allocation5_spill] sm:$0xff] %v5541_v49  ;;  %v1133_v6 = vadd.s32 4294967272, %v5541_v49 }
  0xd5   : > { %795 = vadd.xlane.f32.xlu1 %v794_v58  ;;  %v827_v58 = vsel %vm383_vm0, %v364_v43, 0.0  ;;  %v833_v43 = vsel %vm383_vm0, %v366_v7, 0.0 }
  0xd6   : > { %460 = vadd.xlane.f32.xlu0 %v459_v59  ;;  %v5503_v1 = vpop.xlane.xlu1 %490  ;;  %v5548_v59 = vshrl.u32 %v1113_v34, 7 }
  0xd7   : > { %v5501_v0 = vpop.xlane.xlu0 %652 }
  0xd8   : > { %8387 = vst [vmem:[#allocation6_spill] sm:$0xff] %v5548_v59  ;;  %v5572_v34 = vsub.s32 %v5541_v49, %v5548_v59 }
  0xd9   : > { %816 = vadd.xlane.f32.xlu1 %v815_v2  ;;  %v1119_v2 = vadd.s32 4294967288, %v5541_v49 }
  0xda   : > { %807 = vadd.xlane.f32.xlu0 %v806_v3  ;;  %v5511_v9 = vpop.xlane.xlu1 %511  ;;  %v1126_v3 = vadd.s32 4294967280, %v5541_v49  ;;  %v5592_v49 = vsub.s32 %v1133_v6, %v5548_v59  ;;  %v5607_v6 = vmul.f32 0.0625, %v5350_v26  ;;  %v5622_v26 = vmul.f32 0.0625, %v5362_v32 }
  0xdb   : > { %v5509_v8 = vpop.xlane.xlu0 %502  ;;  %8383 = vst [vmem:[#allocation2_spill] sm:$0xff] %v5511_v9  ;;  %v5643_v32 = vmul.f32 0.0625, %v5374_v38  ;;  %v5661_v38 = vmul.f32 0.0625, %v5403_v51 }
  0xdc   : > { %8393 = vst [vmem:[#allocation12_spill] sm:$0xff] %v5607_v6  ;;  %8396 = vst [vmem:[#allocation15_spill] sm:$0xff] %v5622_v26 }
  0xdd   : > { %825 = vadd.xlane.f32.xlu1 %v824_v12  ;;  %v277_v12 = vld [vmem:[%s8266_s0 + $0xd8] sm:$0xff]  ;;  %8401 = vst [vmem:[#allocation20_spill] sm:$0xff] %v5643_v32  ;;  %8405 = vst [vmem:[#allocation24_spill] sm:$0xff] %v5661_v38 }
  0xde   : > { %822 = vadd.xlane.f32.xlu0 %v821_v13  ;;  %v5523_v23 = vpop.xlane.xlu1 %520  ;;  %v280_v13 = vld [vmem:[%s8266_s0 + $0xf0] sm:$0xff] }
  0xdf   : > { %v5521_v22 = vpop.xlane.xlu0 %517  ;;  %8385 = vst [vmem:[#allocation4_spill] sm:$0xff] %v5523_v23  ;;  %v372_v23 = vld [vmem:[%s5389_s27 + $0xb0] sm:$0xff] }
  0xe0   : > { %8384 = vst [vmem:[#allocation3_spill] sm:$0xff] %v5521_v22 }
  0xe1   : > { %463 = vadd.xlane.f32.xlu1 %v462_v24  ;;  %v836_v24 = vsel %vm383_vm0, %v367_v61, 0.0  ;;  %v5589_v61 = vsub.s32 %v1126_v3, %v5548_v59  ;;  %v5604_v3 = vmul.f32 0.0625, %v5339_v21 }
  0xe2   : > { %454 = vadd.xlane.f32.xlu0 %v453_v25  ;;  %v5535_v40 = vpop.xlane.xlu1 %655  ;;  %v365_v25 = vld [vmem:[%s5389_s27 + $0x78] sm:$0xff] }
  0xe3   : > { %v5533_v35 = vpop.xlane.xlu0 %646  ;;  %v830_v7 = vsel %vm383_vm0, %v365_v25, 0.0  ;;  %8392 = vst [vmem:[#allocation11_spill] sm:$0xff] %v5604_v3 }
  0xe5   : > { %472 = vadd.xlane.f32.xlu1 %v471_v41  ;;  %v5575_v41 = vmul.f32 0.0625, %v5325_v14  ;;  %v465_v14 = vsel %vm383_vm0, %v277_v12, 0.0 }
  0xe6   : > { %469 = vadd.xlane.f32.xlu0 %v468_v42  ;;  %v5545_v53 = vpop.xlane.xlu1 %664  ;;  %v5578_v42 = vmul.f32 0.0625, %v5337_v20  ;;  %v474_v20 = vsel %vm383_vm0, %v280_v13, 0.0 }
  0xe7   : > { %v5543_v52 = vpop.xlane.xlu0 %661  ;;  %8390 = vst [vmem:[#allocation9_spill] sm:$0xff] %v5575_v41 }
  0xe8   : > { %8391 = vst [vmem:[#allocation10_spill] sm:$0xff] %v5578_v42  ;;  %v982_v21 = vmul.f32 %v5578_v42, %v5578_v42  ;;  %v5640_v42 = vmul.f32 0.0625, %v5327_v15  ;;  %v983_v15 = vmul.f32 %v5607_v6, %v5607_v6  ;;  %v986_v6 = vmul.f32 %v5622_v26, %v5622_v26 }
  0xe9   : > { %828 = vadd.xlane.f32.xlu1 %v827_v58  ;;  %v281_v58 = vld [vmem:[%s8266_s0 + $0xf8] sm:$0xff] }
  0xea   : > { %819 = vadd.xlane.f32.xlu0 %v818_v60  ;;  %v5564_v17 = vpop.xlane.xlu1 %523  ;;  %v5586_v60 = vsub.s32 %v1119_v2, %v5548_v59  ;;  %v369_v2 = vld [vmem:[%s5389_s27 + $0x98] sm:$0xff]  ;;  %v5615_v25 = vsel %vm383_vm0, %v281_v58, 0.0  ;;  %8400 = vst [vmem:[#allocation19_spill] sm:$0xff] %v5640_v42  ;;  %v5658_v59 = vmul.f32 0.0625, %v5391_v44 }
  0xeb   : > { %v5562_v16 = vpop.xlane.xlu0 %514  ;;  %8389 = vst [vmem:[#allocation8_spill] sm:$0xff] %v5564_v17  ;;  %v839_v17 = vsel %vm383_vm0, %v368_v30, 0.0  ;;  %v981_v30 = vmul.f32 %v5575_v41, %v5575_v41  ;;  %v5634_v58 = vsel %vm383_vm0, %v369_v2, 0.0  ;;  %v5637_v41 = vsel %vm383_vm0, %v372_v23, 0.0  ;;  %v375_v2 = vld [vmem:[%s5389_s27 + $0xc8] sm:$0xff] }
  0xec   : > { %8388 = vst [vmem:[#allocation7_spill] sm:$0xff] %v5562_v16  ;;  %v5599_v16 = vsel %vm383_vm0, %v370_v31, 0.0  ;;  %v5625_v31 = vmul.f32 0.0625, %v5364_v33  ;;  %v5646_v33 = vmul.f32 0.0625, %v5376_v39  ;;  %v978_v23 = vmul.f32 %v5604_v3, %v5604_v3  ;;  %8404 = vst [vmem:[#allocation23_spill] sm:$0xff] %v5658_v59 }
  0xed   : > { %837 = vadd.xlane.f32.xlu1 %v836_v24  ;;  %v848_v24 = vsel %vm383_vm0, %v371_v48, 0.0  ;;  %v5631_v48 = vmul.f32 0.0625, %v5393_v45  ;;  %v374_v45 = vld [vmem:[%s5389_s27 + $0xc0] sm:$0xff]  ;;  %v1451_v3 = vrot.slane %v982_v21, %v5586_v60  ;;  %v984_v21 = vmul.f32 %v5643_v32, %v5643_v32 }
  0xee   : > { %834 = vadd.xlane.f32.xlu0 %v833_v43  ;;  %v5611_v13 = vpop.xlane.xlu1 %532  ;;  %8397 = vst [vmem:[#allocation16_spill] sm:$0xff] %v5625_v31  ;;  %v5628_v43 = vmul.f32 0.0625, %v5352_v27  ;;  %8402 = vst [vmem:[#allocation21_spill] sm:$0xff] %v5646_v33  ;;  %v5649_v27 = vmul.f32 0.0625, %v5401_v50  ;;  %v985_v44 = vmul.f32 %v5625_v31, %v5625_v31  ;;  %v980_v26 = vmul.f32 %v5646_v33, %v5646_v33 }
  0xef   : > { %v5609_v12 = vpop.xlane.xlu0 %529  ;;  %8395 = vst [vmem:[#allocation14_spill] sm:$0xff] %v5611_v13  ;;  %8399 = vst [vmem:[#allocation18_spill] sm:$0xff] %v5631_v48  ;;  %v5678_v13 = vsel %vm383_vm0, %v374_v45, 0.0  ;;  %v1432_v45 = vrot.slane %v978_v23, %v5586_v60  ;;  %v990_v32 = vmul.f32 %v5661_v38, %v5661_v38 }
  0xf0   : > { %8394 = vst [vmem:[#allocation13_spill] sm:$0xff] %v5609_v12  ;;  %8398 = vst [vmem:[#allocation17_spill] sm:$0xff] %v5628_v43  ;;  %v979_v51 = vmul.f32 %v5628_v43, %v5628_v43  ;;  %v5681_v12 = vsel %vm383_vm0, %v375_v2, 0.0  ;;  %v988_v31 = vmul.f32 %v5649_v27, %v5649_v27  ;;  %v373_v43 = vld [vmem:[%s5389_s27 + $0xb8] sm:$0xff]  ;;  %v1456_v2 = vrot.slane %v983_v15, %v5589_v61 }
  0xf1   : > { %8403 = vst [vmem:[#allocation22_spill] sm:$0xff] %v5649_v27  ;;  %475 = vadd.xlane.f32.xlu1 %v474_v20  ;;  %v1447_v20 = vrot.slane %v981_v30, %v5572_v34  ;;  %v977_v30 = vmul.f32 %v5640_v42, %v5640_v42  ;;  %v989_v42 = vmul.f32 %v5658_v59, %v5658_v59  ;;  %v5707_v15 = vmul.f32 0.0625, %v5409_v56 }
  0xf2   : > { %466 = vadd.xlane.f32.xlu0 %v465_v14  ;;  %v5665_v50 = vpop.xlane.xlu1 %667  ;;  %v987_v14 = vmul.f32 %v5631_v48, %v5631_v48  ;;  %v376_v48 = vld [vmem:[%s5389_s27 + $0xd0] sm:$0xff]  ;;  %v1470_v27 = vrot.slane %v986_v6, %v5586_v60  ;;  %v1466_v23 = vrot.slane %v985_v44, %v5572_v34  ;;  %v1437_v59 = vrot.slane %v979_v51, %v5589_v61  ;;  %v379_v44 = vld [vmem:[%s5389_s27 + $0xe8] sm:$0xff]  ;;  %v377_v51 = vld [vmem:[%s5389_s27 + $0xd8] sm:$0xff] }
  0xf3   : > { %v5663_v39 = vpop.xlane.xlu0 %658  ;;  %8408 = vst [vmem:[#allocation27_spill] sm:$0xff] %v5707_v15  ;;  %v1461_v6 = vrot.slane %v984_v21, %v5592_v49  ;;  %v1480_v56 = vrot.slane %v988_v31, %v5592_v49  ;;  %v1489_v9 = vrot.slane %v990_v32, %v5586_v60  ;;  %v5739_v31 = vmul.f32 %v5707_v15, %v5707_v15 }
  0xf4   : > { %v1475_v38 = vrot.slane %v987_v14, %v5589_v61 }
  0xf5   : > { %840 = vadd.xlane.f32.xlu1 %v839_v17  ;;  %v1452_v17 = vsel %vm1124_vm1, %v1451_v3, %v1447_v20  ;;  %v1428_v3 = vrot.slane %v977_v30, %v5572_v34  ;;  %v1442_v20 = vrot.slane %v980_v26, %v5592_v49 }
  0xf6   : > { %831 = vadd.xlane.f32.xlu0 %v830_v7  ;;  %v5699_v22 = vpop.xlane.xlu1 %388  ;;  %v5712_v7 = vsel %vm383_vm0, %v373_v43, 0.0  ;;  %v1457_v14 = vsel %vm1131_vm2, %v1456_v2, %v1452_v17  ;;  %v1485_v43 = vrot.slane %v989_v42, %v5572_v34  ;;  %v5750_v2 = vsel %vm383_vm0, %v377_v51, 0.0 }
  0xf7   : > { %8406 = vst [vmem:[#allocation25_spill] sm:$0xff] %v5699_v22  ;;  %v5701_v33 = vpop.xlane.xlu0 %385  ;;  %v5715_v22 = vsel %vm383_vm0, %v376_v48, 0.0  ;;  %v5728_v48 = vmul.f32 0.0625, %v5411_v57  ;;  %v1433_v26 = vsel %vm1124_vm1, %v1432_v45, %v1428_v3  ;;  %v5753_v45 = vsel %vm1138_vm3, %v1461_v6, %v1457_v14 }
  0xf8   : > { %8407 = vst [vmem:[#allocation26_spill] sm:$0xff] %v5701_v33  ;;  %v378_v33 = vld [vmem:[%s5389_s27 + $0xe0] sm:$0xff]  ;;  %v1438_v57 = vsel %vm1131_vm2, %v1437_v59, %v1433_v26  ;;  %v5766_v59 = vsel %vm1124_vm1, %v1489_v9, %v1485_v43  ;;  %v5776_v3 = vmul.f32 0.0625, %v5453_v18  ;;  %v1504_v9 = vrot.slane %v5739_v31, %v5572_v34 }
  0xf9   : > { %849 = vadd.xlane.f32.xlu1 %v848_v24  ;;  %v1471_v24 = vsel %vm1124_vm1, %v1470_v27, %v1466_v23  ;;  %v5742_v42 = vsel %vm383_vm0, %v378_v33, 0.0  ;;  %v5756_v27 = vsel %vm1138_vm3, %v1442_v20, %v1438_v57  ;;  %v5762_v33 = vmul.f32 0.0625, %v5419_v62 }
  0xfa   : > { %846 = vadd.xlane.f32.xlu0 %v5599_v16  ;;  %v5731_v30 = vpop.xlane.xlu1 %400  ;;  %v1476_v32 = vsel %vm1131_vm2, %v1475_v38, %v1471_v24  ;;  %v5747_v16 = vsel %vm383_vm0, %v379_v44, 0.0  ;;  %v5770_v38 = vmul.f32 %v5728_v48, %v5728_v48  ;;  %v5773_v23 = vmul.f32 0.0625, %v5445_v11  ;;  %8410 = vst [vmem:[#allocation29_spill] sm:$0xff] %v5776_v3 }
  0xfb   : > { %v5733_v21 = vpop.xlane.xlu0 %397  ;;  %v5759_v17 = vsel %vm1138_vm3, %v1480_v56, %v1476_v32  ;;  %v5789_v20 = vmul.f32 0.0625, %v5461_v28  ;;  %v5792_v11 = vmul.f32 0.0625, %v5485_v47  ;;  %v5795_v18 = vmul.f32 0.0625, %v5493_v54 }
  0xfc   : > { %8409 = vst [vmem:[#allocation28_spill] sm:$0xff] %v5773_v23  ;;  %v5801_v56 = vmul.f32 0.0625, %v5501_v0  ;;  %v5804_v44 = vmul.f32 0.0625, %v5533_v35  ;;  %v5809_v28 = vmul.f32 0.0625, %v5535_v40  ;;  %v5812_v47 = vmul.f32 0.0625, %v5543_v52 }
  0xfd   : > { %843 = vadd.xlane.f32.xlu1 %v5634_v58  ;;  %v5786_v58 = vmul.f32 0.0625, %v5455_v19  ;;  %8412 = vst [vmem:[#allocation31_spill] sm:$0xff] %v5789_v20  ;;  %8413 = vst [vmem:[#allocation32_spill] sm:$0xff] %v5792_v11  ;;  %v994_v19 = vmul.f32 %v5762_v33, %v5762_v33  ;;  %v5815_v54 = vmul.f32 0.0625, %v5545_v53  ;;  %v995_v0 = vmul.f32 %v5776_v3, %v5776_v3 }
  0xfe   : > { %478 = vadd.xlane.f32.xlu0 %v5615_v25  ;;  %v5779_v6 = vpop.xlane.xlu1 %535  ;;  %8414 = vst [vmem:[#allocation33_spill] sm:$0xff] %v5795_v18  ;;  %v5798_v25 = vmul.f32 0.0625, %v5495_v55  ;;  %8416 = vst [vmem:[#allocation35_spill] sm:$0xff] %v5801_v56  ;;  %v992_v55 = vmul.f32 %v5773_v23, %v5773_v23  ;;  %v5823_v35 = vmul.f32 0.0625, %v5663_v39  ;;  %v5826_v40 = vmul.f32 0.0625, %v5665_v50 }
  0xff   : > { %v5781_v62 = vpop.xlane.xlu0 %526  ;;  %8411 = vst [vmem:[#allocation30_spill] sm:$0xff] %v5786_v58  ;;  %8417 = vst [vmem:[#allocation36_spill] sm:$0xff] %v5804_v44  ;;  %v997_v51 = vmul.f32 %v5786_v58, %v5786_v58  ;;  %v998_v14 = vmul.f32 %v5789_v20, %v5789_v20  ;;  %v996_v39 = vmul.f32 %v5792_v11, %v5792_v11 }
 0x100   : > { %8415 = vst [vmem:[#allocation34_spill] sm:$0xff] %v5798_v25  ;;  %8418 = vst [vmem:[#allocation37_spill] sm:$0xff] %v5809_v28  ;;  %v1001_v50 = vmul.f32 %v5798_v25, %v5798_v25  ;;  %v1002_v43 = vmul.f32 %v5801_v56, %v5801_v56  ;;  %v1000_v26 = vmul.f32 %v5804_v44, %v5804_v44 }
 0x101   : > { %8419 = vst [vmem:[#allocation38_spill] sm:$0xff] %v5812_v47  ;;  %8420 = vst [vmem:[#allocation39_spill] sm:$0xff] %v5815_v54  ;;  %858 = vadd.xlane.f32.xlu1 %v5678_v13  ;;  %v1494_v13 = vrot.slane %v5770_v38, %v5589_v61  ;;  %v1508_v24 = vrot.slane %v994_v19, %v5586_v60  ;;  %v1003_v31 = vmul.f32 %v5809_v28, %v5809_v28 }
 0x102   : > { %8421 = vst [vmem:[#allocation40_spill] sm:$0xff] %v5823_v35  ;;  %8422 = vst [vmem:[#allocation41_spill] sm:$0xff] %v5826_v40  ;;  %852 = vadd.xlane.f32.xlu0 %v5637_v41  ;;  %v5829_v52 = vpop.xlane.xlu1 %544  ;;  %v999_v41 = vmul.f32 %v5795_v18, %v5795_v18  ;;  %v1005_v57 = vmul.f32 %v5812_v47, %v5812_v47  ;;  %v1006_v32 = vmul.f32 %v5815_v54, %v5815_v54 }
 0x103   : > { %v5831_v53 = vpop.xlane.xlu0 %541  ;;  %v1499_v38 = vrot.slane %v992_v55, %v5592_v49  ;;  %v1513_v56 = vrot.slane %v995_v0, %v5589_v61  ;;  %v1004_v18 = vmul.f32 %v5823_v35, %v5823_v35  ;;  %v1007_v19 = vmul.f32 %v5826_v40, %v5826_v40 }
 0x104   : > { %v1523_v54 = vrot.slane %v997_v51, %v5572_v34  ;;  %v1518_v55 = vrot.slane %v996_v39, %v5592_v49  ;;  %v1532_v0 = vrot.slane %v999_v41, %v5589_v61  ;;  %v1542_v35 = vrot.slane %v1001_v50, %v5572_v34 }
 0x105   : > { %855 = vadd.xlane.f32.xlu1 %v5712_v7  ;;  %v1527_v7 = vrot.slane %v998_v14, %v5586_v60  ;;  %v1546_v40 = vrot.slane %v1002_v43, %v5586_v60  ;;  %v1551_v47 = vrot.slane %v1003_v31, %v5589_v61  ;;  %v1561_v15 = vrot.slane %v1005_v57, %v5572_v34 }
 0x106   : > { %861 = vadd.xlane.f32.xlu0 %v5681_v12  ;;  %v5864_v28 = vpop.xlane.xlu1 %391  ;;  %v1537_v12 = vrot.slane %v1000_v26, %v5592_v49  ;;  %v1565_v51 = vrot.slane %v1006_v32, %v5586_v60  ;;  %v1509_v39 = vsel %vm1124_vm1, %v1508_v24, %v1504_v9  ;;  %v1556_v41 = vrot.slane %v1004_v18, %v5592_v49  ;;  %v380_v32 = vld [vmem:[%s5389_s27 + $0xf0] sm:$0xff] }
 0x107   : > { %v671_v58 = vpop.xlane.xlu0 %670  ;;  %v1570_v50 = vrot.slane %v1007_v19, %v5589_v61  ;;  %v1528_v57 = vsel %vm1124_vm1, %v1527_v7, %v1523_v54  ;;  %v1617_v9 = vsel %vm1596_vm4, %v5753_v45, %v5756_v27  ;;  %v1547_v24 = vsel %vm1124_vm1, %v1546_v40, %v1542_v35 }
 0x108   : > { %v5869_v23 = vmul.f32 0.0625, %v671_v58  ;;  %v1495_v58 = vsel %vm1131_vm2, %v1494_v13, %v5766_v59  ;;  %v381_v13 = vld [vmem:[%s5389_s27 + $0xf8] sm:$0xff]  ;;  %v1552_v54 = vsel %vm1131_vm2, %v1551_v47, %v1547_v24  ;;  %v1566_v19 = vsel %vm1124_vm1, %v1565_v51, %v1561_v15 }
 0x109   : > { %870 = vadd.xlane.f32.xlu1 %v5742_v42  ;;  %v1500_v31 = vsel %vm1138_vm3, %v1499_v38, %v1495_v58  ;;  %v1514_v42 = vsel %vm1131_vm2, %v1513_v56, %v1509_v39  ;;  %v1618_v38 = vsel %vm1598_vm5, %v5759_v17, %v1617_v9  ;;  %v878_v35 = vsel %vm383_vm0, %v381_v13, 0.0 }
 0x10a   : > { %8423 = vst [vmem:[#allocation42_spill] sm:$0xff] %v5869_v23  ;;  %v1008_v14 = vmul.f32 %v5869_v23, %v5869_v23  ;;  %864 = vadd.xlane.f32.xlu0 %v5715_v22  ;;  %v5887_v43 = vpop.xlane.xlu1 %409  ;;  %v1519_v18 = vsel %vm1138_vm3, %v1518_v55, %v1514_v42  ;;  %v1533_v22 = vsel %vm1131_vm2, %v1532_v0, %v1528_v57  ;;  %v875_v7 = vsel %vm383_vm0, %v380_v32, 0.0 }
 0x10b   : > { %v5889_v26 = vpop.xlane.xlu0 %403  ;;  %v1538_v56 = vsel %vm1138_vm3, %v1537_v12, %v1533_v22  ;;  %v1557_v40 = vsel %vm1138_vm3, %v1556_v41, %v1552_v54  ;;  %v1571_v17 = vsel %vm1131_vm2, %v1570_v50, %v1566_v19  ;;  %v5953_v22 = vmul.f32 0.0625, %v5431_v4 }
 0x10c   : > { %v1575_v59 = vrot.slane %v1008_v14, %v5592_v49  ;;  %v5964_v54 = vmul.f32 0.0625, %v5433_v5  ;;  %v5967_v19 = vmul.f32 0.0625, %v5443_v10  ;;  %v5973_v4 = vmul.f32 0.0625, %v5471_v36  ;;  %v8434_v36 = vld [vmem:[#allocation2_spill] sm:$0xff] }
 0x10d   : > { %867 = vadd.xlane.f32.xlu1 %v5750_v2  ;;  %v1619_v2 = vsel %vm1600_vm6, %v1500_v31, %v1618_v38  ;;  %8425 = vst [vmem:[#allocation44_spill] sm:$0xff] %v5953_v22  ;;  %v5987_v10 = vmul.f32 0.0625, %v5509_v8 }
 0x10e   : > { %873 = vadd.xlane.f32.xlu0 %v5747_v16  ;;  %v5910_v45 = vpop.xlane.xlu1 %538  ;;  %v1576_v47 = vsel %vm1138_vm3, %v1575_v59, %v1571_v17  ;;  %v1620_v15 = vsel %vm1602_vm7, %v1519_v18, %v1619_v2  ;;  %v5950_v18 = vmul.f32 0.0625, %v5421_v63  ;;  %8426 = vst [vmem:[#allocation45_spill] sm:$0xff] %v5964_v54  ;;  %8427 = vst [vmem:[#allocation46_spill] sm:$0xff] %v5967_v19  ;;  %v5970_v63 = vmul.f32 0.0625, %v5463_v29 }
 0x10f   : > { %v5912_v27 = vpop.xlane.xlu0 %412  ;;  %v1621_v16 = vsel %vm1604_vm8, %v1538_v56, %v1620_v15  ;;  %v946_v56 = vmul.f32 %v5953_v22, %v5953_v22  ;;  %8429 = vst [vmem:[#allocation48_spill] sm:$0xff] %v5973_v4  ;;  %v5982_v17 = vmul.f32 0.0625, %v5503_v1  ;;  %8433 = vst [vmem:[#allocation52_spill] sm:$0xff] %v5987_v10  ;;  %v950_v1 = vmul.f32 %v5967_v19, %v5967_v19 }
 0x110   : > { %v1622_v55 = vsel %vm1606_vm9, %v1557_v40, %v1621_v16  ;;  %8424 = vst [vmem:[#allocation43_spill] sm:$0xff] %v5950_v18  ;;  %v945_v38 = vmul.f32 %v5950_v18, %v5950_v18  ;;  %8428 = vst [vmem:[#allocation47_spill] sm:$0xff] %v5970_v63  ;;  %v5979_v40 = vmul.f32 0.0625, %v5483_v46  ;;  %v949_v46 = vmul.f32 %v5964_v54, %v5964_v54 }
 0x111   : > { %879 = vadd.xlane.f32.xlu1 %v878_v35  ;;  %v1623_v51 = vsel %vm1608_vm10, %v1576_v47, %v1622_v55  ;;  %v5976_v35 = vmul.f32 0.0625, %v5473_v37  ;;  %8432 = vst [vmem:[#allocation51_spill] sm:$0xff] %v5982_v17  ;;  %v1280_v37 = vrot.slane %v946_v56, %v5586_v60  ;;  %v947_v47 = vmul.f32 %v5970_v63, %v5970_v63 }
 0x112   : > { %876 = vadd.xlane.f32.xlu0 %v875_v7  ;;  %v5923_v0 = vpop.xlane.xlu1 %553  ;;  %v1635_v14 = vsel %vm1628_vm11, %v1623_v51, 0.0  ;;  %8431 = vst [vmem:[#allocation50_spill] sm:$0xff] %v5979_v40  ;;  %v1276_v29 = vrot.slane %v945_v38, %v5572_v34  ;;  %v5993_v7 = vmul.f32 0.0625, %v8434_v36  ;;  %v951_v8 = vmul.f32 %v5973_v4, %v5973_v4  ;;  %v8436_v38 = vld [vmem:[#allocation3_spill] sm:$0xff]  ;;  %v8438_v36 = vld [vmem:[#allocation4_spill] sm:$0xff] }
 0x113   : > { %v5925_v12 = vpop.xlane.xlu0 %547  ;;  %8430 = vst [vmem:[#allocation49_spill] sm:$0xff] %v5976_v35  ;;  %v953_v15 = vmul.f32 %v5976_v35, %v5976_v35  ;;  %v954_v16 = vmul.f32 %v5979_v40, %v5979_v40  ;;  %v948_v55 = vmul.f32 %v5982_v17, %v5982_v17  ;;  %v6015_v56 = vmul.f32 0.0625, %v8436_v38  ;;  %v8440_v4 = vld [vmem:[#allocation7_spill] sm:$0xff]  ;;  %v8442_v17 = vld [vmem:[#allocation8_spill] sm:$0xff] }
 0x114   : > { %8435 = vst [vmem:[#allocation2_spill] sm:$0xff] %v5993_v7  ;;  %v6018_v23 = vmul.f32 0.0625, %v8438_v36  ;;  %v6021_v54 = vmul.f32 0.0625, %v8440_v4  ;;  %v955_v40 = vmul.f32 %v5993_v7, %v5993_v7  ;;  %v6028_v44 = vmul.f32 0.0625, %v8442_v17 }
 0x115   : > { %8437 = vst [vmem:[#allocation3_spill] sm:$0xff] %v6015_v56  ;;  %v1281_v25 = vsel %vm1124_vm1, %v1280_v37, %v1276_v29  ;;  %v1299_v38 = vrot.slane %v950_v1, %v5586_v60  ;;  %v1285_v36 = vrot.slane %v947_v47, %v5589_v61  ;;  %v1304_v11 = vrot.slane %v951_v8, %v5589_v61 }
 0x116   : > { %1636 = vadd.xlane.f32.xlu0 %v1635_v14  ;;  %v5929_v58 = vpop.xlane.xlu1 %394  ;;  %v952_v14 = vmul.f32 %v5987_v10, %v5987_v10  ;;  %8439 = vst [vmem:[#allocation4_spill] sm:$0xff] %v6018_v23  ;;  %8441 = vst [vmem:[#allocation7_spill] sm:$0xff] %v6021_v54  ;;  %v1295_v10 = vrot.slane %v949_v46, %v5572_v34  ;;  %v1314_v4 = vrot.slane %v953_v15, %v5572_v34  ;;  %v8444_v15 = vld [vmem:[#allocation13_spill] sm:$0xff] }
 0x117   : > { %v5931_v39 = vpop.xlane.xlu0 %556  ;;  %8443 = vst [vmem:[#allocation8_spill] sm:$0xff] %v6028_v44  ;;  %v1318_v35 = vrot.slane %v954_v16, %v5586_v60  ;;  %v1290_v63 = vrot.slane %v948_v55, %v5592_v49  ;;  %v957_v29 = vmul.f32 %v6015_v56, %v6015_v56  ;;  %v958_v37 = vmul.f32 %v6018_v23, %v6018_v23  ;;  %v8445_v55 = vld [vmem:[#allocation14_spill] sm:$0xff] }
 0x118   : > { %v1309_v17 = vrot.slane %v952_v14, %v5592_v49  ;;  %v956_v46 = vmul.f32 %v6021_v54, %v6021_v54  ;;  %v1323_v47 = vrot.slane %v955_v40, %v5589_v61  ;;  %v959_v8 = vmul.f32 %v6028_v44, %v6028_v44 }
 0x119   : > { %v6049_v16 = vmul.f32 0.0625, %v8444_v15  ;;  %v6052_v14 = vmul.f32 0.0625, %v8445_v55  ;;  %v1300_v56 = vsel %vm1124_vm1, %v1299_v38, %v1295_v10  ;;  %v1286_v20 = vsel %vm1131_vm2, %v1285_v36, %v1281_v25 }
 0x11a   : > { %v5933_v41 = vpop.xlane.xlu1 %415  ;;  %v1305_v23 = vsel %vm1131_vm2, %v1304_v11, %v1300_v56  ;;  %v1319_v54 = vsel %vm1124_vm1, %v1318_v35, %v1314_v4  ;;  %v1291_v3 = vsel %vm1138_vm3, %v1290_v63, %v1286_v20  ;;  %v1333_v15 = vrot.slane %v957_v29, %v5572_v34 }
 0x11b   : > { %v5935_v50 = vpop.xlane.xlu0 %406  ;;  %8446 = vst [vmem:[#allocation13_spill] sm:$0xff] %v6052_v14  ;;  %v1310_v44 = vsel %vm1138_vm3, %v1309_v17, %v1305_v23  ;;  %v1337_v19 = vrot.slane %v958_v37, %v5586_v60  ;;  %v1328_v55 = vrot.slane %v956_v46, %v5592_v49  ;;  %v1324_v25 = vsel %vm1131_vm2, %v1323_v47, %v1319_v54 }
 0x11c   : > { %v1342_v11 = vrot.slane %v959_v8, %v5589_v61  ;;  %v961_v35 = vmul.f32 %v6049_v16, %v6049_v16  ;;  %v962_v20 = vmul.f32 %v6052_v14, %v6052_v14  ;;  %v6074_v23 = vmul.f32 0.0625, %v5779_v6 }
 0x11d   : > { %v6077_v63 = vmul.f32 0.0625, %v5829_v52  ;;  %v6080_v10 = vmul.f32 0.0625, %v5831_v53  ;;  %v1610_v56 = vsel %vm1596_vm4, %v1310_v44, %v1291_v3  ;;  %v6084_v54 = vmul.f32 0.0625, %v5781_v62 }
 0x11e   : > { %v5937_v31 = vpop.xlane.xlu1 %424  ;;  %8447 = vst [vmem:[#allocation14_spill] sm:$0xff] %v6074_v23  ;;  %v6087_v38 = vmul.f32 0.0625, %v5910_v45  ;;  %v6090_v36 = vmul.f32 0.0625, %v5925_v12  ;;  %v4996_v6 = vmov 0   ;;  %v1338_v52 = vsel %vm1124_vm1, %v1337_v19, %v1333_v15 }
 0x11f   : > { %v5939_v42 = vpop.xlane.xlu0 %421  ;;  %8448 = vst [vmem:[#allocation53_spill] sm:$0xff] %v6077_v63  ;;  %4815 = vset.pattern.permute.xlu0 %v4996_v6  ;;  %4814 = vset.pattern.permute.xlu1 %v4996_v6  ;;  %v1329_v53 = vsel %vm1138_vm3, %v1328_v55, %v1324_v25  ;;  %v6097_v3 = vmul.f32 0.0625, %v5923_v0  ;;  %v6100_v62 = vmul.f32 0.0625, %v5931_v39  ;;  %v1343_v45 = vsel %vm1131_vm2, %v1342_v11, %v1338_v52 }
 0x120   : > { %8449 = vst [vmem:[#allocation54_spill] sm:$0xff] %v6087_v38  ;;  %8450 = vst [vmem:[#allocation55_spill] sm:$0xff] %v6090_v36  ;;  %v1352_v12 = vrot.slane %v961_v35, %v5572_v34  ;;  %v1356_v17 = vrot.slane %v962_v20, %v5586_v60  ;;  %v963_v19 = vmul.f32 %v6074_v23, %v6074_v23 }
 0x121   : > { %8451 = vst [vmem:[#allocation56_spill] sm:$0xff] %v6097_v3  ;;  %8452 = vst [vmem:[#allocation57_spill] sm:$0xff] %v6100_v62  ;;  %v966_v0 = vmul.f32 %v6077_v63, %v6077_v63  ;;  %v965_v39 = vmul.f32 %v6080_v10, %v6080_v10  ;;  %v960_v46 = vmul.f32 %v6084_v54, %v6084_v54 }
 0x122   : > { %v5941_v57 = vpop.xlane.xlu1 %559  ;;  %v964_v47 = vmul.f32 %v6087_v38, %v6087_v38  ;;  %v969_v55 = vmul.f32 %v6097_v3, %v6097_v3  ;;  %v1611_v20 = vsel %vm1598_vm5, %v1329_v53, %v1610_v56  ;;  %v1361_v3 = vrot.slane %v963_v19, %v5589_v61 }
 0x123   : > { %v5943_v59 = vpop.xlane.xlu0 %550  ;;  %v6117_v37 = vmul.f32 0.0625, %v5941_v57  ;;  %v970_v57 = vmul.f32 %v6100_v62, %v6100_v62  ;;  %v1375_v38 = vrot.slane %v966_v0, %v5586_v60  ;;  %v1347_v63 = vrot.slane %v960_v46, %v5592_v49 }
 0x124   : > { %v6108_v29 = vmul.f32 0.0625, %v5943_v59  ;;  %v967_v59 = vmul.f32 %v6090_v36, %v6090_v36  ;;  %v1366_v56 = vrot.slane %v964_v47, %v5592_v49 }
 0x125   : > { %8454 = vst [vmem:[#allocation59_spill] sm:$0xff] %v6117_v37  ;;  %v1394_v19 = vrot.slane %v970_v57, %v5586_v60 }
 0x126   : > { %v5945_v13 = vpop.xlane.xlu1 %568  ;;  %8453 = vst [vmem:[#allocation58_spill] sm:$0xff] %v6108_v29  ;;  %v968_v6 = vmul.f32 %v6108_v29, %v6108_v29  ;;  %v1380_v53 = vrot.slane %v967_v59, %v5589_v61 }
 0x127   : > { %v5947_v9 = vpop.xlane.xlu0 %565  ;;  %v6134_v25 = vmul.f32 0.0625, %v5945_v13  ;;  %v1371_v13 = vrot.slane %v965_v39, %v5572_v34 }
 0x128   : > { %v6137_v11 = vmul.f32 0.0625, %v5947_v9  ;;  %v971_v9 = vmul.f32 %v6117_v37, %v6117_v37  ;;  %v1385_v47 = vrot.slane %v968_v6, %v5592_v49  ;;  %v1348_v6 = vsel %vm1138_vm3, %v1347_v63, %v1343_v45 }
 0x129   : > { %8456 = vst [vmem:[#allocation61_spill] sm:$0xff] %v6134_v25  ;;  %v974_v0 = vmul.f32 %v6134_v25, %v6134_v25  ;;  %v1376_v25 = vsel %vm1124_vm1, %v1375_v38, %v1371_v13 }
 0x12a   : > { %v5955_v24 = vpop.xlane.xlu1 %676  ;;  %8457 = vst [vmem:[#allocation62_spill] sm:$0xff] %v6137_v11  ;;  %v973_v39 = vmul.f32 %v6137_v11, %v6137_v11  ;;  %v1381_v11 = vsel %vm1131_vm2, %v1380_v53, %v1376_v25 }
 0x12b   : > { %v5957_v32 = vpop.xlane.xlu0 %673  ;;  %v6169_v59 = vmul.f32 0.0625, %v5955_v24  ;;  %v1386_v25 = vsel %vm1138_vm3, %v1385_v47, %v1381_v11 }
 0x12c   : > { %v6172_v37 = vmul.f32 0.0625, %v5957_v32  ;;  %v1409_v38 = vrot.slane %v973_v39, %v5572_v34 }
 0x12e   : > { %v5984_v5 = vpop.xlane.xlu1 %427  ;;  %v1009_v63 = vmul.f32 %v6172_v37, %v6172_v37 }
 0x12f   : > { %v5989_v2 = vpop.xlane.xlu0 %418 }
 0x132   : > { %v6010_v51 = vpop.xlane.xlu1 %436 }
 0x133   : > { %v6023_v18 = vpop.xlane.xlu0 %433 }
 0x136   : > { %v572_v7 = vpop.xlane.xlu1 %571 }
 0x137   : > { %v563_v1 = vpop.xlane.xlu0 %562  ;;  %v6145_v52 = vmul.f32 0.0625, %v572_v7 }
 0x138   : > { %v6125_v8 = vmul.f32 0.0625, %v563_v1  ;;  %v1357_v1 = vsel %vm1124_vm1, %v1356_v17, %v1352_v12  ;;  %v1390_v17 = vrot.slane %v969_v55, %v5572_v34 }
 0x139   : > { %8458 = vst [vmem:[#allocation63_spill] sm:$0xff] %v6145_v52  ;;  %v975_v55 = vmul.f32 %v6145_v52, %v6145_v52  ;;  %v1362_v57 = vsel %vm1131_vm2, %v1361_v3, %v1357_v1  ;;  %v1413_v3 = vrot.slane %v974_v0, %v5586_v60 }
 0x13a   : > { %v6059_v40 = vpop.xlane.xlu1 %786  ;;  %8455 = vst [vmem:[#allocation60_spill] sm:$0xff] %v6125_v8  ;;  %v972_v12 = vmul.f32 %v6125_v8, %v6125_v8  ;;  %v1399_v8 = vrot.slane %v971_v9, %v5589_v61  ;;  %v1367_v24 = vsel %vm1138_vm3, %v1366_v56, %v1362_v57  ;;  %v1395_v52 = vsel %vm1124_vm1, %v1394_v19, %v1390_v17 }
 0x13b   : > { %v6065_v22 = vpop.xlane.xlu0 %679  ;;  %v1418_v45 = vrot.slane %v975_v55, %v5589_v61  ;;  %v1414_v11 = vsel %vm1124_vm1, %v1413_v3, %v1409_v38  ;;  %v1580_v57 = vrot.slane %v1009_v63, %v5572_v34 }
 0x13c   : > { %v6180_v23 = vmul.f32 0.0625, %v6065_v22  ;;  %v1404_v32 = vrot.slane %v972_v12, %v5592_v49  ;;  %v1010_v22 = vmul.f32 %v6169_v59, %v6169_v59  ;;  %v1400_v53 = vsel %vm1131_vm2, %v1399_v8, %v1395_v52 }
 0x13e   : > { %v6092_v4 = vpop.xlane.xlu1 %798  ;;  %v1011_v9 = vmul.f32 %v6180_v23, %v6180_v23  ;;  %v1405_v17 = vsel %vm1138_vm3, %v1404_v32, %v1400_v53  ;;  %v1584_v55 = vrot.slane %v1010_v22, %v5586_v60 }
 0x13f   : > { %v6102_v44 = vpop.xlane.xlu0 %789 }
 0x140   : > { %v1589_v52 = vrot.slane %v1011_v9, %v5589_v61 }
 0x142   : > { %v6127_v15 = vpop.xlane.xlu1 %430 }
 0x143   : > { %v6139_v35 = vpop.xlane.xlu0 %801 }
 0x146   : > { %v6157_v7 = vpop.xlane.xlu1 %445 }
 0x147   : > { %v6165_v46 = vpop.xlane.xlu0 %439 }
 0x14a   : > { %v575_v14 = vpop.xlane.xlu1 %574 }
 0x14b   : > { %v6189_v1 = vpop.xlane.xlu0 %448  ;;  %v6191_v13 = vmul.f32 0.0625, %v575_v14  ;;  %v1612_v14 = vsel %vm1600_vm6, %v1348_v6, %v1611_v20  ;;  %v1419_v20 = vsel %vm1131_vm2, %v1418_v45, %v1414_v11  ;;  %v1585_v45 = vsel %vm1124_vm1, %v1584_v55, %v1580_v57 }
 0x14c   : > { %v1613_v19 = vsel %vm1602_vm7, %v1367_v24, %v1612_v14  ;;  %v1590_v9 = vsel %vm1131_vm2, %v1589_v52, %v1585_v45  ;;  %v6247_v57 = vmul.f32 0.0625, %v5731_v30  ;;  %v6253_v52 = vmul.f32 0.0625, %v5864_v28 }
 0x14d   : > { %8459 = vst [vmem:[#allocation64_spill] sm:$0xff] %v6191_v13  ;;  %v976_v56 = vmul.f32 %v6191_v13, %v6191_v13  ;;  %v1614_v47 = vsel %vm1604_vm8, %v1386_v25, %v1613_v19  ;;  %v6267_v30 = vmul.f32 0.0625, %v5929_v58 }
 0x14e   : > { %v6205_v12 = vpop.xlane.xlu1 %792  ;;  %v1615_v24 = vsel %vm1606_vm9, %v1405_v17, %v1614_v47  ;;  %v8462_v47 = vld [vmem:[#allocation26_spill] sm:$0xff]  ;;  %8464 = vst [vmem:[#allocation65_spill] sm:$0xff] %v6253_v52 }
 0x14f   : > { %v1423_v0 = vrot.slane %v976_v56, %v5592_v49  ;;  %v683_v39 = vpop.xlane.xlu0 %682  ;;  %v6244_v55 = vmul.f32 0.0625, %v8462_v47  ;;  %8463 = vst [vmem:[#allocation26_spill] sm:$0xff] %v6247_v57  ;;  %8466 = vst [vmem:[#allocation67_spill] sm:$0xff] %v6267_v30 }
 0x150   : > { %v6214_v8 = vmul.f32 0.0625, %v683_v39  ;;  %v8460_v39 = vld [vmem:[#allocation25_spill] sm:$0xff] }
 0x151   : > { %v1424_v6 = vsel %vm1138_vm3, %v1423_v0, %v1419_v20  ;;  %v6241_v11 = vmul.f32 0.0625, %v8460_v39  ;;  %v6250_v20 = vmul.f32 0.0625, %v5733_v21  ;;  %v913_v28 = vmul.f32 %v6244_v55, %v6244_v55 }
 0x152   : > { %v1012_v32 = vmul.f32 %v6214_v8, %v6214_v8  ;;  %v6222_v3 = vpop.xlane.xlu1 %810  ;;  %v1616_v38 = vsel %vm1608_vm10, %v1424_v6, %v1615_v24  ;;  %v6258_v24 = vmul.f32 0.0625, %v5887_v43  ;;  %v918_v43 = vmul.f32 %v6247_v57, %v6247_v57 }
 0x153   : > { %v6225_v22 = vpop.xlane.xlu0 %804  ;;  %v1632_v63 = vsel %vm1628_vm11, %v1616_v38, 0.0  ;;  %8461 = vst [vmem:[#allocation25_spill] sm:$0xff] %v6241_v11  ;;  %v6264_v38 = vmul.f32 0.0625, %v5912_v27  ;;  %v914_v21 = vmul.f32 %v6241_v11, %v6241_v11  ;;  %v915_v27 = vmul.f32 %v6253_v52, %v6253_v52 }
 0x154   : > { %v1594_v25 = vrot.slane %v1012_v32, %v5592_v49  ;;  %1633 = vadd.xlane.f32.xlu0 %v1632_v63  ;;  %8465 = vst [vmem:[#allocation66_spill] sm:$0xff] %v6258_v24  ;;  %v6261_v32 = vmul.f32 0.0625, %v5889_v26  ;;  %v917_v26 = vmul.f32 %v6250_v20, %v6250_v20  ;;  %v921_v58 = vmul.f32 %v6258_v24, %v6258_v24 }
 0x155   : > { %v6294_v39 = vmul.f32 0.0625, %v5935_v50  ;;  %v1123_v47 = vrot.slane %v914_v21, %v5586_v60  ;;  %v1118_v13 = vrot.slane %v913_v28, %v5572_v34  ;;  %v6299_v24 = vmul.f32 0.0625, %v5933_v41 }
 0x156   : > { %v6231_v56 = vpop.xlane.xlu1 %442  ;;  %v1595_v53 = vsel %vm1138_vm3, %v1594_v25, %v1590_v9  ;;  %v919_v45 = vmul.f32 %v6261_v32, %v6261_v32  ;;  %v922_v9 = vmul.f32 %v6264_v38, %v6264_v38  ;;  %v1147_v52 = vrot.slane %v918_v43, %v5586_v60 }
 0x157   : > { %v6234_v14 = vpop.xlane.xlu0 %813  ;;  %v1639_v17 = vsel %vm1638_vm12, %v1595_v53, 0.0  ;;  %v916_v53 = vmul.f32 %v6267_v30, %v6267_v30  ;;  %8467 = vst [vmem:[#allocation68_spill] sm:$0xff] %v6294_v39  ;;  %8468 = vst [vmem:[#allocation69_spill] sm:$0xff] %v6299_v24  ;;  %v1143_v57 = vrot.slane %v917_v26, %v5572_v34  ;;  %v1130_v11 = vrot.slane %v915_v27, %v5589_v61 }
 0x158   : > { %1640 = vadd.xlane.f32.xlu1 %v1639_v17  ;;  %v1162_v30 = vrot.slane %v921_v58, %v5572_v34  ;;  %v1152_v50 = vrot.slane %v919_v45, %v5589_v61  ;;  %v1166_v62 = vrot.slane %v922_v9, %v5586_v60  ;;  %v920_v41 = vmul.f32 %v6294_v39, %v6294_v39 }
 0x159   : > { %v1137_v21 = vrot.slane %v916_v53, %v5592_v49  ;;  %v6315_v43 = vmul.f32 0.0625, %v5937_v31  ;;  %v6318_v26 = vmul.f32 0.0625, %v5939_v42  ;;  %v1125_v27 = vsel %vm1124_vm1, %v1123_v47, %v1118_v13 }
 0x15a   : > { %v6236_v19 = vpop.xlane.xlu1 %457  ;;  %v923_v58 = vmul.f32 %v6299_v24, %v6299_v24  ;;  %v6324_v45 = vmul.f32 0.0625, %v5989_v2  ;;  %v1148_v9 = vsel %vm1124_vm1, %v1147_v52, %v1143_v57  ;;  %v1132_v53 = vsel %vm1131_vm2, %v1130_v11, %v1125_v27 }
 0x15b   : > { %v6238_v0 = vpop.xlane.xlu0 %451  ;;  %8469 = vst [vmem:[#allocation70_spill] sm:$0xff] %v6315_v43  ;;  %8470 = vst [vmem:[#allocation71_spill] sm:$0xff] %v6318_v26  ;;  %v1153_v31 = vsel %vm1131_vm2, %v1152_v50, %v1148_v9  ;;  %v1167_v39 = vsel %vm1124_vm1, %v1166_v62, %v1162_v30  ;;  %v1139_v42 = vsel %vm1138_vm3, %v1137_v21, %v1132_v53  ;;  %v6334_v13 = vmul.f32 0.0625, %v5984_v5 }
 0x15c   : > { %8471 = vst [vmem:[#allocation72_spill] sm:$0xff] %v6324_v45  ;;  %v1157_v2 = vrot.slane %v920_v41, %v5592_v49  ;;  %v926_v57 = vmul.f32 %v6315_v43, %v6315_v43  ;;  %v925_v11 = vmul.f32 %v6318_v26, %v6318_v26  ;;  %v6344_v52 = vmul.f32 0.0625, %v6127_v15 }
 0x15d   : > { %8472 = vst [vmem:[#allocation73_spill] sm:$0xff] %v6334_v13  ;;  %v1171_v62 = vrot.slane %v923_v58, %v5589_v61  ;;  %v924_v30 = vmul.f32 %v6324_v45, %v6324_v45  ;;  %v6350_v5 = vmul.f32 0.0625, %v6010_v51  ;;  %v6353_v50 = vmul.f32 0.0625, %v6023_v18 }
 0x15e   : > { %v6255_v6 = vpop.xlane.xlu1 %795  ;;  %8473 = vst [vmem:[#allocation74_spill] sm:$0xff] %v6344_v52  ;;  %v6356_v21 = vmul.f32 0.0625, %v6059_v40  ;;  %v6359_v41 = vmul.f32 0.0625, %v6102_v44  ;;  %v6362_v15 = vmul.f32 0.0625, %v6092_v4  ;;  %v6365_v27 = vmul.f32 0.0625, %v6139_v35 }
 0x15f   : > { %v6269_v63 = vpop.xlane.xlu0 %460  ;;  %8474 = vst [vmem:[#allocation75_spill] sm:$0xff] %v6350_v5  ;;  %8475 = vst [vmem:[#allocation76_spill] sm:$0xff] %v6353_v50  ;;  %v927_v51 = vmul.f32 %v6334_v13, %v6334_v13  ;;  %v6370_v9 = vmul.f32 0.0625, %v6165_v46  ;;  %v6373_v18 = vmul.f32 0.0625, %v6157_v7  ;;  %v6376_v40 = vmul.f32 0.0625, %v6189_v1 }
 0x160   : > { %8476 = vst [vmem:[#allocation77_spill] sm:$0xff] %v6356_v21  ;;  %8477 = vst [vmem:[#allocation78_spill] sm:$0xff] %v6359_v41  ;;  %v1158_v4 = vsel %vm1138_vm3, %v1157_v2, %v1153_v31  ;;  %v1185_v53 = vrot.slane %v926_v57, %v5586_v60  ;;  %v1181_v35 = vrot.slane %v925_v11, %v5572_v34  ;;  %v6389_v1 = vmul.f32 0.0625, %v6205_v12 }
 0x161   : > { %8478 = vst [vmem:[#allocation79_spill] sm:$0xff] %v6362_v15  ;;  %8479 = vst [vmem:[#allocation80_spill] sm:$0xff] %v6365_v27  ;;  %v928_v43 = vmul.f32 %v6344_v52, %v6344_v52  ;;  %v1176_v13 = vrot.slane %v924_v30, %v5592_v49  ;;  %v930_v46 = vmul.f32 %v6350_v5, %v6350_v5 }
 0x162   : > { %v6281_v25 = vpop.xlane.xlu1 %816  ;;  %8480 = vst [vmem:[#allocation81_spill] sm:$0xff] %v6370_v9  ;;  %8481 = vst [vmem:[#allocation82_spill] sm:$0xff] %v6373_v18  ;;  %v929_v7 = vmul.f32 %v6353_v50, %v6353_v50  ;;  %v1928_v31 = vmul.f32 %v6356_v21, %v6356_v21  ;;  %v1929_v2 = vmul.f32 %v6359_v41, %v6359_v41 }
 0x163   : > { %v6291_v17 = vpop.xlane.xlu0 %807  ;;  %8482 = vst [vmem:[#allocation83_spill] sm:$0xff] %v6376_v40  ;;  %v1932_v57 = vmul.f32 %v6362_v15, %v6362_v15  ;;  %v1933_v11 = vmul.f32 %v6365_v27, %v6365_v27  ;;  %v1190_v5 = vrot.slane %v927_v51, %v5589_v61  ;;  %v931_v12 = vmul.f32 %v6370_v9, %v6370_v9 }
 0x164   : > { %v933_v24 = vmul.f32 %v6373_v18, %v6373_v18  ;;  %v934_v52 = vmul.f32 %v6376_v40, %v6376_v40  ;;  %v1172_v50 = vsel %vm1131_vm2, %v1171_v62, %v1167_v39  ;;  %v1597_v45 = vsel %vm1596_vm4, %v1158_v4, %v1139_v42 }
 0x165   : > { %v1186_v27 = vsel %vm1124_vm1, %v1185_v53, %v1181_v35  ;;  %v1195_v15 = vrot.slane %v928_v43, %v5592_v49  ;;  %v1177_v51 = vsel %vm1138_vm3, %v1176_v13, %v1172_v50  ;;  %v1204_v9 = vrot.slane %v930_v46, %v5586_v60 }
 0x166   : > { %v6304_v29 = vpop.xlane.xlu1 %825  ;;  %v1200_v21 = vrot.slane %v929_v7, %v5572_v34  ;;  %v1930_v18 = vmul.f32 %v6389_v1, %v6389_v1  ;;  %v1995_v40 = vrot.slane %v1928_v31, %v5572_v34  ;;  %v1999_v26 = vrot.slane %v1929_v2, %v5586_v60 }
 0x167   : > { %v6310_v28 = vpop.xlane.xlu0 %822  ;;  %v2014_v39 = vrot.slane %v1932_v57, %v5572_v34  ;;  %v2018_v42 = vrot.slane %v1933_v11, %v5586_v60  ;;  %v1191_v43 = vsel %vm1131_vm2, %v1190_v5, %v1186_v27  ;;  %v1209_v13 = vrot.slane %v931_v12, %v5589_v61 }
 0x168   : > { %v1219_v50 = vrot.slane %v933_v24, %v5572_v34  ;;  %v1223_v4 = vrot.slane %v934_v52, %v5586_v60  ;;  %v1599_v35 = vsel %vm1598_vm5, %v1177_v51, %v1597_v45  ;;  %v1196_v46 = vsel %vm1138_vm3, %v1195_v15, %v1191_v43 }
 0x169   : > { %v1205_v7 = vsel %vm1124_vm1, %v1204_v9, %v1200_v21  ;;  %v2004_v31 = vrot.slane %v1930_v18, %v5589_v61  ;;  %v6436_v2 = vmul.f32 0.0625, %v6236_v19  ;;  %v6439_v5 = vmul.f32 0.0625, %v6269_v63 }
 0x16a   : > { %v6328_v36 = vpop.xlane.xlu1 %463  ;;  %v2000_v24 = vsel %vm1124_vm1, %v1999_v26, %v1995_v40  ;;  %v6443_v52 = vsel %vm1124_vm1, %v2018_v42, %v2014_v39  ;;  %v6446_v27 = vmul.f32 0.0625, %v6222_v3  ;;  %v6449_v45 = vmul.f32 0.0625, %v6231_v56 }
 0x16b   : > { %v6336_v47 = vpop.xlane.xlu0 %454  ;;  %8483 = vst [vmem:[#allocation84_spill] sm:$0xff] %v6439_v5  ;;  %v1210_v15 = vsel %vm1131_vm2, %v1209_v13, %v1205_v7  ;;  %v6453_v19 = vsel %vm1124_vm1, %v1223_v4, %v1219_v50  ;;  %v6456_v63 = vmul.f32 0.0625, %v6234_v14  ;;  %v6459_v26 = vsel %vm1600_vm6, %v1196_v46, %v1599_v35 }
 0x16c   : > { %v6462_v18 = vmul.f32 0.0625, %v6225_v22  ;;  %v6465_v3 = vmul.f32 0.0625, %v6328_v36  ;;  %v6472_v57 = vsel %vm1131_vm2, %v2004_v31, %v2000_v24  ;;  %v6475_v14 = vmul.f32 0.0625, %v6238_v0 }
 0x16d   : > { %8484 = vst [vmem:[#allocation85_spill] sm:$0xff] %v6456_v63  ;;  %v937_v11 = vmul.f32 %v6436_v2, %v6436_v2  ;;  %v938_v22 = vmul.f32 %v6439_v5, %v6439_v5  ;;  %v1936_v36 = vmul.f32 %v6446_v27, %v6446_v27  ;;  %v6489_v12 = vmul.f32 0.0625, %v6336_v47 }
 0x16e   : > { %v473_v58 = vpop.xlane.xlu1 %472  ;;  %8485 = vst [vmem:[#allocation86_spill] sm:$0xff] %v6462_v18  ;;  %8486 = vst [vmem:[#allocation87_spill] sm:$0xff] %v6465_v3  ;;  %v1937_v51 = vmul.f32 %v6456_v63, %v6456_v63  ;;  %v6496_v39 = vmul.f32 0.0625, %v6291_v17  ;;  %v939_v47 = vmul.f32 %v6465_v3, %v6465_v3  ;;  %v935_v17 = vmul.f32 %v6475_v14, %v6475_v14 }
 0x16f   : > { %v470_v44 = vpop.xlane.xlu0 %469  ;;  %v6469_v40 = vmul.f32 0.0625, %v473_v58  ;;  %8488 = vst [vmem:[#allocation89_spill] sm:$0xff] %v6475_v14  ;;  %v6486_v58 = vmul.f32 0.0625, %v6281_v25  ;;  %v1934_v25 = vmul.f32 %v6462_v18, %v6462_v18  ;;  %v1238_v35 = vrot.slane %v937_v11, %v5572_v34 }
 0x170   : > { %v6467_v56 = vmul.f32 0.0625, %v470_v44  ;;  %v932_v44 = vmul.f32 %v6449_v45, %v6449_v45  ;;  %v1242_v46 = vrot.slane %v938_v22, %v5586_v60  ;;  %v6517_v7 = vmul.f32 0.0625, %v6255_v6 }
 0x171   : > { %8487 = vst [vmem:[#allocation88_spill] sm:$0xff] %v6469_v40  ;;  %8489 = vst [vmem:[#allocation90_spill] sm:$0xff] %v6486_v58  ;;  %v942_v4 = vmul.f32 %v6469_v40, %v6469_v40  ;;  %v2033_v31 = vrot.slane %v1936_v36, %v5572_v34  ;;  %v2037_v3 = vrot.slane %v1937_v51, %v5586_v60 }
 0x172   : > { %v6399_v30 = vpop.xlane.xlu1 %828  ;;  %v941_v50 = vmul.f32 %v6467_v56, %v6467_v56  ;;  %8492 = vst [vmem:[#allocation93_spill] sm:$0xff] %v6517_v7  ;;  %v1214_v24 = vrot.slane %v932_v44, %v5592_v49  ;;  %v1935_v11 = vmul.f32 %v6496_v39, %v6496_v39  ;;  %v6533_v44 = vmul.f32 0.0625, %v6304_v29 }
 0x173   : > { %v6408_v41 = vpop.xlane.xlu0 %819  ;;  %v1247_v5 = vrot.slane %v939_v47, %v5589_v61  ;;  %v2023_v51 = vrot.slane %v1934_v25, %v5589_v61  ;;  %v1228_v63 = vrot.slane %v935_v17, %v5589_v61  ;;  %v1243_v18 = vsel %vm1124_vm1, %v1242_v46, %v1238_v35 }
 0x174   : > { %8493 = vst [vmem:[#allocation94_spill] sm:$0xff] %v6533_v44  ;;  %v1257_v14 = vrot.slane %v941_v50, %v5572_v34  ;;  %v6548_v47 = vmul.f32 0.0625, %v6310_v28  ;;  %v2038_v25 = vsel %vm1124_vm1, %v2037_v3, %v2033_v31  ;;  %v2028_v17 = vrot.slane %v1935_v11, %v5592_v49 }
 0x175   : > { %v1248_v28 = vsel %vm1131_vm2, %v1247_v5, %v1243_v18  ;;  %v1229_v3 = vsel %vm1131_vm2, %v1228_v63, %v6453_v19  ;;  %v6578_v19 = vmul.f32 0.0625, %v6399_v30  ;;  %v6594_v30 = vmul.f32 0.0625, %v6408_v41 }
 0x176   : > { %v6423_v62 = vpop.xlane.xlu1 %837  ;;  %v1940_v5 = vmul.f32 %v6548_v47, %v6548_v47 }
 0x177   : > { %v6429_v53 = vpop.xlane.xlu0 %834  ;;  %8494 = vst [vmem:[#allocation95_spill] sm:$0xff] %v6578_v19  ;;  %v6581_v63 = vmul.f32 0.0625, %v6423_v62 }
 0x179   : > { %8495 = vst [vmem:[#allocation96_spill] sm:$0xff] %v6581_v63  ;;  %v1945_v41 = vmul.f32 %v6581_v63, %v6581_v63 }
 0x17a   : > { %v476_v21 = vpop.xlane.xlu1 %475 }
 0x17b   : > { %v467_v9 = vpop.xlane.xlu0 %466  ;;  %v6500_v43 = vmul.f32 0.0625, %v476_v21  ;;  %v1938_v21 = vmul.f32 %v6486_v58, %v6486_v58  ;;  %v1261_v58 = vrot.slane %v942_v4, %v5586_v60 }
 0x17c   : > { %v6498_v42 = vmul.f32 0.0625, %v467_v9  ;;  %v936_v9 = vmul.f32 %v6489_v12, %v6489_v12 }
 0x17d   : > { %8491 = vst [vmem:[#allocation92_spill] sm:$0xff] %v6500_v43  ;;  %v943_v22 = vmul.f32 %v6500_v43, %v6500_v43  ;;  %v1215_v43 = vsel %vm1138_vm3, %v1214_v24, %v1210_v15  ;;  %v2042_v29 = vrot.slane %v1938_v21, %v5589_v61  ;;  %v1941_v15 = vmul.f32 %v6533_v44, %v6533_v44 }
 0x17e   : > { %v6491_v0 = vpop.xlane.xlu1 %840  ;;  %8490 = vst [vmem:[#allocation91_spill] sm:$0xff] %v6498_v42  ;;  %v940_v6 = vmul.f32 %v6498_v42, %v6498_v42  ;;  %v6543_v42 = vmul.f32 %v6517_v7, %v6517_v7  ;;  %v1233_v50 = vrot.slane %v936_v9, %v5592_v49  ;;  %v1262_v21 = vsel %vm1124_vm1, %v1261_v58, %v1257_v14 }
 0x17f   : > { %v6502_v13 = vpop.xlane.xlu0 %831  ;;  %v1266_v46 = vrot.slane %v943_v22, %v5589_v61  ;;  %v2024_v9 = vsel %vm1131_vm2, %v2023_v51, %v6443_v52  ;;  %v1603_v11 = vsel %vm1602_vm7, %v1215_v43, %v6459_v26  ;;  %v2056_v22 = vrot.slane %v1941_v15, %v5586_v60 }
 0x180   : > { %v1252_v35 = vrot.slane %v940_v6, %v5592_v49  ;;  %v6570_v6 = vsel %vm1131_vm2, %v2042_v29, %v2038_v25  ;;  %v1234_v52 = vsel %vm1138_vm3, %v1233_v50, %v1229_v3  ;;  %v6590_v51 = vmul.f32 0.0625, %v6429_v53 }
 0x181   : > { %v1267_v43 = vsel %vm1131_vm2, %v1266_v46, %v1262_v21  ;;  %v1605_v25 = vsel %vm1604_vm8, %v1234_v52, %v1603_v11 }
 0x182   : > { %v850_v40 = vpop.xlane.xlu1 %849  ;;  %v1253_v26 = vsel %vm1138_vm3, %v1252_v35, %v1248_v28  ;;  %v2052_v35 = vrot.slane %v1940_v5, %v5572_v34  ;;  %v1942_v28 = vmul.f32 %v6578_v19, %v6578_v19 }
 0x183   : > { %v847_v36 = vpop.xlane.xlu0 %846  ;;  %v6598_v50 = vmul.f32 0.0625, %v850_v40  ;;  %v1607_v53 = vsel %vm1606_vm9, %v1253_v26, %v1605_v25  ;;  %v6611_v40 = vmul.f32 0.0625, %v6491_v0 }
 0x184   : > { %v6596_v62 = vmul.f32 0.0625, %v847_v36 }
 0x185   : > { %8496 = vst [vmem:[#allocation97_spill] sm:$0xff] %v6598_v50  ;;  %8497 = vst [vmem:[#allocation98_spill] sm:$0xff] %v6611_v40  ;;  %v1949_v52 = vmul.f32 %v6598_v50, %v6598_v50 }
 0x186   : > { %v844_v4 = vpop.xlane.xlu1 %843  ;;  %v1948_v0 = vmul.f32 %v6596_v62, %v6596_v62 }
 0x187   : > { %v479_v7 = vpop.xlane.xlu0 %478  ;;  %v6631_v26 = vmul.f32 0.0625, %v844_v4 }
 0x188   : > { %v6557_v24 = vmul.f32 0.0625, %v479_v7  ;;  %v6586_v7 = vsel %vm1138_vm3, %v2028_v17, %v2024_v9  ;;  %v1944_v9 = vmul.f32 %v6590_v51, %v6590_v51 }
 0x18a   : > { %v944_v18 = vmul.f32 %v6557_v24, %v6557_v24  ;;  %v859_v14 = vpop.xlane.xlu1 %858  ;;  %v2071_v4 = vrot.slane %v1944_v9, %v5572_v34 }
 0x18b   : > { %v853_v58 = vpop.xlane.xlu0 %852  ;;  %v6602_v17 = vmul.f32 0.0625, %v859_v14  ;;  %v6624_v14 = vmul.f32 0.0625, %v6502_v13  ;;  %v2061_v13 = vrot.slane %v1942_v28, %v5589_v61 }
 0x18c   : > { %v1271_v29 = vrot.slane %v944_v18, %v5592_v49  ;;  %v6616_v3 = vmul.f32 0.0625, %v853_v58  ;;  %v1939_v18 = vmul.f32 %v6594_v30, %v6594_v30  ;;  %v2057_v58 = vsel %vm1124_vm1, %v2056_v22, %v2052_v35 }
 0x18d   : > { %v2075_v22 = vrot.slane %v1945_v41, %v5586_v60  ;;  %v1943_v28 = vmul.f32 %v6624_v14, %v6624_v14  ;;  %v2062_v63 = vsel %vm1131_vm2, %v2061_v13, %v2057_v58 }
 0x18e   : > { %v856_v46 = vpop.xlane.xlu1 %855  ;;  %v1272_v15 = vsel %vm1138_vm3, %v1271_v29, %v1267_v43  ;;  %8498 = vst [vmem:[#allocation99_spill] sm:$0xff] %v6616_v3  ;;  %v1952_v43 = vmul.f32 %v6602_v17, %v6602_v17  ;;  %v1950_v35 = vmul.f32 %v6616_v3, %v6616_v3  ;;  %v2047_v31 = vrot.slane %v1939_v18, %v5592_v49 }
 0x18f   : > { %v862_v36 = vpop.xlane.xlu0 %861  ;;  %v1609_v21 = vsel %vm1608_vm10, %v1272_v15, %v1607_v53  ;;  %v1946_v15 = vmul.f32 %v6611_v40, %v6611_v40  ;;  %v6640_v53 = vmul.f32 0.0625, %v856_v46  ;;  %v2090_v46 = vrot.slane %v1948_v0, %v5572_v34 }
 0x190   : > { %v6618_v11 = vmul.f32 0.0625, %v862_v36  ;;  %v1629_v5 = vsel %vm1628_vm11, %v1609_v21, 0.0  ;;  %v2109_v9 = vrot.slane %v1952_v43, %v5572_v34  ;;  %v2076_v43 = vsel %vm1124_vm1, %v2075_v22, %v2071_v4 }
 0x191   : > { %1630 = vadd.xlane.f32.xlu1 %v1629_v5  ;;  %8500 = vst [vmem:[#allocation101_spill] sm:$0xff] %v6640_v53  ;;  %v2080_v18 = vrot.slane %v1946_v15, %v5589_v61  ;;  %v1951_v50 = vmul.f32 %v6640_v53, %v6640_v53  ;;  %v2066_v44 = vrot.slane %v1943_v28, %v5592_v49 }
 0x192   : > { %8499 = vst [vmem:[#allocation100_spill] sm:$0xff] %v6618_v11  ;;  %v1953_v29 = vmul.f32 %v6618_v11, %v6618_v11  ;;  %v871_v25 = vpop.xlane.xlu1 %870  ;;  %v2094_v11 = vrot.slane %v1949_v52, %v5586_v60 }
 0x193   : > { %v865_v36 = vpop.xlane.xlu0 %864  ;;  %v6642_v21 = vmul.f32 0.0625, %v871_v25  ;;  %v1947_v25 = vmul.f32 %v6631_v26, %v6631_v26 }
 0x194   : > { %v6648_v5 = vmul.f32 0.0625, %v865_v36  ;;  %v2113_v41 = vrot.slane %v1953_v29, %v5586_v60  ;;  %v2099_v29 = vrot.slane %v1950_v35, %v5589_v61  ;;  %v2095_v15 = vsel %vm1124_vm1, %v2094_v11, %v2090_v46 }
 0x195   : > { %8501 = vst [vmem:[#allocation102_spill] sm:$0xff] %v6642_v21  ;;  %v1956_v0 = vmul.f32 %v6642_v21, %v6642_v21  ;;  %v2085_v58 = vrot.slane %v1947_v25, %v5592_v49  ;;  %v2081_v35 = vsel %vm1131_vm2, %v2080_v18, %v2076_v43  ;;  %v2104_v11 = vrot.slane %v1951_v50, %v5592_v49 }
 0x196   : > { %v1954_v36 = vmul.f32 %v6648_v5, %v6648_v5  ;;  %v868_v3 = vpop.xlane.xlu1 %867  ;;  %v2114_v13 = vsel %vm1124_vm1, %v2113_v41, %v2109_v9  ;;  %v8505_v9 = vrot.slane %v6543_v42, %v5592_v49  ;;  %v2067_v50 = vsel %vm1138_vm3, %v2066_v44, %v2062_v63 }
 0x197   : > { %v874_v52 = vpop.xlane.xlu0 %873  ;;  %v6666_v40 = vmul.f32 0.0625, %v868_v3  ;;  %v2048_v3 = vsel %vm1138_vm3, %v2047_v31, %v6570_v6  ;;  %v2128_v28 = vrot.slane %v1956_v0, %v5572_v34 }
 0x198   : > { %v6671_v19 = vmul.f32 0.0625, %v874_v52  ;;  %v2118_v53 = vrot.slane %v1954_v36, %v5589_v61  ;;  %v2100_v52 = vsel %vm1131_vm2, %v2099_v29, %v2095_v15  ;;  %v2010_v41 = vsel %vm1138_vm3, %v8505_v9, %v6472_v57 }
 0x199   : > { %8502 = vst [vmem:[#allocation103_spill] sm:$0xff] %v6666_v40  ;;  %v1955_v21 = vmul.f32 %v6666_v40, %v6666_v40  ;;  %v2144_v43 = vsel %vm1596_vm4, %v6586_v7, %v2010_v41  ;;  %v2105_v44 = vsel %vm1138_vm3, %v2104_v11, %v2100_v52 }
 0x19a   : > { %v1957_v4 = vmul.f32 %v6671_v19, %v6671_v19  ;;  %v880_v22 = vpop.xlane.xlu1 %879  ;;  %v2119_v0 = vsel %vm1131_vm2, %v2118_v53, %v2114_v13  ;;  %v2145_v15 = vsel %vm1598_vm5, %v2048_v3, %v2144_v43 }
 0x19b   : > { %v877_v46 = vpop.xlane.xlu0 %876  ;;  %v6687_v36 = vmul.f32 0.0625, %v880_v22  ;;  %v2123_v6 = vrot.slane %v1955_v21, %v5592_v49  ;;  %v2086_v21 = vsel %vm1138_vm3, %v2085_v58, %v2081_v35  ;;  %v2146_v7 = vsel %vm1600_vm6, %v2067_v50, %v2145_v15 }
 0x19c   : > { %v2132_v31 = vrot.slane %v1957_v4, %v5586_v60  ;;  %v6692_v25 = vmul.f32 0.0625, %v877_v46  ;;  %v2147_v58 = vsel %vm1602_vm7, %v2086_v21, %v2146_v7  ;;  %v8508_v7 = vld [vmem:[#allocation18_spill] sm:$0xff] }
 0x19d   : > { %8503 = vst [vmem:[#allocation104_spill] sm:$0xff] %v6687_v36  ;;  %v1959_v18 = vmul.f32 %v6687_v36, %v6687_v36  ;;  %v2124_v53 = vsel %vm1138_vm3, %v2123_v6, %v2119_v0  ;;  %v2148_v3 = vsel %vm1604_vm8, %v2105_v44, %v2147_v58  ;;  %v8506_v6 = vld [vmem:[#allocation6_spill] sm:$0xff] }
 0x19e   : > { %8504 = vst [vmem:[#allocation105_spill] sm:$0xff] %v6692_v25  ;;  %v1958_v29 = vmul.f32 %v6692_v25, %v6692_v25  ;;  %v2133_v63 = vsel %vm1124_vm1, %v2132_v31, %v2128_v28  ;;  %v2149_v35 = vsel %vm1606_vm9, %v2124_v53, %v2148_v3  ;;  %v6723_v9 = vsub.s32 0, %v8506_v6  ;;  %v8509_v3 = vld [vmem:[#allocation24_spill] sm:$0xff] }
 0x19f   : > { %v2142_v42 = vrot.slane %v1959_v18, %v5592_v49  ;;  %v1637_v57 = vpop.xlane.xlu0 %1636  ;;  %v6726_v41 = vsub.s32 2, %v8506_v6  ;;  %v6731_v43 = vsub.s32 3, %v8506_v6 }
 0x1a0   : > { %v2137_v4 = vrot.slane %v1958_v29, %v5589_v61  ;;  %4816 = vrsqrt.f32 %v1637_v57  ;;  %vm1658_vm13 = vcmp.eq.f32.partialorder %v1637_v57, inf  ;;  %v1661_v31 = vand.u32 2147483648, %v1637_v57 }
 0x1a1   : > { %vm1660_vm14 = vcmp.eq.f32.partialorder %v1637_v57, 0.0 }
 0x1a2   : > { %v2138_v13 = vsel %vm1131_vm2, %v2137_v4, %v2133_v63  ;;  %v8507_v63 = vld [vmem:[#allocation11_spill] sm:$0xff] }
 0x1a3   : > { %v2143_v22 = vsel %vm1138_vm3, %v2142_v42, %v2138_v13  ;;  %v6740_v42 = vsub.s32 4, %v8506_v6 }
 0x1a4   : > { %v2150_v11 = vsel %vm1608_vm10, %v2143_v22, %v2149_v35 }
 0x1a5   : > { %v2152_v28 = vsel %vm1628_vm11, %v2150_v11, 0.0 }
 0x1a6   : > { %2153 = vadd.xlane.f32.xlu0 %v2152_v28 }
 0x1ad   : > { %v4817_v46 = vpop.eup %4816 }
 0x1ae   : > { %v1657_v52 = vmul.f32 %v4817_v46, %v1637_v57 }
 0x1b0   : > { %v1659_v50 = vsel %vm1658_vm13, %v1637_v57, %v1657_v52 }
 0x1b1   : > { %v1662_v18 = vsel %vm1660_vm14, %v1661_v31, %v1659_v50 }
 0x1b2   : > { %v6728_v0 = vmax.f32 %v1662_v18, 1e-12 }
 0x1b4   : > { %v1745_v21 = vrot.slane %v6728_v0, %v6723_v9  ;;  %v1753_v29 = vrot.slane %v6728_v0, %v6726_v41  ;;  %v1757_v15 = vrot.slane %v6728_v0, %v6731_v43  ;;  %v1761_v57 = vrot.slane %v6728_v0, %v6740_v42 }
 0x1b6   : > { %4818 = vrcp.f32 %v1745_v21 }
 0x1b7   : > { %4820 = vrcp.f32 %v1753_v29 }
 0x1b8   : > { %4822 = vrcp.f32 %v1757_v15 }
 0x1b9   : > { %4824 = vrcp.f32 %v1761_v57 }
 0x1c3   : > { %v6744_v44 = vpop.eup %4818 }
 0x1c4   : > { %v1885_v4 = vmul.f32 %v6744_v44, %v8507_v63  ;;  %v6748_v53 = vpop.eup %4820 }
 0x1c5   : > { %v1896_v58 = vmul.f32 %v6748_v53, %v8508_v7  ;;  %v6752_v13 = vpop.eup %4822 }
 0x1c6   : > { %2896 = vperm.xlu0 %4815, %v1885_v4   ;;  %v1900_v22 = vmul.f32 %v6752_v13, %v8509_v3  ;;  %v1901_v35 = vmul.f32 %v6752_v13, %v5728_v48  ;;  %v6758_v11 = vpop.eup %4824  ;;  %v6766_v3 = vsub.s32 1, %v8506_v6 }
 0x1c7   : > { %v1905_v28 = vmul.f32 %v6758_v11, %v5762_v33 }
 0x1ca   : > { %2923 = vperm.xlu0 %4815, %v1896_v58  }
 0x1ce   : > { %2932 = vperm.xlu0 %4815, %v1900_v22  }
 0x1d2   : > { %2935 = vperm.xlu0 %4815, %v1901_v35   ;;  %v1749_v35 = vrot.slane %v6728_v0, %v6766_v3 }
 0x1d6   : > { %2944 = vperm.xlu0 %4815, %v1905_v28  }
 0x1dd   : > { %v1634_v46 = vpop.xlane.xlu0 %1633 }
 0x1de   : > { %4826 = vrsqrt.f32 %v1634_v46  ;;  %vm1651_vm15 = vcmp.eq.f32.partialorder %v1634_v46, inf  ;;  %v1654_v15 = vand.u32 2147483648, %v1634_v46  ;;  %vm1653_vm0 = vcmp.eq.f32.partialorder %v1634_v46, 0.0 }
 0x1e1   : > { %v1641_v52 = vpop.xlane.xlu1 %1640 }
 0x1e2   : > { %4828 = vrsqrt.f32 %v1641_v52  ;;  %vm1665_vm12 = vcmp.eq.f32.partialorder %v1641_v52, inf  ;;  %v1668_v57 = vand.u32 2147483648, %v1641_v52  ;;  %vm1667_vm13 = vcmp.eq.f32.partialorder %v1641_v52, 0.0 }
 0x1eb   : > { %v4827_v31 = vpop.eup %4826 }
 0x1ec   : > { %v1650_v50 = vmul.f32 %v4827_v31, %v1634_v46 }
 0x1ee   : > { %v1652_v21 = vsel %vm1651_vm15, %v1634_v46, %v1650_v50  ;;  %v6775_v46 = vsub.s32 5, %v8506_v6 }
 0x1ef   : > { %v4829_v18 = vpop.eup %4828  ;;  %v1655_v48 = vsel %vm1653_vm0, %v1654_v15, %v1652_v21 }
 0x1f0   : > { %v1664_v29 = vmul.f32 %v4829_v18, %v1641_v52  ;;  %v6762_v33 = vmax.f32 %v1655_v48, 1e-12  ;;  %v8510_v48 = vld [vmem:[#allocation44_spill] sm:$0xff] }
 0x1f2   : > { %v1666_v63 = vsel %vm1665_vm12, %v1641_v52, %v1664_v29  ;;  %v1713_v22 = vrot.slane %v6762_v33, %v6723_v9  ;;  %v1717_v28 = vrot.slane %v6762_v33, %v6766_v3  ;;  %v1765_v52 = vrot.slane %v6728_v0, %v6775_v46 }
 0x1f3   : > { %v1669_v4 = vsel %vm1667_vm13, %v1668_v57, %v1666_v63  ;;  %v1721_v15 = vrot.slane %v6762_v33, %v6726_v41  ;;  %v8511_v63 = vld [vmem:[#allocation19_spill] sm:$0xff]  ;;  %vm3872_vm13 = vcmask 1040384  }
 0x1f4   : > { %v1673_v7 = vmax.f32 %v1669_v4, 1e-12  ;;  %v1884_v4 = vmul.f32 %v6744_v44, %v8511_v63 }
 0x1f6   : > { %v1777_v58 = vrot.slane %v1673_v7, %v6723_v9 }
 0x1f8   : > { %4830 = vrcp.f32 %v1777_v58 }
 0x1f9   : > { %4832 = vrcp.f32 %v1713_v22  ;;  %v8513_v22 = vld [vmem:[#allocation9_spill] sm:$0xff] }
 0x1fa   : > { %4834 = vrcp.f32 %v1749_v35 }
 0x1fb   : > { %4836 = vrcp.f32 %v1717_v28 }
 0x1fc   : > { %4838 = vrcp.f32 %v1765_v52  ;;  %v8514_v52 = vld [vmem:[#allocation29_spill] sm:$0xff] }
 0x1fd   : > { %4840 = vrcp.f32 %v1721_v15  ;;  %v8516_v15 = vld [vmem:[#allocation31_spill] sm:$0xff] }
 0x205   : > { %v6779_v31 = vpop.eup %4830 }
 0x206   : > { %v1925_v50 = vmul.f32 %v6779_v31, %v6169_v59  ;;  %v1924_v18 = vmul.f32 %v6779_v31, %v6172_v37  ;;  %v6785_v21 = vpop.eup %4832  ;;  %v6796_v37 = vsub.s32 6, %v8506_v6  ;;  %v8512_v59 = vld [vmem:[#allocation46_spill] sm:$0xff] }
 0x207   : > { %v4835_v29 = vpop.eup %4834  ;;  %v1845_v57 = vmul.f32 %v6785_v21, %v8510_v48 }
 0x208   : > { %2992 = vperm.xlu0 %4815, %v1925_v50   ;;  %2989 = vperm.xlu1 %4814, %v1924_v18   ;;  %v6793_v7 = vpop.eup %4836  ;;  %v1889_v35 = vmul.f32 %v4835_v29, %v8513_v22  ;;  %v1769_v28 = vrot.slane %v6728_v0, %v6796_v37  ;;  %v1906_v50 = vmul.f32 %v6758_v11, %v8514_v52  ;;  %v8515_v18 = vld [vmem:[#allocation10_spill] sm:$0xff]  ;;  %v8518_v22 = vld [vmem:[#allocation47_spill] sm:$0xff]  ;;  %v8519_v52 = vld [vmem:[#allocation12_spill] sm:$0xff] }
 0x209   : > { %v1850_v58 = vmul.f32 %v6793_v7, %v8512_v59  ;;  %v1890_v48 = vmul.f32 %v4835_v29, %v8515_v18  ;;  %v1891_v18 = vmul.f32 %v4835_v29, %v8519_v52 }
 0x20a   : > { %4842 = vrcp.f32 %v1769_v28  ;;  %v1725_v28 = vrot.slane %v6762_v33, %v6731_v43 }
 0x20c   : > { %2800 = vperm.xlu0 %4815, %v1845_v57   ;;  %2893 = vperm.xlu1 %4814, %v1884_v4   ;;  %v6806_v57 = vpop.eup %4838  ;;  %v8517_v4 = vld [vmem:[#allocation17_spill] sm:$0xff] }
 0x20d   : > { %v1910_v63 = vmul.f32 %v6806_v57, %v8516_v15  ;;  %v1886_v59 = vmul.f32 %v6744_v44, %v8517_v4  ;;  %v6815_v36 = vpop.eup %4840  ;;  %v8521_v15 = vld [vmem:[#allocation16_spill] sm:$0xff]  ;;  %v6824_v4 = vsub.s32 7, %v8506_v6  ;;  %v8525_v6 = vld [vmem:[#allocation21_spill] sm:$0xff] }
 0x210   : > { %2812 = vperm.xlu0 %4815, %v1850_v58   ;;  %2905 = vperm.xlu1 %4814, %v1889_v35   ;;  %v1846_v35 = vmul.f32 %v6785_v21, %v8518_v22 }
 0x214   : > { %2947 = vperm.xlu0 %4815, %v1906_v50   ;;  %2908 = vperm.xlu1 %4814, %v1890_v48   ;;  %v8520_v50 = vld [vmem:[#allocation49_spill] sm:$0xff] }
 0x215   : > { %v1854_v48 = vmul.f32 %v6815_v36, %v8520_v50 }
 0x218   : > { %2956 = vperm.xlu0 %4815, %v1910_v63   ;;  %2899 = vperm.xlu1 %4814, %v1886_v59   ;;  %v1894_v63 = vmul.f32 %v6748_v53, %v8521_v15  ;;  %v8522_v59 = vld [vmem:[#allocation32_spill] sm:$0xff]  ;;  %v1773_v15 = vrot.slane %v6728_v0, %v6824_v4  ;;  %v1729_v0 = vrot.slane %v6762_v33, %v6740_v42 }
 0x219   : > { %v1907_v22 = vmul.f32 %v6758_v11, %v8522_v59  ;;  %v1927_v59 = vmul.f32 %v6779_v31, %v6214_v8 }
 0x21a   : > { %v1631_v58 = vpop.xlane.xlu1 %1630 }
 0x21b   : > { %4844 = vrsqrt.f32 %v1631_v58  ;;  %vm1644_vm14 = vcmp.eq.f32.partialorder %v1631_v58, inf  ;;  %v1647_v25 = vand.u32 2147483648, %v1631_v58  ;;  %vm1646_vm15 = vcmp.eq.f32.partialorder %v1631_v58, 0.0 }
 0x21c   : > { %2803 = vperm.xlu0 %4815, %v1846_v35   ;;  %2911 = vperm.xlu1 %4814, %v1891_v18   ;;  %4846 = vrcp.f32 %v1725_v28  ;;  %v8523_v35 = vld [vmem:[#allocation15_spill] sm:$0xff]  ;;  %v6830_v18 = vpop.eup %4842  ;;  %v1887_v28 = vmul.f32 %v6744_v44, %v8525_v6 }
 0x21d   : > { %v1895_v52 = vmul.f32 %v6748_v53, %v8523_v35  ;;  %4848 = vrcp.f32 %v1773_v15  ;;  %v8528_v15 = vld [vmem:[#allocation23_spill] sm:$0xff] }
 0x21e   : > { %v1899_v8 = vmul.f32 %v6752_v13, %v8528_v15  ;;  %4850 = vrcp.f32 %v1729_v0 }
 0x220   : > { %2821 = vperm.xlu0 %4815, %v1854_v48   ;;  %2917 = vperm.xlu1 %4814, %v1894_v63   ;;  %v8524_v48 = vld [vmem:[#allocation34_spill] sm:$0xff] }
 0x221   : > { %v1914_v63 = vmul.f32 %v6830_v18, %v8524_v48  ;;  %v8527_v48 = vld [vmem:[#allocation52_spill] sm:$0xff] }
 0x222   : > { %v1852_v6 = vmul.f32 %v6793_v7, %v8527_v48 }
 0x224   : > { %2950 = vperm.xlu0 %4815, %v1907_v22   ;;  %2920 = vperm.xlu1 %4814, %v1895_v52   ;;  %v8526_v22 = vld [vmem:[#allocation20_spill] sm:$0xff] }
 0x225   : > { %v1892_v35 = vmul.f32 %v4835_v29, %v8526_v22  ;;  %v8529_v29 = vld [vmem:[#allocation3_spill] sm:$0xff] }
 0x228   : > { %v4845_v50 = vpop.eup %4844  ;;  %2965 = vperm.xlu0 %4815, %v1914_v63   ;;  %2902 = vperm.xlu1 %4814, %v1887_v28   ;;  %v8530_v28 = vld [vmem:[#allocation22_spill] sm:$0xff] }
 0x229   : > { %v1643_v40 = vmul.f32 %v4845_v50, %v1631_v58  ;;  %v6845_v44 = vpop.eup %4846 }
 0x22a   : > { %v1859_v63 = vmul.f32 %v6845_v44, %v8529_v29 }
 0x22b   : > { %v1645_v52 = vsel %vm1644_vm14, %v1631_v58, %v1643_v40  ;;  %v1897_v58 = vmul.f32 %v6748_v53, %v8530_v28  ;;  %v8533_v53 = vld [vmem:[#allocation38_spill] sm:$0xff]  ;;  %vm4998_vm14 = vmmov 0  }
 0x22c   : > { %2998 = vperm.xlu0 %4815, %v1927_v59   ;;  %2914 = vperm.xlu1 %4814, %v1892_v35   ;;  %v1648_v50 = vsel %vm1646_vm15, %v1647_v25, %v1645_v52  ;;  %v8531_v25 = vld [vmem:[#allocation36_spill] sm:$0xff]  ;;  %v6859_v35 = vpop.eup %4848  ;;  %v8532_v52 = vld [vmem:[#allocation27_spill] sm:$0xff] }
 0x22d   : > { %v6849_v40 = vmax.f32 %v1648_v50, 1e-12  ;;  %v1912_v22 = vmul.f32 %v6806_v57, %v8531_v25  ;;  %v1904_v0 = vmul.f32 %v6758_v11, %v8532_v52  ;;  %v8534_v50 = vld [vmem:[#allocation43_spill] sm:$0xff]  ;;  %v8536_v11 = vld [vmem:[#allocation45_spill] sm:$0xff]  ;;  %v8537_v25 = vld [vmem:[#allocation28_spill] sm:$0xff] }
 0x22e   : > { %v1844_v15 = vmul.f32 %v6785_v21, %v8534_v50  ;;  %v1849_v28 = vmul.f32 %v6793_v7, %v8536_v11  ;;  %v8538_v52 = vld [vmem:[#allocation40_spill] sm:$0xff] }
 0x22f   : > { %v1681_v59 = vrot.slane %v6849_v40, %v6723_v9  ;;  %v1685_v48 = vrot.slane %v6849_v40, %v6766_v3  ;;  %v2154_v50 = vpop.xlane.xlu0 %2153 }
 0x230   : > { %2818 = vperm.xlu0 %4815, %v1852_v6   ;;  %2929 = vperm.xlu1 %4814, %v1899_v8   ;;  %v1919_v6 = vmul.f32 %v6859_v35, %v8533_v53  ;;  %v8535_v8 = vld [vmem:[#allocation7_spill] sm:$0xff]  ;;  %v8539_v53 = vld [vmem:[#allocation30_spill] sm:$0xff]  ;;  %vm2157_vm0 = vcmp.eq.f32.partialorder %v2154_v50, inf  ;;  %vm2159_vm12 = vcmp.eq.f32.partialorder %v2154_v50, 0.0 }
 0x231   : > { %4852 = vrcp.f32 %v1681_v59  ;;  %v1857_v29 = vmul.f32 %v6815_v36, %v8535_v8  ;;  %v8379_v8 = vmov 0.0  }
 0x232   : > { %4854 = vrcp.f32 %v1685_v48  ;;  %4703 = vmatprep.subr.mxu1 %v8379_v8 }
 0x234   : > { %2833 = vperm.xlu0 %4815, %v1859_v63   ;;  %2926 = vperm.xlu1 %4814, %v1897_v58   ;;  %v6871_v63 = vpop.eup %4850  ;;  %v1733_v58 = vrot.slane %v6762_v33, %v6775_v46 }
 0x235   : > { %v1864_v59 = vmul.f32 %v6871_v63, %v6049_v16 }
 0x236   : > { %4856 = vrcp.f32 %v1733_v58  ;;  %v8541_v58 = vld [vmem:[#allocation50_spill] sm:$0xff] }
 0x237   : > { %4858 = vrsqrt.f32 %v2154_v50 }
 0x238   : > { %2962 = vperm.xlu0 %4815, %v1912_v22   ;;  %2941 = vperm.xlu1 %4814, %v1904_v0   ;;  %v1902_v22 = vmul.f32 %v6752_v13, %v8537_v25  ;;  %v1917_v0 = vmul.f32 %v6830_v18, %v8538_v52  ;;  %v1926_v13 = vmul.f32 %v6779_v31, %v6180_v23 }
 0x239   : > { %v1862_v23 = vmul.f32 %v6845_v44, %v6084_v54  ;;  %v1737_v25 = vrot.slane %v6762_v33, %v6796_v37  ;;  %v8543_v54 = vld [vmem:[#allocation42_spill] sm:$0xff] }
 0x23c   : > { %2977 = vperm.xlu0 %4815, %v1919_v6   ;;  %2797 = vperm.xlu1 %4814, %v1844_v15   ;;  %v1909_v6 = vmul.f32 %v6806_v57, %v8539_v53  ;;  %v8544_v53 = vld [vmem:[#allocation35_spill] sm:$0xff] }
 0x23e   : > { %v6883_v48 = vpop.eup %4852 }
 0x23f   : > { %v1804_v16 = vmul.f32 %v6883_v48, %v6244_v55  ;;  %v6889_v15 = vpop.eup %4854 }
 0x240   : > { %2830 = vperm.xlu0 %4815, %v1857_v29   ;;  %2809 = vperm.xlu1 %4814, %v1849_v28   ;;  %v1689_v29 = vrot.slane %v6849_v40, %v6726_v41  ;;  %v1809_v11 = vmul.f32 %v6889_v15, %v6250_v20  ;;  %v8540_v28 = vld [vmem:[#allocation48_spill] sm:$0xff] }
 0x241   : > { %v1851_v55 = vmul.f32 %v6793_v7, %v8540_v28  ;;  %v8542_v7 = vld [vmem:[#allocation33_spill] sm:$0xff] }
 0x242   : > { %4860 = vrcp.f32 %v1689_v29  ;;  %v8545_v29 = vld [vmem:[#allocation51_spill] sm:$0xff] }
 0x243   : > { %v6902_v31 = vpop.eup %4856  ;;  %4862 = vrcp.f32 %v1737_v25 }
 0x244   : > { %2845 = vperm.xlu0 %4815, %v1864_v59   ;;  %2938 = vperm.xlu1 %4814, %v1902_v22   ;;  %v1855_v59 = vmul.f32 %v6815_v36, %v8541_v58  ;;  %v1869_v20 = vmul.f32 %v6902_v31, %v6080_v10  ;;  %v1911_v22 = vmul.f32 %v6806_v57, %v8542_v7  ;;  %v4859_v52 = vpop.eup %4858 }
 0x245   : > { %v1811_v10 = vmul.f32 %v6889_v15, %v6261_v32  ;;  %v1741_v32 = vrot.slane %v6762_v33, %v6824_v4 }
 0x248   : > { %2974 = vperm.xlu0 %4815, %v1917_v0   ;;  %2953 = vperm.xlu1 %4814, %v1909_v6   ;;  %v1922_v0 = vmul.f32 %v6859_v35, %v8543_v54  ;;  %v1915_v6 = vmul.f32 %v6830_v18, %v8544_v53  ;;  %v8549_v54 = vld [vmem:[#allocation57_spill] sm:$0xff] }
 0x24c   : > { %2701 = vperm.xlu0 %4815, %v1804_v16   ;;  %2995 = vperm.xlu1 %4814, %v1926_v13   ;;  %v2156_v16 = vmul.f32 %v4859_v52, %v2154_v50  ;;  %v1693_v13 = vrot.slane %v6849_v40, %v6731_v43  ;;  %v8548_v52 = vld [vmem:[#allocation4_spill] sm:$0xff] }
 0x24e   : > { %v2158_v28 = vsel %vm2157_vm0, %v2154_v50, %v2156_v16  ;;  %4864 = vrcp.f32 %v1693_v13  ;;  %v8551_v13 = vld [vmem:[#allocation68_spill] sm:$0xff] }
 0x24f   : > { %v6920_v57 = vpop.eup %4860  ;;  %4866 = vrcp.f32 %v1741_v32 }
 0x250   : > { %2713 = vperm.xlu0 %4815, %v1809_v11   ;;  %2815 = vperm.xlu1 %4814, %v1851_v55   ;;  %v1847_v11 = vmul.f32 %v6785_v21, %v8545_v29  ;;  %v2160_v55 = vand.u32 2147483648, %v2154_v50  ;;  %v8547_v21 = vld [vmem:[#allocation55_spill] sm:$0xff]  ;;  %v6936_v50 = vpop.permute.xlu0 %2896 }
 0x251   : > { %v1871_v7 = vmul.f32 %v6902_v31, %v8547_v21  ;;  %v8556_v21 = vld [vmem:[#allocation13_spill] sm:$0xff] }
 0x252   : > { %v2161_v58 = vsel %vm2159_vm12, %v2160_v55, %v2158_v28 }
 0x254   : > { %2842 = vperm.xlu0 %4815, %v1862_v23   ;;  %2824 = vperm.xlu1 %4814, %v1855_v59   ;;  %v1815_v23 = vmul.f32 %v6920_v57, %v6264_v38  ;;  %v8546_v59 = vld [vmem:[#allocation2_spill] sm:$0xff]  ;;  %v1860_v38 = vmul.f32 %v6845_v44, %v8548_v52 }
 0x255   : > { %v1856_v25 = vmul.f32 %v6815_v36, %v8546_v59  ;;  %v8555_v59 = vld [vmem:[#allocation58_spill] sm:$0xff] }
 0x258   : > { %2857 = vperm.xlu0 %4815, %v1869_v20   ;;  %2959 = vperm.xlu1 %4814, %v1911_v22   ;;  %v6930_v20 = vmax.f32 %v2161_v58, 1e-12  ;;  %v6934_v22 = vpop.eup %4862  ;;  %v1697_v58 = vrot.slane %v6849_v40, %v6740_v42 }
 0x259   : > { %v1875_v33 = vmul.f32 %v6934_v22, %v8549_v54  ;;  %v8558_v54 = vld [vmem:[#allocation41_spill] sm:$0xff] }
 0x25a   : > { %v2167_v36 = vrot.slane %v6930_v20, %v6723_v9  ;;  %v2171_v16 = vrot.slane %v6930_v20, %v6766_v3  ;;  %v8552_v9 = vld [vmem:[#allocation39_spill] sm:$0xff] }
 0x25b   : > { %v6952_v29 = vpop.eup %4864 }
 0x25c   : > { %2986 = vperm.xlu0 %4815, %v1922_v0   ;;  %2968 = vperm.xlu1 %4814, %v1915_v6   ;;  %v8550_v0 = vld [vmem:[#allocation37_spill] sm:$0xff]  ;;  %v6946_v6 = vpop.permute.xlu0 %2923  ;;  %4868 = vrcp.f32 %v2167_v36  ;;  %v6966_v32 = vpop.eup %4866 }
 0x25d   : > { %v1916_v53 = vmul.f32 %v6830_v18, %v8550_v0  ;;  %4870 = vrcp.f32 %v2171_v16  ;;  %v8553_v18 = vld [vmem:[#allocation71_spill] sm:$0xff]  ;;  %v8559_v0 = vld [vmem:[#allocation77_spill] sm:$0xff] }
 0x25e   : > { %v1819_v28 = vmul.f32 %v6952_v29, %v8553_v18  ;;  %4872 = vrcp.f32 %v1697_v58  ;;  %v8561_v18 = vld [vmem:[#allocation79_spill] sm:$0xff] }
 0x260   : > { %2719 = vperm.xlu0 %4815, %v1811_v10   ;;  %2806 = vperm.xlu1 %4814, %v1847_v11   ;;  %v1812_v10 = vmul.f32 %v6889_v15, %v8551_v13  ;;  %v1920_v11 = vmul.f32 %v6859_v35, %v8552_v9  ;;  %v6958_v55 = vpop.permute.xlu0 %2932 }
 0x264   : > { %2728 = vperm.xlu0 %4815, %v1815_v23   ;;  %2827 = vperm.xlu1 %4814, %v1856_v25   ;;  %v8554_v23 = vld [vmem:[#allocation8_spill] sm:$0xff]  ;;  %v1872_v25 = vmul.f32 %v6902_v31, %v8555_v59  ;;  %v6970_v52 = vpop.permute.xlu0 %2935 }
 0x265   : > { %v1861_v3 = vmul.f32 %v6845_v44, %v8554_v23  ;;  %v8563_v59 = vld [vmem:[#allocation72_spill] sm:$0xff] }
 0x268   : > { %2863 = vperm.xlu0 %4815, %v1871_v7   ;;  %2836 = vperm.xlu1 %4814, %v1860_v38   ;;  %v1865_v7 = vmul.f32 %v6871_v63, %v8556_v21  ;;  %v8557_v38 = vld [vmem:[#allocation62_spill] sm:$0xff]  ;;  %v6982_v13 = vpop.permute.xlu0 %2944 }
 0x269   : > { %v1879_v44 = vmul.f32 %v6966_v32, %v8557_v38  ;;  %v6974_v36 = vpop.eup %4868  ;;  %v8565_v38 = vld [vmem:[#allocation14_spill] sm:$0xff] }
 0x26a   : > { %v6980_v16 = vpop.eup %4870 }
 0x26b   : > { %v6998_v21 = vpop.eup %4872 }
 0x26c   : > { %2872 = vperm.xlu0 %4815, %v1875_v33   ;;  %2971 = vperm.xlu1 %4814, %v1916_v53   ;;  %v1921_v33 = vmul.f32 %v6859_v35, %v8558_v54  ;;  %v2205_v53 = vmul.f32 %v6974_v36, %v8559_v0  ;;  %v2210_v35 = vmul.f32 %v6980_v16, %v8561_v18  ;;  %v8566_v54 = vld [vmem:[#allocation76_spill] sm:$0xff] }
 0x270   : > { %2722 = vperm.xlu0 %4815, %v1812_v10   ;;  %2980 = vperm.xlu1 %4814, %v1920_v11   ;;  %v8560_v10 = vld [vmem:[#allocation25_spill] sm:$0xff]  ;;  %v2175_v11 = vrot.slane %v6930_v20, %v6726_v41 }
 0x271   : > { %v1805_v9 = vmul.f32 %v6883_v48, %v8560_v10  ;;  %v8568_v10 = vld [vmem:[#allocation53_spill] sm:$0xff] }
 0x272   : > { %4874 = vrcp.f32 %v2175_v11  ;;  %v8569_v11 = vld [vmem:[#allocation60_spill] sm:$0xff] }
 0x273   : > { %v1877_v18 = vmul.f32 %v6934_v22, %v8569_v11  ;;  %v8573_v11 = vld [vmem:[#allocation54_spill] sm:$0xff] }
 0x274   : > { %2737 = vperm.xlu0 %4815, %v1819_v28   ;;  %2839 = vperm.xlu1 %4814, %v1861_v3   ;;  %v8562_v3 = vld [vmem:[#allocation26_spill] sm:$0xff] }
 0x275   : > { %v1810_v58 = vmul.f32 %v6889_v15, %v8562_v3  ;;  %v1701_v15 = vrot.slane %v6849_v40, %v6775_v46 }
 0x277   : > { %4876 = vrcp.f32 %v1701_v15  ;;  %v8571_v15 = vld [vmem:[#allocation66_spill] sm:$0xff] }
 0x278   : > { %2866 = vperm.xlu0 %4815, %v1872_v25   ;;  %2848 = vperm.xlu1 %4814, %v1865_v7   ;;  %v1817_v25 = vmul.f32 %v6920_v57, %v8563_v59 }
 0x27c   : > { %2881 = vperm.xlu0 %4815, %v1879_v44   ;;  %2983 = vperm.xlu1 %4814, %v1921_v33   ;;  %v1866_v44 = vmul.f32 %v6871_v63, %v8565_v38  ;;  %v1824_v33 = vmul.f32 %v6998_v21, %v8566_v54  ;;  %v1814_v54 = vmul.f32 %v6920_v57, %v8571_v15 }
 0x27f   : > { %v7026_v38 = vpop.eup %4874 }
 0x280   : > { %2346 = vperm.xlu0 %4815, %v2205_v53   ;;  %2704 = vperm.xlu1 %4814, %v1805_v9   ;;  %v1870_v9 = vmul.f32 %v6902_v31, %v8568_v10  ;;  %v2215_v10 = vmul.f32 %v7026_v38, %v6446_v27  ;;  %v8576_v27 = vld [vmem:[#allocation56_spill] sm:$0xff] }
 0x283   : > { %v6990_v28 = vpop.permute.xlu0 %2992  ;;  %v6992_v23 = vpop.permute.xlu1 %2989 }
 0x284   : > { %2358 = vperm.xlu0 %4815, %v2210_v35   ;;  %2716 = vperm.xlu1 %4814, %v1810_v58   ;;  %v8570_v58 = vld [vmem:[#allocation65_spill] sm:$0xff] }
 0x285   : > { %v1806_v59 = vmul.f32 %v6883_v48, %v8570_v58  ;;  %v8574_v58 = vld [vmem:[#allocation74_spill] sm:$0xff] }
 0x287   : > { %v7000_v7 = vpop.permute.xlu0 %2800  ;;  %v7002_v41 = vpop.permute.xlu1 %2893 }
 0x288   : > { %8564 = vst [vmem:[#allocation11_spill] sm:$0xff] %v7000_v7  ;;  %2734 = vperm.xlu0 %4815, %v1817_v25   ;;  %2851 = vperm.xlu1 %4814, %v1866_v44   ;;  %v2207_v25 = vmul.f32 %v6974_v36, %v6389_v1 }
 0x28b   : > { %v7010_v0 = vpop.permute.xlu0 %2812  ;;  %v7012_v53 = vpop.permute.xlu1 %2905 }
 0x28c   : > { %8567 = vst [vmem:[#allocation18_spill] sm:$0xff] %v7010_v0  ;;  %2749 = vperm.xlu0 %4815, %v1824_v33   ;;  %2860 = vperm.xlu1 %4814, %v1870_v9   ;;  %v2179_v33 = vrot.slane %v6930_v20, %v6731_v43  ;;  %v2183_v0 = vrot.slane %v6930_v20, %v6740_v42  ;;  %v8583_v42 = vld [vmem:[#allocation59_spill] sm:$0xff] }
 0x28e   : > { %4878 = vrcp.f32 %v2179_v33 }
 0x28f   : > { %v7018_v35 = vpop.permute.xlu0 %2947  ;;  %v7020_v3 = vpop.permute.xlu1 %2908 }
 0x290   : > { %2878 = vperm.xlu0 %4815, %v1877_v18   ;;  %2707 = vperm.xlu1 %4814, %v1806_v59   ;;  %v1867_v18 = vmul.f32 %v6871_v63, %v8573_v11  ;;  %v1822_v59 = vmul.f32 %v6952_v29, %v8574_v58  ;;  %v1705_v63 = vrot.slane %v6849_v40, %v6796_v37  ;;  %v8578_v58 = vld [vmem:[#allocation67_spill] sm:$0xff] }
 0x291   : > { %v1807_v8 = vmul.f32 %v6883_v48, %v8578_v58  ;;  %v2213_v48 = vmul.f32 %v6980_v16, %v6496_v39  ;;  %v1876_v39 = vmul.f32 %v6934_v22, %v8583_v42 }
 0x292   : > { %4880 = vrcp.f32 %v1705_v63 }
 0x293   : > { %v7028_v31 = vpop.permute.xlu0 %2956  ;;  %v7030_v44 = vpop.permute.xlu1 %2899  ;;  %4882 = vrcp.f32 %v2183_v0 }
 0x294   : > { %2352 = vperm.xlu0 %4815, %v2207_v25   ;;  %2725 = vperm.xlu1 %4814, %v1814_v54   ;;  %v7046_v25 = vpop.eup %4876  ;;  %v1874_v54 = vmul.f32 %v6934_v22, %v8576_v27 }
 0x297   : > { %v7038_v9 = vpop.permute.xlu0 %2803  ;;  %v7040_v1 = vpop.permute.xlu1 %2911 }
 0x298   : > { %8572 = vst [vmem:[#allocation24_spill] sm:$0xff] %v7038_v9  ;;  %2370 = vperm.xlu0 %4815, %v2215_v10   ;;  %2854 = vperm.xlu1 %4814, %v1867_v18   ;;  %v8577_v10 = vld [vmem:[#allocation82_spill] sm:$0xff]  ;;  %v8580_v9 = vld [vmem:[#allocation69_spill] sm:$0xff] }
 0x299   : > { %v1829_v33 = vmul.f32 %v7046_v25, %v8577_v10  ;;  %v1816_v10 = vmul.f32 %v6920_v57, %v8580_v9 }
 0x29b   : > { %v7048_v15 = vpop.permute.xlu0 %2821  ;;  %v7050_v43 = vpop.permute.xlu1 %2917 }
 0x29c   : > { %8575 = vst [vmem:[#allocation44_spill] sm:$0xff] %v7048_v15  ;;  %2746 = vperm.xlu0 %4815, %v1822_v59   ;;  %2869 = vperm.xlu1 %4814, %v1874_v54   ;;  %v8579_v15 = vld [vmem:[#allocation64_spill] sm:$0xff] }
 0x29d   : > { %v1882_v59 = vmul.f32 %v6966_v32, %v8579_v15  ;;  %v8581_v15 = vld [vmem:[#allocation70_spill] sm:$0xff] }
 0x29f   : > { %v7058_v11 = vpop.permute.xlu0 %2950  ;;  %v7060_v18 = vpop.permute.xlu1 %2920 }
 0x2a0   : > { %2761 = vperm.xlu0 %4815, %v1829_v33   ;;  %2710 = vperm.xlu1 %4814, %v1807_v8   ;;  %v7076_v8 = vpop.eup %4878  ;;  %v1820_v33 = vmul.f32 %v6952_v29, %v8581_v15 }
 0x2a1   : > { %v2220_v57 = vmul.f32 %v7076_v8, %v6548_v47  ;;  %v7096_v15 = vpop.eup %4880  ;;  %v8585_v47 = vld [vmem:[#allocation61_spill] sm:$0xff] }
 0x2a2   : > { %v1834_v22 = vmul.f32 %v7096_v15, %v6436_v2  ;;  %v8587_v2 = vld [vmem:[#allocation80_spill] sm:$0xff] }
 0x2a3   : > { %v7066_v27 = vpop.permute.xlu0 %2965  ;;  %v7068_v54 = vpop.permute.xlu1 %2902 }
 0x2a4   : > { %2890 = vperm.xlu0 %4815, %v1882_v59   ;;  %2731 = vperm.xlu1 %4814, %v1816_v10   ;;  %v1709_v10 = vrot.slane %v6849_v40, %v6824_v4  ;;  %v8586_v40 = vld [vmem:[#allocation78_spill] sm:$0xff] }
 0x2a6   : > { %4884 = vrcp.f32 %v1709_v10 }
 0x2a7   : > { %v7078_v63 = vpop.permute.xlu0 %2998  ;;  %v7082_v58 = vpop.permute.xlu1 %2914 }
 0x2a8   : > { %2367 = vperm.xlu0 %4815, %v2213_v48   ;;  %2740 = vperm.xlu1 %4814, %v1820_v33   ;;  %v1827_v48 = vmul.f32 %v6998_v21, %v6449_v45  ;;  %v1880_v33 = vmul.f32 %v6966_v32, %v8585_v47  ;;  %v2206_v45 = vmul.f32 %v6974_v36, %v8586_v40  ;;  %v7116_v47 = vpop.eup %4882 }
 0x2ab   : > { %v7086_v9 = vpop.permute.xlu0 %2818  ;;  %v7090_v59 = vpop.permute.xlu1 %2929 }
 0x2ac   : > { %8582 = vst [vmem:[#allocation19_spill] sm:$0xff] %v7086_v9  ;;  %2382 = vperm.xlu0 %4815, %v2220_v57   ;;  %2875 = vperm.xlu1 %4814, %v1876_v39   ;;  %v2187_v39 = vrot.slane %v6930_v20, %v6775_v46  ;;  %v8589_v46 = vld [vmem:[#allocation73_spill] sm:$0xff] }
 0x2ae   : > { %4886 = vrcp.f32 %v2187_v39  ;;  %v8591_v39 = vld [vmem:[#allocation75_spill] sm:$0xff] }
 0x2af   : > { %v7098_v0 = vpop.permute.xlu0 %2833  ;;  %v7102_v9 = vpop.permute.xlu1 %2926 }
 0x2b0   : > { %8584 = vst [vmem:[#allocation46_spill] sm:$0xff] %v7098_v0  ;;  %2758 = vperm.xlu0 %4815, %v1827_v48   ;;  %2884 = vperm.xlu1 %4814, %v1880_v33   ;;  %v2218_v48 = vmul.f32 %v7026_v38, %v6594_v30  ;;  %v2211_v33 = vmul.f32 %v6980_v16, %v8587_v2 }
 0x2b1   : > { %v1821_v30 = vmul.f32 %v6952_v29, %v8589_v46  ;;  %v1832_v2 = vmul.f32 %v7046_v25, %v6489_v12  ;;  %v2191_v29 = vrot.slane %v6930_v20, %v6796_v37  ;;  %v8592_v12 = vld [vmem:[#allocation63_spill] sm:$0xff]  ;;  %v2223_v37 = vmul.f32 %v7076_v8, %v6624_v14 }
 0x2b3   : > { %v7106_v57 = vpop.permute.xlu0 %2962  ;;  %v7110_v42 = vpop.permute.xlu1 %2941  ;;  %4888 = vrcp.f32 %v2191_v29 }
 0x2b4   : > { %2773 = vperm.xlu0 %4815, %v1834_v22   ;;  %2349 = vperm.xlu1 %4814, %v2206_v45   ;;  %v2225_v22 = vmul.f32 %v7116_v47, %v6590_v51  ;;  %v7134_v7 = vpop.eup %4884 }
 0x2b7   : > { %v7118_v10 = vpop.permute.xlu0 %2977  ;;  %v7122_v0 = vpop.permute.xlu1 %2797 }
 0x2b8   : > { %2379 = vperm.xlu0 %4815, %v2218_v48   ;;  %2361 = vperm.xlu1 %4814, %v2211_v33   ;;  %v1825_v33 = vmul.f32 %v6998_v21, %v8591_v39  ;;  %v3459_v39 = vrot.slane %v6992_v23, %v5572_v34 }
 0x2bb   : > { %v7126_v40 = vpop.permute.xlu0 %2830  ;;  %v7130_v45 = vpop.permute.xlu1 %2809 }
 0x2bc   : > { %8588 = vst [vmem:[#allocation9_spill] sm:$0xff] %v7126_v40  ;;  %2394 = vperm.xlu0 %4815, %v2225_v22   ;;  %2743 = vperm.xlu1 %4814, %v1821_v30   ;;  %v1839_v22 = vmul.f32 %v7134_v7, %v6467_v56  ;;  %v1881_v30 = vmul.f32 %v6966_v32, %v8592_v12  ;;  %v7158_v56 = vpop.eup %4886 }
 0x2bd   : > { %v2230_v23 = vmul.f32 %v7158_v56, %v6596_v62  ;;  %v2195_v62 = vrot.slane %v6930_v20, %v6824_v4  ;;  %v2228_v4 = vmul.f32 %v7116_v47, %v6631_v26 }
 0x2bf   : > { %v7136_v48 = vpop.permute.xlu0 %2845  ;;  %v7140_v51 = vpop.permute.xlu1 %2938  ;;  %4890 = vrcp.f32 %v2195_v62 }
 0x2c0   : > { %8590 = vst [vmem:[#allocation29_spill] sm:$0xff] %v7136_v48  ;;  %2770 = vperm.xlu0 %4815, %v1832_v2   ;;  %2752 = vperm.xlu1 %4814, %v1825_v33   ;;  %v3463_v2 = vrot.slane %v6990_v28, %v5586_v60  ;;  %v8594_v48 = vld [vmem:[#allocation86_spill] sm:$0xff]  ;;  %v3473_v28 = vrot.slane %v7078_v63, %v5592_v49  ;;  %v8596_v63 = vld [vmem:[#allocation91_spill] sm:$0xff]  ;;  %v7192_v20 = vpop.eup %4888 }
 0x2c1   : > { %v2212_v32 = vmul.f32 %v6980_v16, %v8594_v48 }
 0x2c2   : > { %v3464_v14 = vsel %vm1124_vm1, %v3463_v2, %v3459_v39  ;;  %v1837_v2 = vmul.f32 %v7096_v15, %v8596_v63  ;;  %v8597_v39 = vmov 0.0   ;;  %v1842_v63 = vmul.f32 %v7134_v7, %v6557_v24 }
 0x2c3   : > { %v7146_v46 = vpop.permute.xlu0 %2974  ;;  %v7150_v40 = vpop.permute.xlu1 %2953  ;;  %4711 = vmatprep.mubr.msk.f32.mxu1 %vm4998_vm14, %v8597_v39 }
 0x2c4   : > { %2785 = vperm.xlu0 %4815, %v1839_v22   ;;  %2887 = vperm.xlu1 %4814, %v1881_v30   ;;  %v8595_v30 = vld [vmem:[#allocation85_spill] sm:$0xff] }
 0x2c7   : > { %v7160_v33 = vpop.permute.xlu0 %2701  ;;  %v2996_v12 = vpop.permute.xlu1 %2995 }
 0x2c8   : > { %8593 = vst [vmem:[#allocation10_spill] sm:$0xff] %v7160_v33  ;;  %2391 = vperm.xlu0 %4815, %v2223_v37   ;;  %v3468_v29 = vrot.slane %v2996_v12, %v5589_v61  ;;  %2364 = vperm.xlu1 %4814, %v2212_v32   ;;  %v2216_v33 = vmul.f32 %v7026_v38, %v8595_v30  ;;  %v8598_v12 = vld [vmem:[#allocation81_spill] sm:$0xff] }
 0x2ca   : > { %v3469_v16 = vsel %vm1131_vm2, %v3468_v29, %v3464_v14  ;;  %v1826_v29 = vmul.f32 %v6998_v21, %v8598_v12  ;;  %v2235_v21 = vmul.f32 %v7192_v20, %v6602_v17  ;;  %v8602_v12 = vld [vmem:[#allocation90_spill] sm:$0xff]  ;;  %v2237_v17 = vmul.f32 %v7192_v20, %v6648_v5 }
 0x2cb   : > { %v7170_v22 = vpop.permute.xlu0 %2713  ;;  %v7175_v48 = vpop.permute.xlu1 %2815  ;;  %v3474_v37 = vsel %vm1138_vm3, %v3473_v28, %v3469_v16  ;;  %v8599_v28 = vld [vmem:[#allocation83_spill] sm:$0xff] }
 0x2cc   : > { %2406 = vperm.xlu0 %4815, %v2230_v23   ;;  %2373 = vperm.xlu1 %4814, %v2216_v33   ;;  %v1830_v14 = vmul.f32 %v7046_v25, %v8599_v28 }
 0x2cd   : > { %4704 = vmatpush3.xpose.msk.msra.mxu1 %vm1628_vm11, %v3474_v37  ;;  %4734 = vmatprep.subr.msk.mxu0 %vm3872_vm13, %v3474_v37 }
 0x2ce   : > { %4705 = vmatprep.subr.mxu1 %v8597_v39  ;;  %4735 = vmatpush3.msk.msra.mxu0 %vm3872_vm13, %v3474_v37  ;;  %v8600_v37 = vld [vmem:[#allocation93_spill] sm:$0xff] }
 0x2cf   : > { %v7184_v32 = vpop.permute.xlu0 %2842  ;;  %v7188_v23 = vpop.permute.xlu1 %2824  ;;  %v2208_v62 = vmul.f32 %v6974_v36, %v8600_v37 }
 0x2d0   : > { %2782 = vperm.xlu0 %4815, %v1837_v2   ;;  %2755 = vperm.xlu1 %4814, %v1826_v29   ;;  %v2217_v29 = vmul.f32 %v7026_v38, %v8602_v12  ;;  %v7218_v36 = vpop.eup %4890  ;;  %v8606_v12 = vld [vmem:[#allocation105_spill] sm:$0xff] }
 0x2d1   : > { %v2241_v38 = vmul.f32 %v7218_v36, %v6671_v19  ;;  %v3311_v19 = vrot.slane %v6936_v50, %v5586_v60 }
 0x2d3   : > { %v7194_v33 = vpop.permute.xlu0 %2857  ;;  %v7198_v30 = vpop.permute.xlu1 %2959 }
 0x2d4   : > { %2403 = vperm.xlu0 %4815, %v2228_v4   ;;  %2764 = vperm.xlu1 %4814, %v1830_v14   ;;  %v8604_v14 = vld [vmem:[#allocation94_spill] sm:$0xff] }
 0x2d7   : > { %v7202_v16 = vpop.permute.xlu0 %2986  ;;  %v7206_v26 = vpop.permute.xlu1 %2968 }
 0x2d8   : > { %2418 = vperm.xlu0 %4815, %v2235_v21   ;;  %2355 = vperm.xlu1 %4814, %v2208_v62   ;;  %v2221_v21 = vmul.f32 %v7076_v8, %v8604_v14  ;;  %v8605_v62 = vld [vmem:[#allocation89_spill] sm:$0xff] }
 0x2db   : > { %v7210_v2 = vpop.permute.xlu0 %2719  ;;  %v7214_v4 = vpop.permute.xlu1 %2806 }
 0x2dc   : > { %8601 = vst [vmem:[#allocation31_spill] sm:$0xff] %v7210_v2  ;;  %2794 = vperm.xlu0 %4815, %v1842_v63   ;;  %2376 = vperm.xlu1 %4814, %v2217_v29   ;;  %v1831_v63 = vmul.f32 %v7046_v25, %v8605_v62  ;;  %v2242_v29 = vmul.f32 %v7218_v36, %v8606_v12  ;;  %v8607_v2 = vld [vmem:[#allocation84_spill] sm:$0xff] }
 0x2dd   : > { %v3354_v25 = vrot.slane %v6946_v6, %v5589_v61  ;;  %v3307_v62 = vrot.slane %v7002_v41, %v5572_v34  ;;  %v3368_v6 = vrot.slane %v6958_v55, %v5586_v60  ;;  %v3345_v41 = vrot.slane %v7050_v43, %v5572_v34 }
 0x2de   : > { %v3340_v55 = vrot.slane %v7082_v58, %v5592_v49  ;;  %v3383_v58 = vrot.slane %v7110_v42, %v5572_v34  ;;  %v3411_v42 = vrot.slane %v7198_v30, %v5589_v61 }
 0x2df   : > { %v7220_v28 = vpop.permute.xlu0 %2728  ;;  %v7224_v24 = vpop.permute.xlu1 %2827 }
 0x2e0   : > { %8603 = vst [vmem:[#allocation17_spill] sm:$0xff] %v7220_v28  ;;  %2424 = vperm.xlu0 %4815, %v2237_v17   ;;  %2385 = vperm.xlu1 %4814, %v2221_v21   ;;  %v1835_v17 = vmul.f32 %v7096_v15, %v8607_v2  ;;  %v8609_v2 = vld [vmem:[#allocation95_spill] sm:$0xff] }
 0x2e3   : > { %v7228_v37 = vpop.permute.xlu0 %2863  ;;  %v7232_v5 = vpop.permute.xlu1 %2836 }
 0x2e4   : > { %2433 = vperm.xlu0 %4815, %v2241_v38   ;;  %2767 = vperm.xlu1 %4814, %v1831_v63   ;;  %v3349_v38 = vrot.slane %v7060_v18, %v5586_v60  ;;  %v3330_v63 = vrot.slane %v7020_v3, %v5586_v60  ;;  %v3335_v18 = vrot.slane %v7040_v1, %v5589_v61 }
 0x2e5   : > { %v3364_v3 = vrot.slane %v7090_v59, %v5572_v34  ;;  %v3316_v1 = vrot.slane %v7030_v44, %v5589_v61  ;;  %v3359_v59 = vrot.slane %v7102_v9, %v5592_v49  ;;  %v3378_v9 = vrot.slane %v7140_v51, %v5592_v49 }
 0x2e6   : > { %v3350_v43 = vsel %vm1124_vm1, %v3349_v38, %v3345_v41 }
 0x2e7   : > { %v7236_v14 = vpop.permute.xlu0 %2872  ;;  %v2972_v21 = vpop.permute.xlu1 %2971  ;;  %v3369_v38 = vsel %vm1124_vm1, %v3368_v6, %v3364_v3  ;;  %v3406_v6 = vrot.slane %v7028_v31, %v5586_v60  ;;  %v3421_v3 = vrot.slane %v7066_v27, %v5572_v34  ;;  %v3392_v31 = vrot.slane %v7018_v35, %v5589_v61 }
 0x2e8   : > { %2436 = vperm.xlu0 %4815, %v2242_v29   ;;  %2776 = vperm.xlu1 %4814, %v1835_v17   ;;  %v2222_v29 = vmul.f32 %v7076_v8, %v8609_v2  ;;  %v8610_v17 = vld [vmem:[#allocation87_spill] sm:$0xff]  ;;  %v3387_v8 = vrot.slane %v6982_v13, %v5586_v60  ;;  %v8611_v2 = vld [vmem:[#allocation96_spill] sm:$0xff]  ;;  %v3312_v13 = vsel %vm1124_vm1, %v3311_v19, %v3307_v62 }
 0x2e9   : > { %v1836_v50 = vmul.f32 %v7096_v15, %v8610_v17  ;;  %v3326_v15 = vrot.slane %v7012_v53, %v5572_v34  ;;  %v3321_v53 = vrot.slane %v7068_v54, %v5592_v49  ;;  %v3402_v19 = vrot.slane %v7150_v40, %v5572_v34 }
 0x2ea   : > { %v3355_v54 = vsel %vm1131_vm2, %v3354_v25, %v3350_v43  ;;  %v3317_v51 = vsel %vm1131_vm2, %v3316_v1, %v3312_v13  ;;  %v3430_v41 = vrot.slane %v2972_v21, %v5589_v61  ;;  %v3388_v30 = vsel %vm1124_vm1, %v3387_v8, %v3383_v58 }
 0x2eb   : > { %v7250_v12 = vpop.permute.xlu0 %2722  ;;  %v2981_v28 = vpop.permute.xlu1 %2980  ;;  %v3331_v17 = vsel %vm1124_vm1, %v3330_v63, %v3326_v15  ;;  %v3360_v40 = vsel %vm1138_vm3, %v3359_v59, %v3355_v54  ;;  %v3322_v25 = vsel %vm1138_vm3, %v3321_v53, %v3317_v51  ;;  %v3407_v21 = vsel %vm1124_vm1, %v3406_v6, %v3402_v19 }
 0x2ec   : > { %8608 = vst [vmem:[#allocation47_spill] sm:$0xff] %v7250_v12  ;;  %v3373_v12 = vrot.slane %v6970_v52, %v5589_v61  ;;  %2388 = vperm.xlu1 %4814, %v2222_v29   ;;  %v2226_v52 = vmul.f32 %v7116_v47, %v8611_v2  ;;  %v3336_v44 = vsel %vm1131_vm2, %v3335_v18, %v3331_v17 }
 0x2ed   : > { %v3341_v63 = vsel %vm1138_vm3, %v3340_v55, %v3336_v44  ;;  %v3425_v18 = vrot.slane %v7206_v26, %v5586_v60  ;;  %v3412_v59 = vsel %vm1131_vm2, %v3411_v42, %v3407_v21  ;;  %v3393_v35 = vsel %vm1131_vm2, %v3392_v31, %v3388_v30  ;;  %v8614_v30 = vld [vmem:[#allocation97_spill] sm:$0xff] }
 0x2ee   : > { %v3374_v15 = vsel %vm1131_vm2, %v3373_v12, %v3369_v38  ;;  %v3489_v55 = vsel %vm1596_vm4, %v3341_v63, %v3322_v25  ;;  %v3416_v12 = vrot.slane %v7106_v57, %v5592_v49  ;;  %v3397_v13 = vrot.slane %v7058_v11, %v5592_v49 }
 0x2ef   : > { %v7285_v29 = vpop.permute.xlu0 %2737  ;;  %v7293_v62 = vpop.permute.xlu1 %2839  ;;  %v3379_v1 = vsel %vm1138_vm3, %v3378_v9, %v3374_v15  ;;  %v3490_v27 = vsel %vm1598_vm5, %v3360_v40, %v3489_v55  ;;  %v3426_v8 = vsel %vm1124_vm1, %v3425_v18, %v3421_v3  ;;  %v3435_v53 = vrot.slane %v7146_v46, %v5592_v49  ;;  %v8613_v18 = vld [vmem:[#allocation98_spill] sm:$0xff]  ;;  %v8615_v55 = vld [vmem:[#allocation92_spill] sm:$0xff] }
 0x2f0   : > { %2397 = vperm.xlu1 %4814, %v2226_v52   ;;  %v3431_v2 = vsel %vm1131_vm2, %v3430_v41, %v3426_v8  ;;  %v3444_v52 = vrot.slane %v2981_v28, %v5586_v60  ;;  %v3491_v17 = vsel %vm1600_vm6, %v3379_v1, %v3490_v27  ;;  %v3440_v57 = vrot.slane %v7118_v10, %v5572_v34 }
 0x2f1   : > { %v3417_v38 = vsel %vm1138_vm3, %v3416_v12, %v3412_v59  ;;  %v3398_v28 = vsel %vm1138_vm3, %v3397_v13, %v3393_v35  ;;  %v3436_v19 = vsel %vm1138_vm3, %v3435_v53, %v3431_v2  ;;  %v3454_v46 = vrot.slane %v7202_v16, %v5592_v49  ;;  %v8616_v59 = vld [vmem:[#allocation99_spill] sm:$0xff]  ;;  %v8617_v35 = vld [vmem:[#allocation100_spill] sm:$0xff] }
 0x2f2   : > { %v3445_v63 = vsel %vm1124_vm1, %v3444_v52, %v3440_v57  ;;  %v3492_v54 = vsel %vm1602_vm7, %v3398_v28, %v3491_v17  ;;  %v2227_v6 = vmul.f32 %v7116_v47, %v8613_v18  ;;  %v2231_v47 = vmul.f32 %v7158_v56, %v8614_v30  ;;  %v8622_v30 = vld [vmem:[#allocation11_spill] sm:$0xff] }
 0x2f3   : > { %v7311_v26 = vpop.permute.xlu0 %2866  ;;  %v7318_v43 = vpop.permute.xlu1 %2848  ;;  %v3493_v51 = vsel %vm1604_vm8, %v3417_v38, %v3492_v54  ;;  %v1841_v1 = vmul.f32 %v7134_v7, %v8615_v55  ;;  %v2232_v8 = vmul.f32 %v7158_v56, %v8616_v59  ;;  %v2236_v2 = vmul.f32 %v7192_v20, %v8617_v35  ;;  %v8623_v55 = vld [vmem:[#allocation18_spill] sm:$0xff] }
 0x2f4   : > { %2779 = vperm.xlu1 %4814, %v1836_v50   ;;  %v8612_v50 = vld [vmem:[#allocation88_spill] sm:$0xff]  ;;  %v3494_v3 = vsel %vm1606_vm9, %v3436_v19, %v3493_v51 }
 0x2f5   : > { %v1840_v44 = vmul.f32 %v7134_v7, %v8612_v50  ;;  %v8618_v7 = vld [vmem:[#allocation101_spill] sm:$0xff] }
 0x2f6   : > { %v2233_v17 = vmul.f32 %v7158_v56, %v8618_v7  ;;  %v8621_v56 = vld [vmem:[#allocation104_spill] sm:$0xff] }
 0x2f7   : > { %v7333_v58 = vpop.permute.xlu0 %2881  ;;  %v2984_v9 = vpop.permute.xlu1 %2983 }
 0x2f8   : > { %v3449_v11 = vrot.slane %v2984_v9, %v5589_v61  ;;  %2788 = vperm.xlu1 %4814, %v1840_v44   ;;  %v8619_v44 = vld [vmem:[#allocation102_spill] sm:$0xff]  ;;  %v8620_v9 = vld [vmem:[#allocation103_spill] sm:$0xff] }
 0x2f9   : > { %v2240_v57 = vmul.f32 %v7218_v36, %v8619_v44  ;;  %v2238_v28 = vmul.f32 %v7192_v20, %v8620_v9  ;;  %v8625_v44 = vld [vmem:[#allocation44_spill] sm:$0xff]  ;;  %v8626_v9 = vld [vmem:[#allocation19_spill] sm:$0xff] }
 0x2fa   : > { %v3450_v42 = vsel %vm1131_vm2, %v3449_v11, %v3445_v63 }
 0x2fb   : > { %v7348_v10 = vpop.permute.xlu0 %2346  ;;  %v7353_v40 = vpop.permute.xlu1 %2704  ;;  %v3455_v41 = vsel %vm1138_vm3, %v3454_v46, %v3450_v42  ;;  %v2243_v46 = vmul.f32 %v7218_v36, %v8621_v56  ;;  %v3155_v36 = vrot.slane %v7122_v0, %v5572_v34  ;;  %v8627_v56 = vld [vmem:[#allocation46_spill] sm:$0xff] }
 0x2fc   : > { %2400 = vperm.xlu1 %4814, %v2227_v6   ;;  %v3495_v16 = vsel %vm1608_vm10, %v3455_v41, %v3494_v3  ;;  %v3174_v3 = vrot.slane %v7130_v45, %v5572_v34  ;;  %v3197_v45 = vrot.slane %v7188_v23, %v5586_v60  ;;  %v3216_v23 = vrot.slane %v7232_v5, %v5586_v60 }
 0x2fd   : > { %4706 = vmatpush3.xpose.msk.msra.mxu1 %vm1628_vm11, %v3495_v16  ;;  %4736 = vmatprep.subr.mxu0 %v3495_v16  ;;  %v3169_v5 = vrot.slane %v7214_v4, %v5592_v49  ;;  %v3060_v4 = vrot.slane %v7285_v29, %v5572_v34 }
 0x2fe   : > { %4737 = vmatpush3.msra.mxu0 %v3495_v16  ;;  %4707 = vmatprep.subr.mxu1 %v8597_v39  ;;  %v3183_v16 = vrot.slane %v7175_v48, %v5589_v61 }
 0x2ff   : > { %v7359_v25 = vpop.permute.xlu0 %2358  ;;  %v7364_v15 = vpop.permute.xlu1 %2716 }
 0x300   : > { %2409 = vperm.xlu1 %4814, %v2231_v47   ;;  %v3159_v47 = vrot.slane %v8622_v30, %v5586_v60  ;;  %v8629_v30 = vld [vmem:[#allocation29_spill] sm:$0xff] }
 0x302   : > { %v3160_v35 = vsel %vm1124_vm1, %v3159_v47, %v3155_v36 }
 0x303   : > { %v7366_v31 = vpop.permute.xlu0 %2734  ;;  %v7370_v21 = vpop.permute.xlu1 %2851 }
 0x304   : > { %2791 = vperm.xlu1 %4814, %v1841_v1   ;;  %v3178_v1 = vrot.slane %v8623_v55, %v5586_v60  ;;  %v3221_v55 = vrot.slane %v7293_v62, %v5589_v61  ;;  %v3235_v62 = vrot.slane %v7318_v43, %v5586_v60 }
 0x306   : > { %v3179_v0 = vsel %vm1124_vm1, %v3178_v1, %v3174_v3  ;;  %v8628_v3 = vld [vmem:[#allocation9_spill] sm:$0xff] }
 0x307   : > { %v7372_v27 = vpop.permute.xlu0 %2749  ;;  %v7376_v12 = vpop.permute.xlu1 %2860  ;;  %v3184_v7 = vsel %vm1131_vm2, %v3183_v16, %v3179_v0  ;;  %v3207_v16 = vrot.slane %v8628_v3, %v5592_v49 }
 0x308   : > { %2412 = vperm.xlu1 %4814, %v2232_v8  }
 0x30b   : > { %v7380_v52 = vpop.permute.xlu1 %2707  ;;  %v7382_v13 = vpop.permute.xlu0 %2878 }
 0x30c   : > { %2421 = vperm.xlu1 %4814, %v2236_v2   ;;  %v8624_v2 = vld [vmem:[#allocation24_spill] sm:$0xff] }
 0x30d   : > { %v3164_v48 = vrot.slane %v8624_v2, %v5589_v61 }
 0x30f   : > { %v7386_v53 = vpop.permute.xlu1 %2725  ;;  %v7388_v50 = vpop.permute.xlu0 %2352  ;;  %v3165_v47 = vsel %vm1131_vm2, %v3164_v48, %v3160_v35 }
 0x310   : > { %2415 = vperm.xlu1 %4814, %v2233_v17   ;;  %v3202_v17 = vrot.slane %v7224_v24, %v5589_v61  ;;  %v3231_v24 = vrot.slane %v8629_v30, %v5572_v34 }
 0x313   : > { %v7392_v38 = vpop.permute.xlu1 %2854  ;;  %v7398_v19 = vpop.permute.xlu0 %2370 }
 0x314   : > { %2430 = vperm.xlu1 %4814, %v2240_v57   ;;  %v3193_v57 = vrot.slane %v8625_v44, %v5572_v34  ;;  %v3226_v44 = vrot.slane %v7184_v32, %v5592_v49  ;;  %v3254_v32 = vrot.slane %v7376_v12, %v5586_v60 }
 0x316   : > { %v3198_v0 = vsel %vm1124_vm1, %v3197_v45, %v3193_v57 }
 0x317   : > { %v7396_v11 = vpop.permute.xlu1 %2869  ;;  %v2747_v54 = vpop.permute.xlu0 %2746  ;;  %v3203_v35 = vsel %vm1131_vm2, %v3202_v17, %v3198_v0  ;;  %v3245_v17 = vrot.slane %v7392_v38, %v5592_v49  ;;  %v3236_v38 = vsel %vm1124_vm1, %v3235_v62, %v3231_v24 }
 0x318   : > { %2427 = vperm.xlu1 %4814, %v2238_v28   ;;  %v3188_v28 = vrot.slane %v8626_v9, %v5592_v49  ;;  %v3250_v9 = vrot.slane %v7194_v33, %v5572_v34  ;;  %v3269_v43 = vrot.slane %v7396_v11, %v5572_v34  ;;  %v3074_v29 = vrot.slane %v2747_v54, %v5592_v49 }
 0x31a   : > { %v3189_v1 = vsel %vm1138_vm3, %v3188_v28, %v3184_v7  ;;  %v3170_v28 = vsel %vm1138_vm3, %v3169_v5, %v3165_v47  ;;  %v3255_v54 = vsel %vm1124_vm1, %v3254_v32, %v3250_v9  ;;  %v3264_v9 = vrot.slane %v7311_v26, %v5592_v49 }
 0x31b   : > { %v7402_v63 = vpop.permute.xlu1 %2710  ;;  %v7408_v20 = vpop.permute.xlu0 %2761 }
 0x31c   : > { %2439 = vperm.xlu1 %4814, %v2243_v46   ;;  %v3212_v46 = vrot.slane %v8627_v56, %v5572_v34  ;;  %v3208_v56 = vsel %vm1138_vm3, %v3207_v16, %v3203_v35  ;;  %v3288_v35 = vrot.slane %v7333_v58, %v5572_v34 }
 0x31e   : > { %v3217_v45 = vsel %vm1124_vm1, %v3216_v23, %v3212_v46  ;;  %v3273_v46 = vrot.slane %v7236_v14, %v5586_v60  ;;  %v3259_v14 = vrot.slane %v7228_v37, %v5589_v61 }
 0x31f   : > { %v7406_v42 = vpop.permute.xlu1 %2731  ;;  %v7412_v51 = vpop.permute.xlu0 %2890  ;;  %v3222_v33 = vsel %vm1131_vm2, %v3221_v55, %v3217_v45 }
 0x320   : > { %v3227_v23 = vsel %vm1138_vm3, %v3226_v44, %v3222_v33  ;;  %v3274_v24 = vsel %vm1124_vm1, %v3273_v46, %v3269_v43  ;;  %v3260_v44 = vsel %vm1131_vm2, %v3259_v14, %v3255_v54  ;;  %v3050_v46 = vrot.slane %v7406_v42, %v5589_v61 }
 0x321   : > { %v3265_v33 = vsel %vm1138_vm3, %v3264_v9, %v3260_v44  ;;  %v3017_v42 = vrot.slane %v7402_v63, %v5592_v49  ;;  %v3055_v44 = vrot.slane %v7366_v31, %v5592_v49  ;;  %v8633_v9 = vld [vmem:[#allocation47_spill] sm:$0xff] }
 0x323   : > { %v2741_v18 = vpop.permute.xlu1 %2740  ;;  %v7428_v8 = vpop.permute.xlu0 %2367 }
 0x324   : > { %v3064_v2 = vrot.slane %v2741_v18, %v5586_v60  ;;  %v3240_v18 = vrot.slane %v7370_v21, %v5589_v61 }
 0x326   : > { %v3065_v21 = vsel %vm1124_vm1, %v3064_v2, %v3060_v4  ;;  %v3241_v3 = vsel %vm1131_vm2, %v3240_v18, %v3236_v38  ;;  %v8630_v4 = vld [vmem:[#allocation10_spill] sm:$0xff] }
 0x327   : > { %v7410_v6 = vpop.permute.xlu1 %2875  ;;  %v7468_v48 = vpop.permute.xlu0 %2382  ;;  %v3246_v16 = vsel %vm1138_vm3, %v3245_v17, %v3241_v3  ;;  %v3003_v18 = vrot.slane %v8630_v4, %v5572_v34  ;;  %v8631_v17 = vld [vmem:[#allocation17_spill] sm:$0xff] }
 0x328   : > { %v3278_v12 = vrot.slane %v7410_v6, %v5589_v61  ;;  %v3482_v6 = vsel %vm1596_vm4, %v3189_v1, %v3170_v28  ;;  %v3283_v1 = vrot.slane %v7382_v13, %v5592_v49  ;;  %v3045_v43 = vrot.slane %v8631_v17, %v5586_v60 }
 0x329   : > { %v3483_v0 = vsel %vm1598_vm5, %v3208_v56, %v3482_v6 }
 0x32a   : > { %v3279_v5 = vsel %vm1131_vm2, %v3278_v12, %v3274_v24  ;;  %v3484_v37 = vsel %vm1600_vm6, %v3227_v23, %v3483_v0  ;;  %v2482_v24 = vrot.slane %v7398_v19, %v5572_v34 }
 0x32b   : > { %v7414_v41 = vpop.permute.xlu1 %2884  ;;  %v7506_v55 = vpop.permute.xlu0 %2758  ;;  %v3485_v62 = vsel %vm1602_vm7, %v3246_v16, %v3484_v37  ;;  %v3284_v13 = vsel %vm1138_vm3, %v3283_v1, %v3279_v5 }
 0x32c   : > { %v3292_v2 = vrot.slane %v7414_v41, %v5586_v60  ;;  %v3022_v41 = vrot.slane %v7170_v22, %v5572_v34  ;;  %v3026_v22 = vrot.slane %v7364_v15, %v5586_v60  ;;  %v3007_v15 = vrot.slane %v7353_v40, %v5586_v60 }
 0x32e   : > { %v3293_v26 = vsel %vm1124_vm1, %v3292_v2, %v3288_v35  ;;  %v3027_v40 = vsel %vm1124_vm1, %v3026_v22, %v3022_v41  ;;  %v3008_v16 = vsel %vm1124_vm1, %v3007_v15, %v3003_v18  ;;  %v3036_v35 = vrot.slane %v8633_v9, %v5592_v49 }
 0x32f   : > { %v7426_v59 = vpop.permute.xlu1 %2349 }
 0x333   : > { %v7447_v36 = vpop.permute.xlu1 %2361 }
 0x334   : > { %v2467_v58 = vrot.slane %v7447_v36, %v5586_v60  ;;  %v3041_v36 = vrot.slane %v7386_v53, %v5572_v34  ;;  %v2477_v53 = vrot.slane %v7428_v8, %v5592_v49 }
 0x336   : > { %v3046_v8 = vsel %vm1124_vm1, %v3045_v43, %v3041_v36 }
 0x337   : > { %v2744_v7 = vpop.permute.xlu1 %2743  ;;  %v3051_v63 = vsel %vm1131_vm2, %v3050_v46, %v3046_v8 }
 0x338   : > { %v3069_v57 = vrot.slane %v2744_v7, %v5589_v61  ;;  %v3302_v7 = vrot.slane %v7412_v51, %v5592_v49  ;;  %v2463_v51 = vrot.slane %v7359_v25, %v5572_v34  ;;  %v3012_v25 = vrot.slane %v7380_v52, %v5589_v61  ;;  %v8632_v52 = vld [vmem:[#allocation31_spill] sm:$0xff] }
 0x339   : > { %v3031_v54 = vrot.slane %v8632_v52, %v5589_v61  ;;  %v3056_v4 = vsel %vm1138_vm3, %v3055_v44, %v3051_v63 }
 0x33a   : > { %v3070_v11 = vsel %vm1131_vm2, %v3069_v57, %v3065_v21  ;;  %v7537_v57 = vpop.permute.xlu0 %2773  ;;  %v2468_v23 = vsel %vm1124_vm1, %v2467_v58, %v2463_v51  ;;  %v3013_v1 = vsel %vm1131_vm2, %v3012_v25, %v3008_v16 }
 0x33b   : > { %v7497_v30 = vsel %vm1138_vm3, %v3074_v29, %v3070_v11  ;;  %v7499_v47 = vpop.permute.xlu1 %2752  ;;  %v3486_v29 = vsel %vm1604_vm8, %v3265_v33, %v3485_v62  ;;  %v3032_v2 = vsel %vm1131_vm2, %v3031_v54, %v3027_v40  ;;  %v3018_v19 = vsel %vm1138_vm3, %v3017_v42, %v3013_v1 }
 0x33c   : > { %v3487_v56 = vsel %vm1606_vm9, %v3284_v13, %v3486_v29  ;;  %v3083_v37 = vrot.slane %v7499_v47, %v5586_v60  ;;  %v3037_v31 = vsel %vm1138_vm3, %v3036_v35, %v3032_v2  ;;  %v3093_v47 = vrot.slane %v7506_v55, %v5592_v49 }
 0x33d   : > { %v2444_v55 = vrot.slane %v7348_v10, %v5572_v34 }
 0x33e   : > { %v2380_v0 = vpop.permute.xlu0 %2379 }
 0x33f   : > { %v2888_v45 = vpop.permute.xlu1 %2887  ;;  %v2496_v15 = vrot.slane %v2380_v0, %v5592_v49 }
 0x340   : > { %v3297_v32 = vrot.slane %v2888_v45, %v5589_v61  ;;  %v3079_v45 = vrot.slane %v7372_v27, %v5572_v34 }
 0x342   : > { %v3298_v28 = vsel %vm1131_vm2, %v3297_v32, %v3293_v26  ;;  %v3475_v32 = vsel %vm1596_vm4, %v3037_v31, %v3018_v19  ;;  %v3084_v13 = vsel %vm1124_vm1, %v3083_v37, %v3079_v45  ;;  %v2448_v26 = vrot.slane %v7426_v59, %v5586_v60  ;;  %v7595_v27 = vpop.permute.xlu0 %2394 }
 0x343   : > { %v2365_v21 = vpop.permute.xlu1 %2364  ;;  %v3303_v12 = vsel %vm1138_vm3, %v3302_v7, %v3298_v28  ;;  %v3476_v7 = vsel %vm1598_vm5, %v3056_v4, %v3475_v32  ;;  %v2453_v59 = vrot.slane %v7388_v50, %v5589_v61  ;;  %v3117_v32 = vrot.slane %v7537_v57, %v5572_v34 }
 0x344   : > { %v2472_v38 = vrot.slane %v2365_v21, %v5589_v61  ;;  %v3488_v11 = vsel %vm1608_vm10, %v3303_v12, %v3487_v56  ;;  %v3477_v33 = vsel %vm1600_vm6, %v7497_v30, %v3476_v7  ;;  %v2449_v28 = vsel %vm1124_vm1, %v2448_v26, %v2444_v55 }
 0x345   : > { %4708 = vmatpush3.xpose.msk.msra.mxu1 %vm1628_vm11, %v3488_v11  ;;  %4738 = vmatprep.subr.mxu0 %v3488_v11  ;;  %v2454_v21 = vsel %vm1131_vm2, %v2453_v59, %v2449_v28 }
 0x346   : > { %v2473_v3 = vsel %vm1131_vm2, %v2472_v38, %v2468_v23  ;;  %4739 = vmatpush3.msra.mxu0 %v3488_v11  ;;  %4709 = vmatprep.subr.mxu1 %v8597_v39  ;;  %v2771_v51 = vpop.permute.xlu0 %2770  ;;  %v3098_v23 = vrot.slane %v7408_v20, %v5572_v34  ;;  %v2501_v20 = vrot.slane %v7468_v48, %v5572_v34 }
 0x347   : > { %v2478_v6 = vsel %vm1138_vm3, %v2477_v53, %v2473_v3  ;;  %v2374_v14 = vpop.permute.xlu1 %2373  ;;  %v3112_v52 = vrot.slane %v2771_v51, %v5592_v49 }
 0x348   : > { %v2486_v5 = vrot.slane %v2374_v14, %v5586_v60 }
 0x34a   : > { %v2487_v62 = vsel %vm1124_vm1, %v2486_v5, %v2482_v24  ;;  %v2786_v46 = vpop.permute.xlu0 %2785 }
 0x34b   : > { %v2756_v18 = vpop.permute.xlu1 %2755 }
 0x34c   : > { %v3088_v41 = vrot.slane %v2756_v18, %v5589_v61 }
 0x34e   : > { %v3089_v58 = vsel %vm1131_vm2, %v3088_v41, %v3084_v13  ;;  %v2392_v42 = vpop.permute.xlu0 %2391 }
 0x34f   : > { %v3094_v17 = vsel %vm1138_vm3, %v3093_v47, %v3089_v58  ;;  %v2765_v43 = vpop.permute.xlu1 %2764  ;;  %v2515_v2 = vrot.slane %v2392_v42, %v5592_v49 }
 0x350   : > { %v3478_v22 = vsel %vm1602_vm7, %v3094_v17, %v3477_v33  ;;  %v3102_v53 = vrot.slane %v2765_v43, %v5586_v60  ;;  %v3136_v17 = vrot.slane %v2786_v46, %v5572_v34 }
 0x352   : > { %v3103_v54 = vsel %vm1124_vm1, %v3102_v53, %v3098_v23  ;;  %v7626_v63 = vpop.permute.xlu0 %2406 }
 0x353   : > { %v2356_v29 = vpop.permute.xlu1 %2355  ;;  %v2539_v42 = vrot.slane %v7626_v63, %v5572_v34 }
 0x354   : > { %v2458_v36 = vrot.slane %v2356_v29, %v5592_v49 }
 0x356   : > { %v2459_v30 = vsel %vm1138_vm3, %v2458_v36, %v2454_v21  ;;  %v2783_v35 = vpop.permute.xlu0 %2782 }
 0x357   : > { %v2593_v12 = vsel %vm1596_vm4, %v2478_v6, %v2459_v30  ;;  %v2377_v56 = vpop.permute.xlu1 %2376  ;;  %v3131_v58 = vrot.slane %v2783_v35, %v5592_v49 }
 0x358   : > { %v2491_v10 = vrot.slane %v2377_v56, %v5589_v61 }
 0x35a   : > { %v2492_v38 = vsel %vm1131_vm2, %v2491_v10, %v2487_v62  ;;  %v2404_v45 = vpop.permute.xlu0 %2403 }
 0x35b   : > { %v2497_v50 = vsel %vm1138_vm3, %v2496_v15, %v2492_v38  ;;  %v2386_v11 = vpop.permute.xlu1 %2385  ;;  %v2520_v38 = vrot.slane %v7595_v27, %v5572_v34 }
 0x35c   : > { %v2594_v25 = vsel %vm1598_vm5, %v2497_v50, %v2593_v12  ;;  %v2505_v24 = vrot.slane %v2386_v11, %v5586_v60 }
 0x35e   : > { %v2506_v44 = vsel %vm1124_vm1, %v2505_v24, %v2501_v20  ;;  %v2419_v18 = vpop.permute.xlu0 %2418 }
 0x35f   : > { %v2768_v40 = vpop.permute.xlu1 %2767  ;;  %v2558_v53 = vrot.slane %v2419_v18, %v5572_v34 }
 0x360   : > { %v3107_v3 = vrot.slane %v2768_v40, %v5589_v61 }
 0x362   : > { %v3108_v8 = vsel %vm1131_vm2, %v3107_v3, %v3103_v54  ;;  %v2795_v33 = vpop.permute.xlu0 %2794  ;;  %v2534_v54 = vrot.slane %v2404_v45, %v5592_v49 }
 0x363   : > { %v3113_v6 = vsel %vm1138_vm3, %v3112_v52, %v3108_v8  ;;  %v2777_v14 = vpop.permute.xlu1 %2776  ;;  %v3150_v28 = vrot.slane %v2795_v33, %v5592_v49 }
 0x364   : > { %v3479_v16 = vsel %vm1604_vm8, %v3113_v6, %v3478_v22  ;;  %v3121_v31 = vrot.slane %v2777_v14, %v5586_v60 }
 0x366   : > { %v3122_v13 = vsel %vm1124_vm1, %v3121_v31, %v3117_v32  ;;  %v2425_v12 = vpop.permute.xlu0 %2424 }
 0x367   : > { %v2389_v0 = vpop.permute.xlu1 %2388  ;;  %v2567_v14 = vrot.slane %v2425_v12, %v5589_v61 }
 0x368   : > { %v2510_v5 = vrot.slane %v2389_v0, %v5589_v61 }
 0x36a   : > { %v2511_v1 = vsel %vm1131_vm2, %v2510_v5, %v2506_v44  ;;  %v2434_v15 = vpop.permute.xlu0 %2433 }
 0x36b   : > { %v2516_v37 = vsel %vm1138_vm3, %v2515_v2, %v2511_v1  ;;  %v2398_v9 = vpop.permute.xlu1 %2397 }
 0x36c   : > { %v7636_v19 = vsel %vm1600_vm6, %v2516_v37, %v2594_v25  ;;  %v2524_v10 = vrot.slane %v2398_v9, %v5586_v60 }
 0x36e   : > { %v2525_v23 = vsel %vm1124_vm1, %v2524_v10, %v2520_v38  ;;  %v2437_v24 = vpop.permute.xlu0 %2436 }
 0x36f   : > { %v2780_v62 = vpop.permute.xlu1 %2779  ;;  %v2586_v1 = vrot.slane %v2437_v24, %v5589_v61 }
 0x370   : > { %v3126_v41 = vrot.slane %v2780_v62, %v5589_v61 }
 0x372   : > { %v3127_v7 = vsel %vm1131_vm2, %v3126_v41, %v3122_v13 }
 0x373   : > { %v2789_v4 = vpop.permute.xlu1 %2788  ;;  %v3132_v55 = vsel %vm1138_vm3, %v3131_v58, %v3127_v7  ;;  %v8634_v58 = vld [vmem:[#allocation5_spill] sm:$0xff] }
 0x374   : > { %v3140_v26 = vrot.slane %v2789_v4, %v5586_v60  ;;  %v3480_v36 = vsel %vm1606_vm9, %v3132_v55, %v3479_v16  ;;  %v2581_v16 = vrot.slane %v2434_v15, %v5586_v60  ;;  %vm3607_vm6 = vcmp.eq.s32.totalorder %v8634_v58, 0 }
 0x376   : > { %v3141_v57 = vsel %vm1124_vm1, %v3140_v26, %v3136_v17 }
 0x377   : > { %v2401_v48 = vpop.permute.xlu1 %2400 }
 0x378   : > { %v2529_v46 = vrot.slane %v2401_v48, %v5589_v61 }
 0x37a   : > { %v2530_v3 = vsel %vm1131_vm2, %v2529_v46, %v2525_v23 }
 0x37b   : > { %v2410_v47 = vpop.permute.xlu1 %2409  ;;  %v2535_v0 = vsel %vm1138_vm3, %v2534_v54, %v2530_v3 }
 0x37c   : > { %v2543_v25 = vrot.slane %v2410_v47, %v5586_v60  ;;  %v2596_v9 = vsel %vm1602_vm7, %v2535_v0, %v7636_v19  ;;  %vm3635_vm7 = vcmp.eq.s32.totalorder %v8634_v58, 1 }
 0x37e   : > { %v2544_v20 = vsel %vm1124_vm1, %v2543_v25, %v2539_v42 }
 0x37f   : > { %v2792_v43 = vpop.permute.xlu1 %2791 }
 0x380   : > { %v3145_v22 = vrot.slane %v2792_v43, %v5589_v61 }
 0x382   : > { %v3146_v59 = vsel %vm1131_vm2, %v3145_v22, %v3141_v57 }
 0x383   : > { %v2413_v29 = vpop.permute.xlu1 %2412  ;;  %v3151_v51 = vsel %vm1138_vm3, %v3150_v28, %v3146_v59 }
 0x384   : > { %v3481_v21 = vsel %vm1608_vm10, %v3151_v51, %v3480_v36  ;;  %v2548_v40 = vrot.slane %v2413_v29, %v5589_v61 }
 0x385   : > { %4710 = vmatpush3.xpose.msk.msra.mxu1 %vm1628_vm11, %v3481_v21  ;;  %4740 = vmatprep.subr.mxu0 %v3481_v21 }
 0x386   : > { %4741 = vmatpush3.msra.mxu0 %v3481_v21  ;;  %4714 = vmatprep.subr.bf16.mxu1 %v8597_v39  ;;  %v2549_v5 = vsel %vm1131_vm2, %v2548_v40, %v2544_v20 }
 0x387   : > { %v2422_v30 = vpop.permute.xlu1 %2421  ;;  %4766 = vmatprep.subr.mxu0 %v8597_v39 }
 0x388   : > { %v2562_v50 = vrot.slane %v2422_v30, %v5586_v60 }
 0x38a   : > { %v2563_v8 = vsel %vm1124_vm1, %v2562_v50, %v2558_v53 }
 0x38b   : > { %v2416_v56 = vpop.permute.xlu1 %2415  ;;  %v2568_v44 = vsel %vm1131_vm2, %v2567_v14, %v2563_v8 }
 0x38c   : > { %v2553_v52 = vrot.slane %v2416_v56, %v5592_v49 }
 0x38f   : > { %v2431_v11 = vpop.permute.xlu1 %2430 }
 0x390   : > { %v2577_v27 = vrot.slane %v2431_v11, %v5572_v34  ;;  %v2554_v34 = vsel %vm1138_vm3, %v2553_v52, %v2549_v5 }
 0x391   : > { %v2597_v62 = vsel %vm1604_vm8, %v2554_v34, %v2596_v9 }
 0x392   : > { %v2582_v2 = vsel %vm1124_vm1, %v2581_v16, %v2577_v27 }
 0x393   : > { %v2428_v6 = vpop.permute.xlu1 %2427  ;;  %v2587_v45 = vsel %vm1131_vm2, %v2586_v1, %v2582_v2  ;;  %vm3585_vm2 = vcmask 203776  }
 0x394   : > { %v2572_v63 = vrot.slane %v2428_v6, %v5592_v49 }
 0x396   : > { %v2573_v37 = vsel %vm1138_vm3, %v2572_v63, %v2568_v44 }
 0x397   : > { %v2440_v60 = vpop.permute.xlu1 %2439  ;;  %v2598_v48 = vsel %vm1606_vm9, %v2573_v37, %v2597_v62 }
 0x398   : > { %v2591_v35 = vrot.slane %v2440_v60, %v5592_v49 }
 0x39a   : > { %v2592_v4 = vsel %vm1138_vm3, %v2591_v35, %v2587_v45 }
 0x39b   : > { %v7693_v18 = vsel %vm1608_vm10, %v2592_v4, %v2598_v48  ;;  %vm3663_vm10 = vcmp.eq.s32.totalorder %v8634_v58, 2 }
 0x39c   : > { %4712 = vmatmul.mubr.msk.f32.vlgmr.msra.gmra.mxu1 %vm1628_vm11, %v7693_v18 }
 0x39d   : > { %4730 = vmatprep.mubr.msk.bf16.mxu1 %vm4998_vm14, %v8597_v39 }
 0x45c   : > { %v3572_v61 = vpop.f32.mrf.mxu1 }
 0x45d   : > { %v7699_v19 = vsub.f32 1.0, %v3572_v61 }
 0x45e   : > { %v4713_v49 = vpop.f32.mrf.mxu1 }
 0x45f   : > { %v3577_v31 = vmax.f32 %v7699_v19, 0.0 }
 0x461   : > { %v3578_v41 = vmin.f32 %v3577_v31, 2.0 }
 0x463   : > { %v3579_v32 = vmul.f32 8388607.0, %v3578_v41 }
 0x465   : > { %v4801_v47 = vtrunc.f32 %v3579_v32 }
 0x467   : > { %v4802_v13 = vcvt.f32.s32 %v4801_v47 }
 0x469   : > { %vm3581_vm1 = vcmp.lt.s32.totalorder %v4802_v13, 16777214 }
 0x46a   : > { %v3582_v7 = vsel %vm3581_vm1, %v4802_v13, 16777214 }
 0x46b   : > { %v3583_v26 = vmul.u32 32, %v3582_v7 }
 0x46d   : > { %v3584_v33 = vadd.s32 %v3583_v26, %v8634_v58 }
 0x46f   : > { %v3586_v17 = vsel %vm3585_vm2, %v3584_v33, 2147483647 }
 0x470   : > { %v3588_v43 = vshra.s32 %v3586_v17, 16  ;;  %v3587_v22 = vand.u32 65535, %v3586_v17  ;;  %v7759_v17 = vld [vmem:[%s8268_s2] ss:$0 sm:$0xff] }
 0x472   : > { %v3590_v55 = vcvt.s32.f32 %v3588_v43  ;;  %v3589_v57 = vcvt.s32.f32 %v3587_v22  ;;  %v8641_v43 = vld [vmem:[#allocation6_spill] sm:$0xff] }
 0x473   : > { %v2247_v22 = vadd.s32 16, %v8641_v43  ;;  %vm2265_vm12 = vcmp.eq.s32.totalorder %v8641_v43, %v7759_v17 }
 0x474   : > { %3591 = vmin.xlane.f32.xlu0 %v3590_v55 }
 0x475   : > { %vm2267_vm1 = vcmp.eq.s32.totalorder %v2247_v22, %v7759_v17 }
 0x4fd   : > { %v3592_v28 = vpop.xlane.xlu0 %3591 }
 0x4fe   : > { %vm3593_vm3 = vcmp.eq.f32.partialorder %v3590_v55, %v3592_v28  ;;  %v3598_v29 = vcvt.f32.s32 %v3592_v28  ;;  %v2246_v55 = vadd.s32 8, %v8641_v43  ;;  %v2248_v28 = vadd.s32 24, %v8641_v43 }
 0x4ff   : > { %v3594_v59 = vsel %vm3593_vm3, %v3589_v57, inf  ;;  %v7767_v57 = vsel %vm2265_vm12, 1.0, %v8597_v39 }
 0x500   : > { %3595 = vmin.xlane.f32.xlu1 %v3594_v59  ;;  %v3599_v36 = vshll.u32 %v3598_v29, 16  ;;  %vm2266_vm13 = vcmp.eq.s32.totalorder %v2246_v55, %v7759_v17  ;;  %vm2268_vm3 = vcmp.eq.s32.totalorder %v2248_v28, %v7759_v17  ;;  %4742 = vmatprep.mubr.msk.f32.mxu0 %vm3585_vm2, %v7767_v57  ;;  %v7778_v29 = vsel %vm2267_vm1, 1.0, %v8597_v39 }
 0x501   : > { %v7775_v59 = vsel %vm2266_vm13, 1.0, %v8597_v39 }
 0x502   : > { %4743 = vmatmul.mubr.msk.f32.vlgmr.msra.gmra.mxu0 %vm3585_vm2, %v7775_v59 }
 0x503   : > { %4745 = vmatprep.mubr.msk.f32.mxu0 %vm3585_vm2, %v7778_v29 }
 0x589   : > { %v3596_v51 = vpop.xlane.xlu1 %3595 }
 0x58a   : > { %v3597_v21 = vcvt.f32.s32 %v3596_v51  ;;  %v7785_v51 = vsel %vm2268_vm3, 1.0, %v8597_v39 }
 0x58b   : > { %4746 = vmatmul.mubr.msk.f32.gmra.mxu0 %vm3585_vm2, %v7785_v51 }
 0x58c   : > { %v3600_v30 = vadd.s32 %v3599_v36, %v3597_v21  ;;  %v2249_v36 = vadd.s32 32, %v8641_v43  ;;  %v2250_v21 = vadd.s32 40, %v8641_v43 }
 0x58e   : > { %v3601_v12 = vand.u32 31, %v3600_v30  ;;  %v2251_v30 = vadd.s32 48, %v8641_v43 }
 0x590   : > { %vm7705_vm4 = vcmp.eq.s32.totalorder %v8634_v58, %v3601_v12  ;;  %v3609_v54 = vsel %vm3607_vm6, %v3601_v12, 0  ;;  %v2252_v12 = vadd.s32 56, %v8641_v43 }
 0x591   : > { %v3613_v10 = vsel %vm7705_vm4, 2147483647, %v3584_v33  ;;  %v4609_v14 = vsel %vm7705_vm4, 1.0, %v8597_v39 }
 0x592   : > { %v3614_v15 = vsel %vm3585_vm2, %v3613_v10, 2147483647  ;;  %vm2272_vm12 = vcmp.eq.s32.totalorder %v2252_v12, %v7759_v17 }
 0x593   : > { %v3616_v46 = vshra.s32 %v3614_v15, 16  ;;  %v3615_v50 = vand.u32 65535, %v3614_v15 }
 0x595   : > { %v3618_v38 = vcvt.s32.f32 %v3616_v46  ;;  %v3617_v25 = vcvt.s32.f32 %v3615_v50  ;;  %v2254_v50 = vadd.s32 72, %v8641_v43 }
 0x597   : > { %3619 = vmin.xlane.f32.xlu0 %v3618_v38  ;;  %vm2274_vm1 = vcmp.eq.s32.totalorder %v2254_v50, %v7759_v17  ;;  %v3727_v50 = vpack.c.bf16 %v7785_v51, %v7778_v29 }
 0x620   : > { %v3620_v11 = vpop.xlane.xlu0 %3619 }
 0x621   : > { %vm3621_vm5 = vcmp.eq.f32.partialorder %v3618_v38, %v3620_v11  ;;  %v3626_v23 = vcvt.f32.s32 %v3620_v11  ;;  %v2255_v11 = vadd.s32 80, %v8641_v43 }
 0x622   : > { %v3622_v53 = vsel %vm3621_vm5, %v3617_v25, inf  ;;  %vm2269_vm5 = vcmp.eq.s32.totalorder %v2249_v36, %v7759_v17  ;;  %v7817_v25 = vsel %vm2272_vm12, 1.0, %v8597_v39 }
 0x623   : > { %3623 = vmin.xlane.f32.xlu0 %v3622_v53  ;;  %v3627_v42 = vshll.u32 %v3626_v23, 16  ;;  %v7798_v15 = vsel %vm2269_vm5, 1.0, %v8597_v39  ;;  %v2256_v23 = vadd.s32 88, %v8641_v43  ;;  %vm2275_vm3 = vcmp.eq.s32.totalorder %v2255_v11, %v7759_v17 }
 0x624   : > { %4748 = vmatprep.mubr.msk.f32.mxu0 %vm3585_vm2, %v7798_v15  ;;  %v3741_v11 = vsel %vm3585_vm2, %v3727_v50, 0 }
 0x625   : > { %vm2276_vm5 = vcmp.eq.s32.totalorder %v2256_v23, %v7759_v17 }
 0x6ac   : > { %v3624_v40 = vpop.xlane.xlu0 %3623 }
 0x6ad   : > { %v3625_v3 = vcvt.f32.s32 %v3624_v40  ;;  %v2257_v40 = vadd.s32 96, %v8641_v43 }
 0x6af   : > { %v3628_v52 = vadd.s32 %v3627_v42, %v3625_v3  ;;  %v7831_v42 = vsel %vm2274_vm1, 1.0, %v8597_v39  ;;  %v7834_v3 = vsel %vm2275_vm3, 1.0, %v8597_v39  ;;  %vm8382_vm1 = vcmp.eq.s32.totalorder %v8634_v58, 3 }
 0x6b1   : > { %v3629_v27 = vand.u32 31, %v3628_v52  ;;  %v2258_v52 = vadd.s32 104, %v8641_v43 }
 0x6b3   : > { %vm7717_vm8 = vcmp.eq.s32.totalorder %v8634_v58, %v3629_v27  ;;  %v3637_v6 = vsel %vm3635_vm7, %v3629_v27, %v3609_v54  ;;  %v2259_v27 = vadd.s32 112, %v8641_v43  ;;  %v4599_v54 = vsel %vm2276_vm5, 1.0, %v8597_v39 }
 0x6b4   : > { %v4610_v16 = vsel %vm7717_vm8, 1.0, %v8597_v39  ;;  %v3641_v24 = vsel %vm7717_vm8, 2147483647, %v3613_v10  ;;  %v2253_v10 = vadd.s32 64, %v8641_v43  ;;  %v3731_v55 = vpack.c.bf16 %v4599_v54, %v7834_v3 }
 0x6b5   : > { %v3640_v20 = vadd.f32 %v4610_v16, %v4609_v14  ;;  %v3642_v63 = vsel %vm3585_vm2, %v3641_v24, 2147483647  ;;  %v2260_v14 = vadd.s32 120, %v8641_v43  ;;  %vm2279_vm12 = vcmp.eq.s32.totalorder %v2259_v27, %v7759_v17 }
 0x6b6   : > { %v3644_v0 = vshra.s32 %v3642_v63, 16  ;;  %v3643_v34 = vand.u32 65535, %v3642_v63  ;;  %vm2273_vm13 = vcmp.eq.s32.totalorder %v2253_v10, %v7759_v17  ;;  %v3753_v22 = vsel %vm3585_vm2, %v3731_v55, 0 }
 0x6b7   : > { %v7820_v53 = vsel %vm2273_vm13, 1.0, %v8597_v39  ;;  %vm2280_vm13 = vcmp.eq.s32.totalorder %v2260_v14, %v7759_v17  ;;  %v4032_v55 = vsel %vm3585_vm2, %v7798_v15, 0.0  ;;  %vm8381_vm5 = vcmp.eq.s32.totalorder %v8634_v58, 4 }
 0x6b8   : > { %v3646_v5 = vcvt.s32.f32 %v3644_v0  ;;  %v3645_v44 = vcvt.s32.f32 %v3643_v34  ;;  %v3730_v28 = vpack.c.bf16 %v7831_v42, %v7820_v53 }
 0x6ba   : > { %3647 = vmin.xlane.f32.xlu1 %v3646_v5  ;;  %v3750_v36 = vsel %vm3585_vm2, %v3730_v28, 0 }
 0x743   : > { %v3648_v2 = vpop.xlane.xlu1 %3647 }
 0x744   : > { %vm3649_vm9 = vcmp.eq.f32.partialorder %v3646_v5, %v3648_v2  ;;  %v3654_v37 = vcvt.f32.s32 %v3648_v2 }
 0x745   : > { %v3650_v1 = vsel %vm3649_vm9, %v3645_v44, inf  ;;  %vm2270_vm9 = vcmp.eq.s32.totalorder %v2250_v21, %v7759_v17 }
 0x746   : > { %3651 = vmin.xlane.f32.xlu0 %v3650_v1  ;;  %v3655_v9 = vshll.u32 %v3654_v37, 16  ;;  %v7803_v46 = vsel %vm2270_vm9, 1.0, %v8597_v39  ;;  %vm2277_vm9 = vcmp.eq.s32.totalorder %v2257_v40, %v7759_v17 }
 0x747   : > { %4749 = vmatmul.mubr.msk.f32.gmra.mxu0 %vm3585_vm2, %v7803_v46  ;;  %v3728_v12 = vpack.c.bf16 %v7803_v46, %v7798_v15 }
 0x749   : > { %v3744_v10 = vsel %vm3585_vm2, %v3728_v12, 0  ;;  %v4026_v12 = vsel %vm3585_vm2, %v7778_v29, 0.0 }
 0x7cf   : > { %v3652_v60 = vpop.xlane.xlu0 %3651 }
 0x7d0   : > { %v3653_v35 = vcvt.f32.s32 %v3652_v60 }
 0x7d2   : > { %v3656_v62 = vadd.s32 %v3655_v9, %v3653_v35 }
 0x7d4   : > { %v3657_v45 = vand.u32 31, %v3656_v62 }
 0x7d6   : > { %vm7734_vm15 = vcmp.eq.s32.totalorder %v8634_v58, %v3657_v45  ;;  %v7740_v48 = vsel %vm3663_vm10, %v3657_v45, %v3637_v6  ;;  %v7846_v6 = vsel %vm2277_vm9, 1.0, %v8597_v39 }
 0x7d7   : > { %v4611_v61 = vsel %vm7734_vm15, 1.0, %v8597_v39  ;;  %v7747_v49 = vsel %vm7734_vm15, 2147483647, %v3641_v24  ;;  %v7856_v24 = vsel %vm2279_vm12, 1.0, %v8597_v39 }
 0x7d8   : > { %v7749_v31 = vadd.f32 %v4611_v61, %v3640_v20  ;;  %v3670_v41 = vsel %vm3585_vm2, %v7747_v49, 2147483647  ;;  %v4603_v20 = vsel %vm2280_vm13, 1.0, %v8597_v39 }
 0x7d9   : > { %v3672_v32 = vshra.s32 %v3670_v41, 16  ;;  %v3671_v13 = vand.u32 65535, %v3670_v41  ;;  %v4065_v41 = vsel %vm3585_vm2, %v4603_v20, 0.0 }
 0x7db   : > { %v3674_v47 = vcvt.s32.f32 %v3672_v32  ;;  %v3673_v26 = vcvt.s32.f32 %v3671_v13  ;;  %v4053_v32 = vsel %vm3585_vm2, %v4599_v54, 0.0  ;;  %v4029_v13 = vsel %vm3585_vm2, %v7785_v51, 0.0 }
 0x7dd   : > { %3675 = vmin.xlane.f32.xlu1 %v3674_v47 }
 0x866   : > { %v7753_v7 = vpop.xlane.xlu1 %3675 }
 0x867   : > { %vm3677_vm0 = vcmp.eq.f32.partialorder %v3674_v47, %v7753_v7  ;;  %v3682_v63 = vcvt.f32.s32 %v7753_v7  ;;  %v4035_v47 = vsel %vm3585_vm2, %v7803_v46, 0.0  ;;  %v4023_v7 = vsel %vm3585_vm2, %v7775_v59, 0.0 }
 0x868   : > { %v3678_v33 = vsel %vm3677_vm0, %v3673_v26, inf  ;;  %vm2271_vm0 = vcmp.eq.s32.totalorder %v2251_v30, %v7759_v17  ;;  %v3733_v26 = vpack.c.bf16 %v4603_v20, %v7856_v24 }
 0x869   : > { %3679 = vmin.xlane.f32.xlu0 %v3678_v33  ;;  %v7806_v38 = vsel %vm2271_vm0, 1.0, %v8597_v39  ;;  %vm2278_vm0 = vcmp.eq.s32.totalorder %v2258_v52, %v7759_v17  ;;  %v3683_v5 = vshll.u32 %v3682_v63, 16 }
 0x86a   : > { %4751 = vmatprep.mubr.msk.f32.mxu0 %vm3585_vm2, %v7806_v38  ;;  %v4601_v16 = vsel %vm2278_vm0, 1.0, %v8597_v39  ;;  %v3759_v33 = vsel %vm3585_vm2, %v3733_v26, 0  ;;  %v3729_v21 = vpack.c.bf16 %v7817_v25, %v7806_v38 }
 0x86b   : > { %4752 = vmatmul.mubr.msk.f32.gmra.mxu0 %vm3585_vm2, %v7817_v25  ;;  %4715 = vmatpush3.bf16.xpose.msra.mxu1 %v3759_v33  ;;  %v3732_v17 = vpack.c.bf16 %v4601_v16, %v7846_v6 }
 0x86c   : > { %4754 = vmatprep.mubr.msk.f32.mxu0 %vm3585_vm2, %v7820_v53  ;;  %4716 = vmatprep.subr.bf16.mxu1 %v8597_v39  ;;  %v3747_v30 = vsel %vm3585_vm2, %v3729_v21, 0 }
 0x86d   : > { %v3756_v43 = vsel %vm3585_vm2, %v3732_v17, 0 }
 0x86f   : > { %4755 = vmatmul.mubr.msk.f32.gmra.mxu0 %vm3585_vm2, %v7831_v42 }
 0x870   : > { %4757 = vmatprep.mubr.msk.f32.mxu0 %vm3585_vm2, %v7834_v3 }
 0x873   : > { %4758 = vmatmul.mubr.msk.f32.gmra.mxu0 %vm3585_vm2, %v4599_v54  ;;  %4717 = vmatpush3.bf16.xpose.msra.mxu1 %v3756_v43 }
 0x874   : > { %4760 = vmatprep.mubr.msk.f32.mxu0 %vm3585_vm2, %v7846_v6  ;;  %4718 = vmatprep.subr.bf16.mxu1 %v8597_v39 }
 0x877   : > { %4761 = vmatmul.mubr.msk.f32.gmra.mxu0 %vm3585_vm2, %v4601_v16 }
 0x878   : > { %4763 = vmatprep.mubr.msk.f32.mxu0 %vm3585_vm2, %v7856_v24 }
 0x87b   : > { %4764 = vmatmul.mubr.msk.f32.gmra.mxu0 %vm3585_vm2, %v4603_v20  ;;  %4719 = vmatpush3.bf16.xpose.msra.mxu1 %v3753_v22 }
 0x87c   : > { %4798 = vmatprep.mubr.msk.f32.mxu0 %vm4998_vm14, %v8597_v39  ;;  %4720 = vmatprep.subr.bf16.mxu1 %v8597_v39 }
 0x883   : > { %4721 = vmatpush3.bf16.xpose.msra.mxu1 %v3750_v36 }
 0x884   : > { %4722 = vmatprep.subr.bf16.mxu1 %v8597_v39 }
 0x88b   : > { %4723 = vmatpush3.bf16.xpose.msra.mxu1 %v3747_v30 }
 0x88c   : > { %4724 = vmatprep.subr.bf16.mxu1 %v8597_v39 }
 0x893   : > { %4725 = vmatpush3.bf16.xpose.msra.mxu1 %v3744_v10 }
 0x894   : > { %4726 = vmatprep.subr.bf16.mxu1 %v8597_v39 }
 0x89b   : > { %4727 = vmatpush3.bf16.xpose.msra.mxu1 %v3741_v11 }
 0x89c   : > { %4728 = vmatprep.subr.bf16.mxu1 %v8597_v39 }
 0x8f2   : > { %v3680_v0 = vpop.xlane.xlu0 %3679 }
 0x8f3   : > { %v3681_v34 = vcvt.f32.s32 %v3680_v0 }
 0x8f5   : > { %v3684_v2 = vadd.s32 %v3683_v5, %v3681_v34  ;;  %v4062_v34 = vsel %vm3585_vm2, %v7856_v24, 0.0 }
 0x8f7   : > { %v3685_v44 = vand.u32 31, %v3684_v2 }
 0x8f9   : > { %vm7869_vm3 = vcmp.eq.s32.totalorder %v8634_v58, %v3685_v44  ;;  %v7876_v37 = vsel %vm8382_vm1, %v3685_v44, %v7740_v48  ;;  %v4059_v48 = vsel %vm3585_vm2, %v4601_v16, 0.0 }
 0x8fa   : > { %v4612_v60 = vsel %vm7869_vm3, 1.0, %v8597_v39  ;;  %v3697_v9 = vsel %vm7869_vm3, 2147483647, %v7747_v49  ;;  %v4047_v49 = vsel %vm3585_vm2, %v7831_v42, 0.0 }
 0x8fb   : > { %v7885_v35 = vadd.f32 %v4612_v60, %v7749_v31  ;;  %v3698_v62 = vsel %vm3585_vm2, %v3697_v9, 2147483647  ;;  %v4041_v31 = vsel %vm3585_vm2, %v7817_v25, 0.0  ;;  %v7926_v25 = vpop.f32.mrf.mxu0  ;;  %v4056_v9 = vsel %vm3585_vm2, %v7846_v6, 0.0 }
 0x8fc   : > { %v3700_v45 = vshra.s32 %v3698_v62, 16  ;;  %v3699_v14 = vand.u32 65535, %v3698_v62 }
 0x8fd   : > { %v7928_v23 = vpop.f32.mrf.mxu0 }
 0x8fe   : > { %v3702_v61 = vcvt.s32.f32 %v3700_v45  ;;  %v3701_v63 = vcvt.s32.f32 %v3699_v14 }
 0x8ff   : > { %v7930_v40 = vpop.f32.mrf.mxu0 }
 0x900   : > { %3703 = vmin.xlane.f32.xlu1 %v3702_v61 }
 0x901   : > { %v7932_v46 = vpop.f32.mrf.mxu0 }
 0x903   : > { %v7934_v42 = vpop.f32.mrf.mxu0 }
 0x904   : > { %4066 = vadd.xlane.f32.xlu1 %v4065_v41 }
 0x905   : > { %v7936_v52 = vpop.f32.mrf.mxu0 }
 0x908   : > { %4060 = vadd.xlane.f32.xlu1 %v4059_v48 }
 0x90c   : > { %4054 = vadd.xlane.f32.xlu1 %v4053_v32 }
 0x910   : > { %4048 = vadd.xlane.f32.xlu1 %v4047_v49  ;;  %v4044_v49 = vsel %vm3585_vm2, %v7820_v53, 0.0  ;;  %v3726_v53 = vpack.c.bf16 %v7775_v59, %v7767_v57 }
 0x912   : > { %v3738_v21 = vsel %vm3585_vm2, %v3726_v53, 0 }
 0x913   : > { %4729 = vmatpush3.bf16.xpose.msra.mxu1 %v3738_v21 }
 0x914   : > { %4042 = vadd.xlane.f32.xlu1 %v4041_v31 }
 0x918   : > { %4036 = vadd.xlane.f32.xlu1 %v4035_v47 }
 0x91c   : > { %4030 = vadd.xlane.f32.xlu1 %v4029_v13 }
 0x920   : > { %4024 = vadd.xlane.f32.xlu1 %v4023_v7  ;;  %v4038_v7 = vsel %vm3585_vm2, %v7806_v38, 0.0 }
 0x92b   : > { %v7938_v27 = vpop.f32.mrf.mxu0 }
 0x92d   : > { %v7940_v51 = vpop.f32.mrf.mxu0 }
 0x92f   : > { %v7942_v54 = vpop.f32.mrf.mxu0 }
 0x931   : > { %v7944_v16 = vpop.f32.mrf.mxu0 }
 0x933   : > { %v4759_v5 = vpop.f32.mrf.mxu0 }
 0x935   : > { %v7951_v60 = vpop.f32.mrf.mxu0 }
 0x937   : > { %v4762_v41 = vpop.f32.mrf.mxu0 }
 0x939   : > { %v7957_v24 = vpop.f32.mrf.mxu0 }
 0x93b   : > { %v4765_v6 = vpop.f32.mrf.mxu0 }
 0x989   : > { %v7946_v20 = vpop.xlane.xlu1 %3703 }
 0x98a   : > { %vm3705_vm14 = vcmp.eq.f32.partialorder %v3702_v61, %v7946_v20  ;;  %v4050_v61 = vsel %vm3585_vm2, %v7834_v3, 0.0 }
 0x98b   : > { %v3706_v0 = vsel %vm3705_vm14, %v3701_v63, inf }
 0x98c   : > { %3707 = vmin.xlane.f32.xlu0 %v3706_v0  ;;  %v4020_v0 = vsel %vm3585_vm2, %v7767_v57, 0.0 }
 0x98d   : > { %v4067_v2 = vpop.xlane.xlu1 %4066 }
 0x98e   : > { %v4083_v44 = vmax.f32 %v4067_v2, 1.0 }
 0x990   : > { %4063 = vadd.xlane.f32.xlu0 %v4062_v34  ;;  %4892 = vrcp.f32 %v4083_v44 }
 0x991   : > { %v4061_v62 = vpop.xlane.xlu1 %4060 }
 0x992   : > { %v4081_v45 = vmax.f32 %v4061_v62, 1.0 }
 0x994   : > { %4057 = vadd.xlane.f32.xlu0 %v4056_v9  ;;  %4894 = vrcp.f32 %v4081_v45 }
 0x995   : > { %v4055_v48 = vpop.xlane.xlu1 %4054 }
 0x996   : > { %v4079_v32 = vmax.f32 %v4055_v48, 1.0 }
 0x998   : > { %4051 = vadd.xlane.f32.xlu0 %v4050_v61  ;;  %4896 = vrcp.f32 %v4079_v32 }
 0x999   : > { %v4049_v31 = vpop.xlane.xlu1 %4048 }
 0x99a   : > { %v4077_v47 = vmax.f32 %v4049_v31, 1.0 }
 0x99c   : > { %4045 = vadd.xlane.f32.xlu0 %v4044_v49  ;;  %4898 = vrcp.f32 %v4077_v47 }
 0x99d   : > { %v4893_v13 = vpop.eup %4892  ;;  %v4043_v26 = vpop.xlane.xlu1 %4042 }
 0x99e   : > { %v7963_v3 = vmul.f32 %v4893_v13, %v4765_v6  ;;  %v4075_v33 = vmax.f32 %v4043_v26, 1.0 }
 0x9a0   : > { %4039 = vadd.xlane.f32.xlu0 %v4038_v7  ;;  %v4131_v17 = vmul.f32 %v7963_v3, %v7963_v3  ;;  %4900 = vrcp.f32 %v4075_v33 }
 0x9a1   : > { %v4895_v43 = vpop.eup %4894  ;;  %v4037_v22 = vpop.xlane.xlu1 %4036 }
 0x9a2   : > { %v7971_v28 = vmul.f32 %v4895_v43, %v4762_v41  ;;  %v4073_v38 = vmax.f32 %v4037_v22, 1.0  ;;  %v4177_v36 = vsel %vm1628_vm11, %v4131_v17, 0.0 }
 0x9a3   : > { %4178 = vadd.xlane.f32.xlu1 %v4177_v36 }
 0x9a4   : > { %4033 = vadd.xlane.f32.xlu0 %v4032_v55  ;;  %v4129_v30 = vmul.f32 %v7971_v28, %v7971_v28  ;;  %4902 = vrcp.f32 %v4073_v38 }
 0x9a5   : > { %v4897_v59 = vpop.eup %4896  ;;  %v4031_v15 = vpop.xlane.xlu1 %4030 }
 0x9a6   : > { %v4071_v10 = vmax.f32 %v4031_v15, 1.0  ;;  %v4171_v50 = vsel %vm1628_vm11, %v4129_v30, 0.0  ;;  %v7980_v11 = vmul.f32 %v4897_v59, %v4759_v5 }
 0x9a7   : > { %4172 = vadd.xlane.f32.xlu1 %v4171_v50 }
 0x9a8   : > { %4027 = vadd.xlane.f32.xlu0 %v4026_v12  ;;  %4904 = vrcp.f32 %v4071_v10  ;;  %v4127_v14 = vmul.f32 %v7980_v11, %v7980_v11 }
 0x9a9   : > { %v4899_v63 = vpop.eup %4898  ;;  %v4025_v34 = vpop.xlane.xlu1 %4024 }
 0x9aa   : > { %v4069_v2 = vmax.f32 %v4025_v34, 1.0  ;;  %v4165_v29 = vsel %vm1628_vm11, %v4127_v14, 0.0  ;;  %v7988_v44 = vmul.f32 %v4899_v63, %v7942_v54  ;;  %v4011_v14 = vpop.f32.mrf.mxu0 }
 0x9ab   : > { %4166 = vadd.xlane.f32.xlu1 %v4165_v29 }
 0x9ac   : > { %4021 = vadd.xlane.f32.xlu0 %v4020_v0  ;;  %4906 = vrcp.f32 %v4069_v2  ;;  %v4125_v5 = vmul.f32 %v7988_v44, %v7988_v44 }
 0x9ad   : > { %v4901_v9 = vpop.eup %4900 }
 0x9ae   : > { %v4159_v62 = vsel %vm1628_vm11, %v4125_v5, 0.0  ;;  %v7994_v45 = vmul.f32 %v4901_v9, %v7938_v27 }
 0x9af   : > { %4160 = vadd.xlane.f32.xlu1 %v4159_v62 }
 0x9b0   : > { %v4123_v57 = vmul.f32 %v7994_v45, %v7994_v45 }
 0x9b1   : > { %v4903_v41 = vpop.eup %4902 }
 0x9b2   : > { %v4153_v54 = vsel %vm1628_vm11, %v4123_v57, 0.0  ;;  %v8000_v61 = vmul.f32 %v4903_v41, %v7934_v42 }
 0x9b3   : > { %4154 = vadd.xlane.f32.xlu1 %v4153_v54 }
 0x9b4   : > { %v4121_v48 = vmul.f32 %v8000_v61, %v8000_v61 }
 0x9b5   : > { %v4905_v32 = vpop.eup %4904 }
 0x9b6   : > { %v4147_v49 = vsel %vm1628_vm11, %v4121_v48, 0.0  ;;  %v8006_v27 = vmul.f32 %v4905_v32, %v7930_v40  ;;  %v3710_v40 = vcvt.f32.s32 %v7946_v20 }
 0x9b7   : > { %4148 = vadd.xlane.f32.xlu1 %v4147_v49 }
 0x9b8   : > { %v4119_v31 = vmul.f32 %v8006_v27, %v8006_v27  ;;  %v3711_v33 = vshll.u32 %v3710_v40, 16 }
 0x9b9   : > { %v4907_v47 = vpop.eup %4906 }
 0x9ba   : > { %v4141_v6 = vsel %vm1628_vm11, %v4119_v31, 0.0  ;;  %v8012_v42 = vmul.f32 %v4907_v47, %v7926_v25 }
 0x9bb   : > { %4142 = vadd.xlane.f32.xlu1 %v4141_v6 }
 0x9bc   : > { %v4117_v13 = vmul.f32 %v8012_v42, %v8012_v42 }
 0x9be   : > { %v4135_v7 = vsel %vm1628_vm11, %v4117_v13, 0.0 }
 0x9bf   : > { %4136 = vadd.xlane.f32.xlu1 %v4135_v7 }
 0xa15   : > { %v3708_v26 = vpop.xlane.xlu0 %3707 }
 0xa16   : > { %v3709_v17 = vcvt.f32.s32 %v3708_v26 }
 0xa18   : > { %v3712_v53 = vadd.s32 %v3711_v33, %v3709_v17 }
 0xa19   : > { %v4064_v43 = vpop.xlane.xlu0 %4063 }
 0xa1a   : > { %v3713_v55 = vand.u32 31, %v3712_v53  ;;  %v4082_v22 = vmax.f32 %v4064_v43, 1.0 }
 0xa1c   : > { %vm8020_vm9 = vcmp.eq.s32.totalorder %v8634_v58, %v3713_v55  ;;  %4908 = vrcp.f32 %v4082_v22  ;;  %v8027_v38 = vsel %vm8381_vm5, %v3713_v55, %v7876_v37 }
 0xa1d   : > { %v4613_v20 = vsel %vm8020_vm9, 1.0, %v8597_v39  ;;  %v4058_v36 = vpop.xlane.xlu0 %4057 }
 0xa1e   : > { %v3724_v21 = vadd.f32 %v4613_v20, %v7885_v35  ;;  %v4080_v30 = vmax.f32 %v4058_v36, 1.0 }
 0xa20   : > { %v3725_v59 = vpack.c.bf16 %v3724_v21, %v3724_v21  ;;  %4910 = vrcp.f32 %v4080_v30 }
 0xa21   : > { %v4052_v12 = vpop.xlane.xlu0 %4051 }
 0xa22   : > { %v4078_v15 = vmax.f32 %v4052_v12, 1.0  ;;  %4731 = vmatmul.mubr.msk.bf16.vlgmr.msra.gmra.mxu1 %vm3585_vm2, %v3725_v59 }
 0xa24   : > { %4912 = vrcp.f32 %v4078_v15 }
 0xa25   : > { %v4046_v10 = vpop.xlane.xlu0 %4045 }
 0xa26   : > { %v4076_v50 = vmax.f32 %v4046_v10, 1.0 }
 0xa28   : > { %4914 = vrcp.f32 %v4076_v50 }
 0xa29   : > { %v4909_v37 = vpop.eup %4908  ;;  %v4040_v63 = vpop.xlane.xlu0 %4039 }
 0xa2a   : > { %v8034_v0 = vmul.f32 %v4909_v37, %v4011_v14  ;;  %v4074_v34 = vmax.f32 %v4040_v63, 1.0 }
 0xa2c   : > { %v4130_v35 = vmul.f32 %v8034_v0, %v8034_v0  ;;  %4916 = vrcp.f32 %v4074_v34  ;;  %v4179_v2 = vpop.xlane.xlu1 %4178 }
 0xa2d   : > { %v4911_v29 = vpop.eup %4910  ;;  %v4034_v5 = vpop.xlane.xlu0 %4033  ;;  %4918 = vrsqrt.f32 %v4179_v2  ;;  %vm4287_vm0 = vcmp.eq.f32.partialorder %v4179_v2, inf  ;;  %v4290_v43 = vand.u32 2147483648, %v4179_v2  ;;  %vm4289_vm12 = vcmp.eq.f32.partialorder %v4179_v2, 0.0 }
 0xa2e   : > { %v4072_v9 = vmax.f32 %v4034_v5, 1.0  ;;  %v4174_v62 = vsel %vm1628_vm11, %v4130_v35, 0.0  ;;  %v8040_v57 = vmul.f32 %v4911_v29, %v7957_v24 }
 0xa2f   : > { %4175 = vadd.xlane.f32.xlu0 %v4174_v62 }
 0xa30   : > { %4920 = vrcp.f32 %v4072_v9  ;;  %v4128_v41 = vmul.f32 %v8040_v57, %v8040_v57 }
 0xa31   : > { %v4913_v54 = vpop.eup %4912  ;;  %v4028_v48 = vpop.xlane.xlu0 %4027 }
 0xa32   : > { %v4070_v32 = vmax.f32 %v4028_v48, 1.0  ;;  %v4168_v49 = vsel %vm1628_vm11, %v4128_v41, 0.0  ;;  %v8046_v31 = vmul.f32 %v4913_v54, %v7951_v60 }
 0xa33   : > { %4169 = vadd.xlane.f32.xlu0 %v4168_v49 }
 0xa34   : > { %4922 = vrcp.f32 %v4070_v32  ;;  %v4126_v47 = vmul.f32 %v8046_v31, %v8046_v31 }
 0xa35   : > { %v4915_v24 = vpop.eup %4914  ;;  %v4022_v6 = vpop.xlane.xlu0 %4021 }
 0xa36   : > { %v4068_v13 = vmax.f32 %v4022_v6, 1.0  ;;  %v4162_v7 = vsel %vm1628_vm11, %v4126_v47, 0.0  ;;  %v8052_v40 = vmul.f32 %v4915_v24, %v7944_v16 }
 0xa37   : > { %4163 = vadd.xlane.f32.xlu0 %v4162_v7 }
 0xa38   : > { %4924 = vrcp.f32 %v4068_v13  ;;  %v4124_v26 = vmul.f32 %v8052_v40, %v8052_v40 }
 0xa39   : > { %v4917_v60 = vpop.eup %4916 }
 0xa3a   : > { %v4919_v33 = vpop.eup %4918  ;;  %v4156_v17 = vsel %vm1628_vm11, %v4124_v26, 0.0  ;;  %v8058_v53 = vmul.f32 %v4917_v60, %v7940_v51 }
 0xa3b   : > { %4157 = vadd.xlane.f32.xlu0 %v4156_v17  ;;  %v4286_v55 = vmul.f32 %v4919_v33, %v4179_v2 }
 0xa3c   : > { %v4122_v16 = vmul.f32 %v8058_v53, %v8058_v53 }
 0xa3d   : > { %v4921_v22 = vpop.eup %4920  ;;  %v4288_v20 = vsel %vm4287_vm0, %v4179_v2, %v4286_v55  ;;  %v4173_v2 = vpop.xlane.xlu1 %4172 }
 0xa3e   : > { %v4150_v36 = vsel %vm1628_vm11, %v4122_v16, 0.0  ;;  %v8064_v21 = vmul.f32 %v4921_v22, %v7936_v52  ;;  %v4291_v30 = vsel %vm4289_vm12, %v4290_v43, %v4288_v20  ;;  %vm4273_vm13 = vcmp.eq.f32.partialorder %v4173_v2, inf }
 0xa3f   : > { %4151 = vadd.xlane.f32.xlu0 %v4150_v36  ;;  %v4307_v59 = vmax.f32 %v4291_v30, 1e-12  ;;  %vm4275_vm14 = vcmp.eq.f32.partialorder %v4173_v2, 0.0 }
 0xa40   : > { %v4120_v51 = vmul.f32 %v8064_v21, %v8064_v21 }
 0xa41   : > { %v4923_v12 = vpop.eup %4922  ;;  %4926 = vrcp.f32 %v4307_v59  ;;  %v4167_v29 = vpop.xlane.xlu1 %4166 }
 0xa42   : > { %v4144_v15 = vsel %vm1628_vm11, %v4120_v51, 0.0  ;;  %v8070_v10 = vmul.f32 %v4923_v12, %v7932_v46  ;;  %4928 = vrsqrt.f32 %v4173_v2  ;;  %vm4259_vm5 = vcmp.eq.f32.partialorder %v4167_v29, inf }
 0xa43   : > { %4145 = vadd.xlane.f32.xlu0 %v4144_v15  ;;  %4930 = vrsqrt.f32 %v4167_v29  ;;  %v4262_v36 = vand.u32 2147483648, %v4167_v29 }
 0xa44   : > { %v4118_v50 = vmul.f32 %v8070_v10, %v8070_v10 }
 0xa45   : > { %v4925_v14 = vpop.eup %4924  ;;  %v8084_v62 = vpop.xlane.xlu1 %4160 }
 0xa46   : > { %v4138_v52 = vsel %vm1628_vm11, %v4118_v50, 0.0  ;;  %v8076_v37 = vmul.f32 %v4925_v14, %v7928_v23 }
 0xa47   : > { %4139 = vadd.xlane.f32.xlu0 %v4138_v52 }
 0xa48   : > { %v4116_v63 = vmul.f32 %v8076_v37, %v8076_v37 }
 0xa49   : > { %v8090_v7 = vpop.xlane.xlu1 %4154 }
 0xa4a   : > { %v4132_v34 = vsel %vm1628_vm11, %v4116_v63, 0.0 }
 0xa4b   : > { %4133 = vadd.xlane.f32.xlu0 %v4132_v34 }
 0xa4d   : > { %v8096_v63 = vpop.xlane.xlu1 %4148 }
 0xa4e   : > { %v4927_v35 = vpop.eup %4926 }
 0xa4f   : > { %v4339_v46 = vmul.f32 %v4927_v35, %v7963_v3  ;;  %v4929_v9 = vpop.eup %4928  ;;  %v4276_v3 = vand.u32 2147483648, %v4173_v2 }
 0xa50   : > { %v4272_v54 = vmul.f32 %v4929_v9, %v4173_v2  ;;  %v4931_v32 = vpop.eup %4930 }
 0xa51   : > { %4767 = vmatpush3.xpose.msk.msra.mxu0 %vm1628_vm11, %v4339_v46  ;;  %v4258_v26 = vmul.f32 %v4931_v32, %v4167_v29 }
 0xa52   : > { %4768 = vmatprep.subr.mxu0 %v8597_v39  ;;  %v4274_v49 = vsel %vm4273_vm13, %v4173_v2, %v4272_v54 }
 0xa53   : > { %v4277_v13 = vsel %vm4275_vm14, %v4276_v3, %v4274_v49  ;;  %v4260_v59 = vsel %vm4259_vm5, %v4167_v29, %v4258_v26  ;;  %vm4261_vm14 = vcmp.eq.f32.partialorder %v4167_v29, 0.0  ;;  %vm4245_vm5 = vcmp.eq.f32.partialorder %v8084_v62, inf }
 0xa54   : > { %v4305_v16 = vmax.f32 %v4277_v13, 1e-12  ;;  %v4263_v52 = vsel %vm4261_vm14, %v4262_v36, %v4260_v59 }
 0xab8   : > { %v4176_v23 = vpop.xlane.xlu0 %4175 }
 0xab9   : > { %4932 = vrsqrt.f32 %v4176_v23  ;;  %vm4280_vm0 = vcmp.eq.f32.partialorder %v4176_v23, inf  ;;  %v4283_v24 = vand.u32 2147483648, %v4176_v23  ;;  %vm4282_vm12 = vcmp.eq.f32.partialorder %v4176_v23, 0.0 }
 0xabc   : > { %v4170_v5 = vpop.xlane.xlu0 %4169 }
 0xabd   : > { %4934 = vrsqrt.f32 %v4170_v5  ;;  %vm4266_vm13 = vcmp.eq.f32.partialorder %v4170_v5, inf  ;;  %v4269_v55 = vand.u32 2147483648, %v4170_v5  ;;  %vm4268_vm1 = vcmp.eq.f32.partialorder %v4170_v5, 0.0 }
 0xabe   : > { %4936 = vrsqrt.f32 %v8084_v62 }
 0xac0   : > { %v4164_v41 = vpop.xlane.xlu0 %4163 }
 0xac1   : > { %4938 = vrsqrt.f32 %v4164_v41  ;;  %v4255_v34 = vand.u32 2147483648, %v4164_v41 }
 0xac4   : > { %v8087_v48 = vpop.xlane.xlu0 %4157 }
 0xac5   : > { %4940 = vrsqrt.f32 %v8087_v48  ;;  %vm4240_vm14 = vcmp.eq.f32.partialorder %v8087_v48, 0.0 }
 0xac6   : > { %v4933_v47 = vpop.eup %4932  ;;  %4942 = vrsqrt.f32 %v8090_v7 }
 0xac7   : > { %v4279_v6 = vmul.f32 %v4933_v47, %v4176_v23  ;;  %v8109_v47 = vpop.xlane.xlu1 %4142 }
 0xac8   : > { %v8093_v33 = vpop.xlane.xlu0 %4151 }
 0xac9   : > { %v4281_v60 = vsel %vm4280_vm0, %v4176_v23, %v4279_v6  ;;  %4944 = vrsqrt.f32 %v8093_v33  ;;  %vm4252_vm0 = vcmp.eq.f32.partialorder %v4164_v41, inf  ;;  %v4303_v23 = vmax.f32 %v4263_v52, 1e-12 }
 0xaca   : > { %v4935_v17 = vpop.eup %4934  ;;  %v4284_v43 = vsel %vm4282_vm12, %v4283_v24, %v4281_v60  ;;  %vm4254_vm12 = vcmp.eq.f32.partialorder %v4164_v41, 0.0  ;;  %v4241_v24 = vand.u32 2147483648, %v8087_v48 }
 0xacb   : > { %v4306_v22 = vmax.f32 %v4284_v43, 1e-12  ;;  %v4265_v20 = vmul.f32 %v4935_v17, %v4170_v5  ;;  %v4937_v30 = vpop.eup %4936 }
 0xacc   : > { %v4244_v35 = vmul.f32 %v4937_v30, %v8084_v62  ;;  %v8101_v29 = vpop.xlane.xlu0 %4145  ;;  %v8126_v30 = vpop.xlane.xlu1 %4136 }
 0xacd   : > { %4946 = vrcp.f32 %v4306_v22  ;;  %v4267_v51 = vsel %vm4266_vm13, %v4170_v5, %v4265_v20  ;;  %v4248_v5 = vand.u32 2147483648, %v8084_v62  ;;  %vm4238_vm13 = vcmp.eq.f32.partialorder %v8087_v48, inf }
 0xace   : > { %v4939_v12 = vpop.eup %4938  ;;  %v4270_v15 = vsel %vm4268_vm1, %v4269_v55, %v4267_v51  ;;  %4948 = vrcp.f32 %v4305_v16  ;;  %v4246_v54 = vsel %vm4245_vm5, %v8084_v62, %v4244_v35  ;;  %vm4247_vm1 = vcmp.eq.f32.partialorder %v8084_v62, 0.0 }
 0xacf   : > { %v4304_v50 = vmax.f32 %v4270_v15, 1e-12  ;;  %v4251_v14 = vmul.f32 %v4939_v12, %v4164_v41  ;;  %4950 = vrsqrt.f32 %v8096_v63  ;;  %v4249_v49 = vsel %vm4247_vm1, %v4248_v5, %v4246_v54 }
 0xad0   : > { %v8117_v60 = vpop.xlane.xlu0 %4139  ;;  %v4301_v17 = vmax.f32 %v4249_v49, 1e-12  ;;  %v4234_v16 = vand.u32 2147483648, %v8090_v7  ;;  %vm4224_vm5 = vcmp.eq.f32.partialorder %v8093_v33, inf  ;;  %vm4226_vm1 = vcmp.eq.f32.partialorder %v8093_v33, 0.0 }
 0xad1   : > { %v4253_v46 = vsel %vm4252_vm0, %v4164_v41, %v4251_v14  ;;  %4952 = vrcp.f32 %v4304_v50  ;;  %vm4231_vm0 = vcmp.eq.f32.partialorder %v8090_v7, inf }
 0xad2   : > { %v4941_v2 = vpop.eup %4940  ;;  %v4256_v9 = vsel %vm4254_vm12, %v4255_v34, %v4253_v46  ;;  %4954 = vrsqrt.f32 %v8101_v29  ;;  %vm4233_vm12 = vcmp.eq.f32.partialorder %v8090_v7, 0.0 }
 0xad3   : > { %v4237_v3 = vmul.f32 %v4941_v2, %v8087_v48  ;;  %v4943_v32 = vpop.eup %4942  ;;  %4956 = vrcp.f32 %v4303_v23  ;;  %v4302_v41 = vmax.f32 %v4256_v9, 1e-12  ;;  %v4220_v2 = vand.u32 2147483648, %v8096_v63 }
 0xad4   : > { %v4230_v13 = vmul.f32 %v4943_v32, %v8090_v7  ;;  %4958 = vrsqrt.f32 %v8109_v47  ;;  %v8138_v52 = vpop.xlane.xlu0 %4133 }
 0xad5   : > { %v4239_v62 = vsel %vm4238_vm13, %v8087_v48, %v4237_v3  ;;  %4960 = vrcp.f32 %v4302_v41  ;;  %vm4217_vm13 = vcmp.eq.f32.partialorder %v8096_v63, inf }
 0xad6   : > { %v4945_v6 = vpop.eup %4944  ;;  %v4242_v22 = vsel %vm4240_vm14, %v4241_v24, %v4239_v62  ;;  %v4232_v20 = vsel %vm4231_vm0, %v8090_v7, %v4230_v13  ;;  %4962 = vrsqrt.f32 %v8117_v60  ;;  %v4227_v7 = vand.u32 2147483648, %v8093_v33 }
 0xad7   : > { %v4223_v36 = vmul.f32 %v4945_v6, %v8093_v33  ;;  %4964 = vrcp.f32 %v4301_v17  ;;  %v4235_v12 = vsel %vm4233_vm12, %v4234_v16, %v4232_v20  ;;  %vm4219_vm14 = vcmp.eq.f32.partialorder %v8096_v63, 0.0 }
 0xad8   : > { %4966 = vrsqrt.f32 %v8126_v30  ;;  %v4299_v34 = vmax.f32 %v4235_v12, 1e-12  ;;  %vm4210_vm0 = vcmp.eq.f32.partialorder %v8101_v29, inf  ;;  %v4213_v6 = vand.u32 2147483648, %v8101_v29 }
 0xad9   : > { %v4225_v50 = vsel %vm4224_vm5, %v8093_v33, %v4223_v36  ;;  %v3603_v33 = vsel %vm7705_vm4, %v7699_v19, 0.0  ;;  %vm4212_vm4 = vcmp.eq.f32.partialorder %v8101_v29, 0.0  ;;  %vm4203_vm12 = vcmp.eq.f32.partialorder %v8109_v47, inf }
 0xada   : > { %v4947_v26 = vpop.eup %4946  ;;  %v4228_v23 = vsel %vm4226_vm1, %v4227_v7, %v4225_v50  ;;  %v3604_v3 = vsel %vm3585_vm2, %v3603_v33, 0.0  ;;  %vm4196_vm5 = vcmp.eq.f32.partialorder %v8117_v60, inf  ;;  %vm4189_vm1 = vcmp.eq.f32.partialorder %v8126_v30, inf }
 0xadb   : > { %v4337_v43 = vmul.f32 %v4947_v26, %v8034_v0  ;;  %v4949_v55 = vpop.eup %4948  ;;  %v4300_v0 = vmax.f32 %v4242_v22, 1e-12  ;;  %v4298_v32 = vmax.f32 %v4228_v23, 1e-12 }
 0xadc   : > { %v4951_v48 = vpop.eup %4950  ;;  %v4335_v59 = vmul.f32 %v4949_v55, %v7971_v28  ;;  %v3687_v55 = vsel %vm7869_vm3, %v7699_v19, 0.0  ;;  %vm4198_vm3 = vcmp.eq.f32.partialorder %v8117_v60, 0.0 }
 0xadd   : > { %4769 = vmatpush3.xpose.msk.msra.mxu0 %vm1628_vm11, %v4337_v43  ;;  %v4216_v15 = vmul.f32 %v4951_v48, %v8096_v63  ;;  %4968 = vrcp.f32 %v4300_v0 }
 0xade   : > { %4770 = vmatprep.subr.mxu0 %v8597_v39  ;;  %v4953_v51 = vpop.eup %4952  ;;  %4970 = vrsqrt.f32 %v8138_v52 }
 0xadf   : > { %v4955_v14 = vpop.eup %4954  ;;  %v4333_v35 = vmul.f32 %v4953_v51, %v8040_v57  ;;  %v4218_v9 = vsel %vm4217_vm13, %v8096_v63, %v4216_v15  ;;  %4972 = vrcp.f32 %v4299_v34  ;;  %v3631_v63 = vsel %vm7717_vm8, %v7699_v19, 0.0 }
 0xae0   : > { %v4957_v46 = vpop.eup %4956  ;;  %v4209_v54 = vmul.f32 %v4955_v14, %v8101_v29  ;;  %v4221_v24 = vsel %vm4219_vm14, %v4220_v2, %v4218_v9  ;;  %4974 = vrcp.f32 %v4298_v32  ;;  %vm4205_vm8 = vcmp.eq.f32.partialorder %v8109_v47, 0.0 }
 0xae1   : > { %4771 = vmatpush3.xpose.msk.msra.mxu0 %vm1628_vm11, %v4335_v59  ;;  %v4959_v57 = vpop.eup %4958  ;;  %v4331_v41 = vmul.f32 %v4957_v46, %v7980_v11  ;;  %v3632_v11 = vsel %vm3585_vm2, %v3631_v63, 0.0  ;;  %v4297_v8 = vmax.f32 %v4221_v24, 1e-12  ;;  %v4192_v34 = vand.u32 2147483648, %v8126_v30 }
 0xae2   : > { %v8140_v28 = vpop.f32.mrf.mxu1  ;;  %4772 = vmatprep.subr.mxu0 %v8597_v39  ;;  %v4961_v49 = vpop.eup %4960  ;;  %v4202_v62 = vmul.f32 %v4959_v57, %v8109_v47  ;;  %v4211_v26 = vsel %vm4210_vm0, %v8101_v29, %v4209_v54  ;;  %v4206_v29 = vand.u32 2147483648, %v8109_v47  ;;  %vm4191_vm13 = vcmp.eq.f32.partialorder %v8126_v30, 0.0 }
 0xae3   : > { %3801 = vmax.xlane.f32.xlu1 %v8140_v28  ;;  %v4963_v17 = vpop.eup %4962  ;;  %v4329_v43 = vmul.f32 %v4961_v49, %v8046_v31  ;;  %v4214_v22 = vsel %vm4212_vm4, %v4213_v6, %v4211_v26  ;;  %v3688_v31 = vsel %vm3585_vm2, %v3687_v55, 0.0  ;;  %4976 = vrcp.f32 %v4297_v8 }
 0xae4   : > { %v4732_v5 = vpop.f32.mrf.mxu1  ;;  %v4965_v16 = vpop.eup %4964  ;;  %v4204_v20 = vsel %vm4203_vm12, %v8109_v47, %v4202_v62  ;;  %v4195_v36 = vmul.f32 %v4963_v17, %v8117_v60  ;;  %v4296_v1 = vmax.f32 %v4214_v22, 1e-12  ;;  %v4199_v47 = vand.u32 2147483648, %v8117_v60 }
 0xae5   : > { %4773 = vmatpush3.xpose.msk.msra.mxu0 %vm1628_vm11, %v4333_v35  ;;  %v4967_v48 = vpop.eup %4966  ;;  %v4327_v0 = vmul.f32 %v4965_v16, %v7988_v44  ;;  %v4207_v51 = vsel %vm4205_vm8, %v4206_v29, %v4204_v20  ;;  %vm4182_vm14 = vcmp.eq.f32.partialorder %v8138_v52, inf  ;;  %v4185_v5 = vand.u32 2147483648, %v8138_v52 }
 0xae6   : > { %v3798_v56 = vpop.f32.mrf.mxu1  ;;  %4774 = vmatprep.subr.mxu0 %v8597_v39  ;;  %v4188_v12 = vmul.f32 %v4967_v48, %v8126_v30  ;;  %v4197_v7 = vsel %vm4196_vm5, %v8117_v60, %v4195_v36  ;;  %v4295_v50 = vmax.f32 %v4207_v51, 1e-12  ;;  %4978 = vrcp.f32 %v4296_v1 }
 0xae7   : > { %3605 = vadd.xlane.f32.xlu1 %v3604_v3  ;;  %v4200_v35 = vsel %vm4198_vm3, %v4199_v47, %v4197_v7  ;;  %vm4184_vm0 = vcmp.eq.f32.partialorder %v8138_v52, 0.0  ;;  %v3659_v62 = vsel %vm7734_vm15, %v7699_v19, 0.0 }
 0xae8   : > { %v4733_v13 = vpop.f32.mrf.mxu1  ;;  %v4190_v33 = vsel %vm4189_vm1, %v8126_v30, %v4188_v12  ;;  %4980 = vrcp.f32 %v4295_v50  ;;  %v4294_v46 = vmax.f32 %v4200_v35, 1e-12 }
 0xae9   : > { %4775 = vmatpush3.xpose.msk.msra.mxu0 %vm1628_vm11, %v4331_v41  ;;  %v4193_v23 = vsel %vm4191_vm13, %v4192_v34, %v4190_v33 }
 0xaea   : > { %4776 = vmatprep.subr.mxu0 %v8597_v39  ;;  %v4969_v59 = vpop.eup %4968  ;;  %v4293_v30 = vmax.f32 %v4193_v23, 1e-12  ;;  %4982 = vrcp.f32 %v4294_v46 }
 0xaeb   : > { %3633 = vadd.xlane.f32.xlu1 %v3632_v11  ;;  %v4971_v15 = vpop.eup %4970  ;;  %v4325_v44 = vmul.f32 %v4969_v59, %v8052_v40  ;;  %v3715_v11 = vsel %vm8020_vm9, %v7699_v19, 0.0 }
 0xaec   : > { %v4973_v14 = vpop.eup %4972  ;;  %v4181_v60 = vmul.f32 %v4971_v15, %v8138_v52  ;;  %4984 = vrcp.f32 %v4293_v30  ;;  %v3716_v8 = vsel %vm3585_vm2, %v3715_v11, 0.0 }
 0xaed   : > { %4777 = vmatpush3.xpose.msk.msra.mxu0 %vm1628_vm11, %v4329_v43  ;;  %v4323_v40 = vmul.f32 %v4973_v14, %v7994_v45  ;;  %v4975_v2 = vpop.eup %4974 }
 0xaee   : > { %4778 = vmatprep.subr.mxu0 %v8597_v39  ;;  %v4183_v9 = vsel %vm4182_vm14, %v8138_v52, %v4181_v60  ;;  %v4321_v54 = vmul.f32 %v4975_v2, %v8058_v53 }
 0xaef   : > { %3689 = vadd.xlane.f32.xlu1 %v3688_v31  ;;  %v4186_v56 = vsel %vm4184_vm0, %v4185_v5, %v4183_v9 }
 0xaf0   : > { %v4977_v57 = vpop.eup %4976  ;;  %v4292_v45 = vmax.f32 %v4186_v56, 1e-12 }
 0xaf1   : > { %4779 = vmatpush3.xpose.msk.msra.mxu0 %vm1628_vm11, %v4327_v0  ;;  %v4319_v3 = vmul.f32 %v4977_v57, %v8000_v61 }
 0xaf2   : > { %4780 = vmatprep.subr.mxu0 %v8597_v39  ;;  %4986 = vrcp.f32 %v4292_v45 }
 0xaf3   : > { %v4979_v32 = vpop.eup %4978 }
 0xaf4   : > { %v4317_v52 = vmul.f32 %v4979_v32, %v8064_v21 }
 0xaf5   : > { %4781 = vmatpush3.xpose.msk.msra.mxu0 %vm1628_vm11, %v4325_v44  ;;  %v4981_v41 = vpop.eup %4980 }
 0xaf6   : > { %4782 = vmatprep.subr.mxu0 %v8597_v39  ;;  %v4315_v53 = vmul.f32 %v4981_v41, %v8006_v27 }
 0xaf7   : > { %v4983_v63 = vpop.eup %4982 }
 0xaf8   : > { %v4313_v61 = vmul.f32 %v4983_v63, %v8070_v10 }
 0xaf9   : > { %4783 = vmatpush3.xpose.msk.msra.mxu0 %vm1628_vm11, %v4323_v40  ;;  %v4985_v49 = vpop.eup %4984 }
 0xafa   : > { %4784 = vmatprep.subr.mxu0 %v8597_v39  ;;  %v4311_v21 = vmul.f32 %v4985_v49, %v8012_v42 }
 0xafd   : > { %4785 = vmatpush3.xpose.msk.msra.mxu0 %vm1628_vm11, %v4321_v54 }
 0xafe   : > { %4786 = vmatprep.subr.mxu0 %v8597_v39 }
 0xaff   : > { %v4987_v24 = vpop.eup %4986 }
 0xb00   : > { %v4309_v27 = vmul.f32 %v4987_v24, %v8076_v37 }
 0xb01   : > { %4787 = vmatpush3.xpose.msk.msra.mxu0 %vm1628_vm11, %v4319_v3 }
 0xb02   : > { %4788 = vmatprep.subr.mxu0 %v8597_v39 }
 0xb05   : > { %4789 = vmatpush3.xpose.msk.msra.mxu0 %vm1628_vm11, %v4317_v52 }
 0xb06   : > { %4790 = vmatprep.subr.mxu0 %v8597_v39 }
 0xb09   : > { %4791 = vmatpush3.xpose.msk.msra.mxu0 %vm1628_vm11, %v4315_v53 }
 0xb0a   : > { %4792 = vmatprep.subr.mxu0 %v8597_v39 }
 0xb0d   : > { %4793 = vmatpush3.xpose.msk.msra.mxu0 %vm1628_vm11, %v4313_v61 }
 0xb0e   : > { %4794 = vmatprep.subr.mxu0 %v8597_v39 }
 0xb11   : > { %4795 = vmatpush3.xpose.msk.msra.mxu0 %vm1628_vm11, %v4311_v21 }
 0xb12   : > { %4796 = vmatprep.subr.mxu0 %v8597_v39  ;;  %v3660_v39 = vsel %vm3585_vm2, %v3659_v62, 0.0  ;;  %vm3819_vm2 = vcmp.eq.s32.totalorder %v8634_v58, 8 }
 0xb15   : > { %4797 = vmatpush3.xpose.msk.msra.mxu0 %vm1628_vm11, %v4309_v27 }
 0xb18   : > { %4799 = vmatmul.mubr.msk.f32.vlgmr.msra.gmra.mxu0 %vm1628_vm11, %v7693_v18 }
 0xb6c   : > { %v3802_v10 = vpop.xlane.xlu1 %3801 }
 0xb6d   : > { %vm3803_vm4 = vcmp.ge.f32.partialorder %v8140_v28, %v3802_v10 }
 0xb6e   : > { %v3804_v6 = vsel %vm3803_vm4, %v8634_v58, 128 }
 0xb6f   : > { %v3806_v42 = vshra.s32 %v3804_v6, 16  ;;  %v3805_v28 = vand.u32 65535, %v3804_v6 }
 0xb70   : > { %v3606_v43 = vpop.xlane.xlu1 %3605 }
 0xb71   : > { %v3808_v13 = vcvt.s32.f32 %v3806_v42  ;;  %v3807_v26 = vcvt.s32.f32 %v3805_v28  ;;  %v3608_v22 = vsel %vm3607_vm6, %v3606_v43, 0.0  ;;  %vm8646_vm6 = vcmp.eq.s32.totalorder %v8634_v58, 3 }
 0xb73   : > { %3809 = vmin.xlane.f32.xlu0 %v3808_v13 }
 0xb74   : > { %v3634_v16 = vpop.xlane.xlu1 %3633 }
 0xb75   : > { %v3636_v20 = vsel %vm3635_vm7, %v3634_v16, %v3608_v22  ;;  %vm8647_vm7 = vcmp.eq.s32.totalorder %v8634_v58, 4 }
 0xb77   : > { %3661 = vadd.xlane.f32.xlu0 %v3660_v39 }
 0xb78   : > { %v3690_v31 = vpop.xlane.xlu1 %3689 }
 0xbd8   : > { %v4454_v18 = vpop.f32.mrf.mxu0 }
 0xbd9   : > { %4458 = vst [vmem:[%s240_s23] sm:$0xff] %v4454_v18 }
 0xbda   : > { %v4800_v37 = vpop.f32.mrf.mxu0 }
 0xbfc   : > { %v3810_v17 = vpop.xlane.xlu0 %3809 }
 0xbfd   : > { %vm3811_vm11 = vcmp.eq.f32.partialorder %v3808_v13, %v3810_v17  ;;  %v3816_v29 = vcvt.f32.s32 %v3810_v17 }
 0xbfe   : > { %v3812_v4 = vsel %vm3811_vm11, %v3807_v26, inf }
 0xbff   : > { %3813 = vmin.xlane.f32.xlu0 %v3812_v4  ;;  %v3817_v48 = vshll.u32 %v3816_v29, 16 }
 0xc00   : > { %v3662_v55 = vpop.xlane.xlu0 %3661 }
 0xc01   : > { %v3664_v25 = vsel %vm3663_vm10, %v3662_v55, %v3636_v20 }
 0xc02   : > { %v3692_v59 = vsel %vm8646_vm6, %v3690_v31, %v3664_v25 }
 0xc03   : > { %3717 = vadd.xlane.f32.xlu0 %v3716_v8 }
 0xc88   : > { %v3814_v36 = vpop.xlane.xlu0 %3813 }
 0xc89   : > { %v3815_v19 = vcvt.f32.s32 %v3814_v36 }
 0xc8b   : > { %v3818_v1 = vadd.s32 %v3817_v48, %v3815_v19 }
 0xc8c   : > { %v3718_v0 = vpop.xlane.xlu0 %3717 }
 0xc8d   : > { %v3820_v51 = vsel %vm3819_vm2, %v3818_v1, %v8027_v38  ;;  %v3720_v47 = vsel %vm8647_vm7, %v3718_v0, %v3692_v59 }
 0xc8e   : > { %4460 = vst [vmem:[%s248_s25] sm:$0xff] %v3820_v51  ;;  %4459 = vst [vmem:[%s244_s29] sm:$0xff] %v3720_v47 }
 0xc8f PF: > { %s16_s18 = sadd.s32 1, %s4994_s18  }
 0xc90   : > { %p13_p5 = scmp.ge.s32.totalorder %s16_s18, 4  }
 0xc92   :  { %15 = sbr.rel (!%p13_p5) target bundleno = 1 (0x1), region = 86 }

</bundles_post_ra>
